<compile_context>
chip_gen: v7x
topology: tpu7x:2x2x1
jax: 0.10.0
libtpu: 0.0.40
codegen_flags: <defaults>
</compile_context>

<pallas_src>
import functools

import jax
import jax.numpy as jnp
from jax.experimental import pallas as pl
from jax.experimental.pallas import tpu as pltpu


# ------------------------------ fused kernel ---------------------------------
def _gru_gates(gi, gh, bhn, h_prev, H):
    """One direction's gate math. gi/gh: (B, 3H) with [r|z|n] columns.
    bhn: (B, H) pre-broadcast b_hn (lives inside r*(W_hn h + b_hn))."""
    r = jax.nn.sigmoid(gi[:, 0:H] + gh[:, 0:H])
    z = jax.nn.sigmoid(gi[:, H:2 * H] + gh[:, H:2 * H])
    n = jnp.tanh(gi[:, 2 * H:3 * H] + r * (gh[:, 2 * H:3 * H] + bhn))
    return (1.0 - z) * n + z * h_prev


def make_fused_gru_kernel(T, B, H, D, L, V):
    DH = D * H

    def kernel(src_ref, wih_ref, whh_ref, bias_ref, fc_ref, out_ref, x_scr):
        # ---- embedding gather fused as a one-hot matmul ---------------------
        # Layer-0 W_ih was pre-folded with the embedding table host-side, so
        # gi0 = onehot(src) @ (E @ W_ih0) == emb[src] @ W_ih0, exactly.
        src = src_ref[...]                                          # (T*B,1) i32
        tok = jax.lax.broadcasted_iota(jnp.int32, (T * B, V), 1)
        x = (tok == src).astype(jnp.float32)                        # (T*B, V)

        h_f_last = None
        h_b_first = None
        row = 0
        for l in range(L):
            f_in = V if l == 0 else DH
            wih = wih_ref[row:row + f_in, :]                        # (f_in, 3*DH)
            row += f_in
            bi = bias_ref[l:l + 1, 0:3 * DH]                        # (1, 3*DH)

            # Hoisted input projection: all timesteps, both directions.
            gi_all = jnp.dot(x, wih, preferred_element_type=jnp.float32) + bi

            whh_f = whh_ref[(l * D) * H:(l * D + 1) * H, :]         # (H, 3H)
            bhn_f = jnp.broadcast_to(
                bias_ref[l:l + 1, 3 * DH:3 * DH + H], (B, H))       # hoisted
            if D == 2:
                whh_b = whh_ref[(l * D + 1) * H:(l * D + 2) * H, :]
                bhn_b = jnp.broadcast_to(
                    bias_ref[l:l + 1, 3 * DH + H:3 * DH + 2 * H], (B, H))

            h_f = jnp.zeros((B, H), jnp.float32)
            h_b = jnp.zeros((B, H), jnp.float32)
            for s in range(T):
                # forward direction processes time s
                gh_f = jnp.dot(h_f, whh_f, preferred_element_type=jnp.float32)
                gi_f = gi_all[s * B:(s + 1) * B, 0:3 * H]
                h_f = _gru_gates(gi_f, gh_f, bhn_f, h_f, H)
                if l < L - 1:
                    x_scr[s * B:(s + 1) * B, 0:H] = h_f

                if D == 2:
                    # backward direction processes time T-1-s; the reversal is
                    # pure static indexing of the hoisted gi buffer.
                    sb = T - 1 - s
                    gh_b = jnp.dot(h_b, whh_b,
                                   preferred_element_type=jnp.float32)
                    gi_b = gi_all[sb * B:(sb + 1) * B, 3 * H:6 * H]
                    h_b = _gru_gates(gi_b, gh_b, bhn_b, h_b, H)
                    if l < L - 1:
                        x_scr[sb * B:(sb + 1) * B, H:2 * H] = h_b
                    if l == L - 1 and s == 0:
                        h_b_first = h_b   # out[:, -1, bwd half]

            if l == L - 1:
                h_f_last = h_f
            else:
                x = x_scr[...]                                      # (T*B, DH)

        # ---- fused final Linear on the last timestep (no lane concat) -------
        fc = fc_ref[...]                                            # (DH+1, V)
        out = jnp.dot(h_f_last, fc[0:H, :],
                      preferred_element_type=jnp.float32)
        if D == 2:
            out = out + jnp.dot(h_b_first, fc[H:DH, :],
                                preferred_element_type=jnp.float32)
        out_ref[...] = out + fc[DH:DH + 1, :]

    return kernel


# -------------------- one-time parameter packing (host-side) ------------------
def pack_params(params, config):
    """PyTorch-layout per-direction weights -> 4 packed slabs. Run ONCE."""
    H = config["hidden_size"]
    D = 2 if config["bidirectional"] else 1
    L = config["num_layers"]
    DH = D * H
    emb = params["embedding"].astype(jnp.float32)

    wih_rows, whh_rows, bias_rows = [], [], []
    for l in range(L):
        wih_cols, bi_cols, bhn_cols = [], [], []
        for d in range(D):
            wih, whh, bih, bhh = params["gru"][(l, d)]  # (3H,Fin),(3H,H),(3H,),(3H,)
            wih = wih.astype(jnp.float32)
            whh = whh.astype(jnp.float32)
            bih = bih.astype(jnp.float32)
            bhh = bhh.astype(jnp.float32)
            wih_cols.append(wih.T)                       # (Fin, 3H)
            whh_rows.append(whh.T)                       # (H, 3H)
            # fold b_hh into b_ih for r/z gates only; b_hn must stay inside
            # r*(W_hn h + b_hn) to match PyTorch.
            bi_cols.append(bih.at[0:2 * H].add(bhh[0:2 * H]))
            bhn_cols.append(bhh[2 * H:3 * H])
        wih_l = jnp.concatenate(wih_cols, axis=1)        # (Fin, 3*DH)
        if l == 0:
            wih_l = emb @ wih_l                          # fold embedding gather
        wih_rows.append(wih_l)
        bias_rows.append(jnp.concatenate(bi_cols + bhn_cols).reshape(1, -1))

    W_IH = jnp.concatenate(wih_rows, axis=0)             # (V+(L-1)*DH, 3*DH)
    W_HH = jnp.concatenate(whh_rows, axis=0)             # (L*D*H, 3H)
    BIAS = jnp.concatenate(bias_rows, axis=0)            # (L, 4*DH)
    FC = jnp.concatenate([params["fc_w"].T.astype(jnp.float32),
                          params["fc_b"].reshape(1, -1).astype(jnp.float32)],
                         axis=0)                         # (DH+1, V)
    return (W_IH, W_HH, BIAS, FC)


# ------------------------------ model forward --------------------------------
def gru_model_forward(src, tgt, packed, config):
    del tgt  # the PyTorch forward ignores tgt as well
    B, T = src.shape
    H = config["hidden_size"]
    D = 2 if config["bidirectional"] else 1
    L = config["num_layers"]
    V = config["num_tokens"]
    DH = D * H
    W_IH, W_HH, BIAS, FC = packed

    # Tiny int reorder to time-major rows; everything else is in the kernel.
    src_tm = jnp.transpose(src).reshape(T * B, 1).astype(jnp.int32)

    # Small advisory cost estimate (keeps XLA from over-scheduling around us).
    flops = 2 * B * DH * V
    f_in = V
    for _ in range(L):
        flops += 2 * (T * B) * f_in * 3 * DH + 2 * T * D * B * H * 3 * H
        f_in = DH
    bytes_accessed = 4 * (W_IH.size + W_HH.size + BIAS.size + FC.size
                          + T * B + B * V)

    kernel = make_fused_gru_kernel(T, B, H, D, L, V)
    # TODO(synk): inter-layer dropout is a training-only op (eval no-op here).
    return pl.pallas_call(
        kernel,
        out_shape=jax.ShapeDtypeStruct((B, V), jnp.float32),
        scratch_shapes=[pltpu.VMEM((T * B, DH), jnp.float32)],
        cost_estimate=pl.CostEstimate(
            flops=int(flops),
            transcendentals=int(T * L * D * B * 3 * H),
            bytes_accessed=int(bytes_accessed)),
    )(src_tm, W_IH, W_HH, BIAS, FC)


# --------------------------- deterministic params ----------------------------
def init_params(key, config):
    E, H = config["embedding_size"], config["hidden_size"]
    V, L = config["num_tokens"], config["num_layers"]
    D = 2 if config["bidirectional"] else 1

    k_emb, k_gru, k_fc = jax.random.split(key, 3)
    params = {"embedding": jax.random.normal(k_emb, (V, E), jnp.float32)}

    bound = 1.0 / (H ** 0.5)
    gru_params = {}
    gkeys = jax.random.split(k_gru, L * D)
    idx = 0
    for l in range(L):
        f_in = E if l == 0 else H * D
        for d in range(D):
            kk = jax.random.split(gkeys[idx], 4)
            idx += 1
            wih = jax.random.uniform(kk[0], (3 * H, f_in), jnp.float32, -bound, bound)
            whh = jax.random.uniform(kk[1], (3 * H, H), jnp.float32, -bound, bound)
            bih = jax.random.uniform(kk[2], (3 * H,), jnp.float32, -bound, bound)
            bhh = jax.random.uniform(kk[3], (3 * H,), jnp.float32, -bound, bound)
            gru_params[(l, d)] = (wih, whh, bih, bhh)
    params["gru"] = gru_params

    fk1, fk2 = jax.random.split(k_fc)
    fbound = 1.0 / ((H * D) ** 0.5)
    params["fc_w"] = jax.random.uniform(fk1, (V, H * D), jnp.float32, -fbound, fbound)
    params["fc_b"] = jax.random.uniform(fk2, (V,), jnp.float32, -fbound, fbound)
    return params


# ------------------------------ pure-JAX reference ---------------------------
def _ref_forward(src, params, config):
    H = config["hidden_size"]
    D = 2 if config["bidirectional"] else 1
    x = jnp.take(params["embedding"], src, axis=0)            # (B, T, E)
    B, T, _ = x.shape

    def cell(x_t, h, wih, whh, bih, bhh):
        gi = x_t @ wih.T + bih
        gh = h @ whh.T + bhh
        r = jax.nn.sigmoid(gi[:, :H] + gh[:, :H])
        z = jax.nn.sigmoid(gi[:, H:2 * H] + gh[:, H:2 * H])
        n = jnp.tanh(gi[:, 2 * H:] + r * gh[:, 2 * H:])
        return (1 - z) * n + z * h

    layer_in = x
    for l in range(config["num_layers"]):
        outs = []
        for d in range(D):
            wih, whh, bih, bhh = params["gru"][(l, d)]
            seq = layer_in if d == 0 else layer_in[:, ::-1, :]
            h = jnp.zeros((B, H), jnp.float32)
            ys = []
            for t in range(T):
                h = cell(seq[:, t, :], h, wih, whh, bih, bhh)
                ys.append(h)
            o = jnp.stack(ys, axis=1)
            if d == 1:
                o = o[:, ::-1, :]
            outs.append(o)
        layer_in = jnp.concatenate(outs, axis=-1) if D == 2 else outs[0]
    return layer_in[:, -1, :] @ params["fc_w"].T + params["fc_b"]


# ----------------------------------- main -------------------------------------
if __name__ == "__main__":
    config = {
        "num_tokens": 32,
        "embedding_size": 16,
        "hidden_size": 32,
        "num_layers": 2,
        "bidirectional": True,
        "dropout": 0.0,
    }
    B, T = 2, 8

    key = jax.random.PRNGKey(0)
    k_src, k_tgt, k_par = jax.random.split(key, 3)
    src = jax.random.randint(k_src, (B, T), 0, config["num_tokens"], dtype=jnp.int32)
    tgt = jax.random.randint(k_tgt, (B, T), 0, config["num_tokens"], dtype=jnp.int32)
    params = init_params(k_par, config)

    # One-time packing, hoisted out of the per-call forward path.
    packed = pack_params(params, config)
    packed = tuple(jax.block_until_ready(a) for a in packed)

    fwd = jax.jit(functools.partial(gru_model_forward, config=config))
    logits = fwd(src, tgt, packed)
    logits = jax.block_until_ready(logits)
    assert logits.shape == (B, config["num_tokens"]), logits.shape

    ref = _ref_forward(src, params, config)
    max_err = jnp.max(jnp.abs(logits - ref))
    assert jnp.allclose(logits, ref, rtol=1e-3, atol=1e-3), f"max abs err {max_err}"

    print("KERNEL_OK")
</pallas_src>

<mosaic_0001>
module attributes {stable_mosaic.version = 11 : i64} {
  func.func @kernel(%arg0: memref<16x1xi32, #tpu.memory_space<vmem>>, %arg1: memref<96x192xf32, #tpu.memory_space<vmem>>, %arg2: memref<128x96xf32, #tpu.memory_space<vmem>>, %arg3: memref<2x256xf32, #tpu.memory_space<vmem>>, %arg4: memref<65x32xf32, #tpu.memory_space<vmem>>, %arg5: memref<2x32xf32, #tpu.memory_space<vmem>>, %arg6: memref<16x64xf32, #tpu.memory_space<vmem>>) attributes {dimension_semantics = [], scalar_prefetch = 0 : i64, scratch_operands = 1 : i64, tpu.core_type = #tpu.core_type<tc>} {
    %c0 = arith.constant 0 : index
    %c0_0 = arith.constant 0 : index
    %0 = vector.load %arg0[%c0, %c0_0] : memref<16x1xi32, #tpu.memory_space<vmem>>, vector<16x1xi32>
    %1 = tpu.iota {dimensions = array<i32: 1>} : vector<16x32xi32>
    %2 = vector.broadcast %0 : vector<16x1xi32> to vector<16x32xi32>
    %3 = arith.cmpi eq, %1, %2 : vector<16x32xi32>
    %4 = arith.extui %3 : vector<16x32xi1> to vector<16x32xi32>
    %5 = arith.sitofp %4 : vector<16x32xi32> to vector<16x32xf32>
    %c0_1 = arith.constant 0 : index
    %c0_2 = arith.constant 0 : index
    %6 = vector.load %arg1[%c0_1, %c0_2] : memref<96x192xf32, #tpu.memory_space<vmem>>, vector<32x192xf32>
    %c0_3 = arith.constant 0 : index
    %c0_4 = arith.constant 0 : index
    %7 = vector.load %arg3[%c0_3, %c0_4] : memref<2x256xf32, #tpu.memory_space<vmem>>, vector<1x192xf32>
    %cst = arith.constant dense<0.000000e+00> : vector<16x192xf32>
    %8 = tpu.matmul %5, %6, %cst {dimension_numbers = #tpu.dot_dimension_numbers<[1], [0], [0], [1], [0, 0, 1, 1], [], []>} : vector<16x32xf32>, vector<32x192xf32>, vector<16x192xf32> -> vector<16x192xf32>
    %9 = vector.broadcast %7 : vector<1x192xf32> to vector<16x192xf32>
    %10 = arith.addf %8, %9 : vector<16x192xf32>
    %c0_5 = arith.constant 0 : index
    %c0_6 = arith.constant 0 : index
    %11 = vector.load %arg2[%c0_5, %c0_6] : memref<128x96xf32, #tpu.memory_space<vmem>>, vector<32x96xf32>
    %c0_7 = arith.constant 0 : index
    %c192 = arith.constant 192 : index
    %12 = vector.load %arg3[%c0_7, %c192] : memref<2x256xf32, #tpu.memory_space<vmem>>, vector<1x32xf32>
    %13 = vector.shape_cast %12 : vector<1x32xf32> to vector<1x32xf32>
    %14 = vector.broadcast %13 : vector<1x32xf32> to vector<2x32xf32>
    %c32 = arith.constant 32 : index
    %c0_8 = arith.constant 0 : index
    %15 = vector.load %arg2[%c32, %c0_8] : memref<128x96xf32, #tpu.memory_space<vmem>>, vector<32x96xf32>
    %c0_9 = arith.constant 0 : index
    %c224 = arith.constant 224 : index
    %16 = vector.load %arg3[%c0_9, %c224] : memref<2x256xf32, #tpu.memory_space<vmem>>, vector<1x32xf32>
    %17 = vector.shape_cast %16 : vector<1x32xf32> to vector<1x32xf32>
    %18 = vector.broadcast %17 : vector<1x32xf32> to vector<2x32xf32>
    %cst_10 = arith.constant 0.000000e+00 : f32
    %19 = vector.broadcast %cst_10 : f32 to vector<2x32xf32>
    %cst_11 = arith.constant 0.000000e+00 : f32
    %20 = vector.broadcast %cst_11 : f32 to vector<2x32xf32>
    %cst_12 = arith.constant dense<0.000000e+00> : vector<2x96xf32>
    %21 = tpu.matmul %19, %11, %cst_12 {dimension_numbers = #tpu.dot_dimension_numbers<[1], [0], [0], [1], [0, 0, 1, 1], [], []>} : vector<2x32xf32>, vector<32x96xf32>, vector<2x96xf32> -> vector<2x96xf32>
    %22 = vector.extract_strided_slice %10 {offsets = [0, 0], sizes = [2, 96], strides = [1, 1]} : vector<16x192xf32> to vector<2x96xf32>
    %23 = vector.extract_strided_slice %22 {offsets = [0, 0], sizes = [2, 32], strides = [1, 1]} : vector<2x96xf32> to vector<2x32xf32>
    %24 = vector.extract_strided_slice %21 {offsets = [0, 0], sizes = [2, 32], strides = [1, 1]} : vector<2x96xf32> to vector<2x32xf32>
    %25 = arith.addf %23, %24 : vector<2x32xf32>
    %26 = arith.negf %25 : vector<2x32xf32>
    %27 = math.exp %26 : vector<2x32xf32>
    %cst_13 = arith.constant 1.000000e+00 : f32
    %28 = vector.broadcast %cst_13 : f32 to vector<2x32xf32>
    %29 = arith.addf %28, %27 : vector<2x32xf32>
    %30 = arith.divf %28, %29 : vector<2x32xf32>
    %31 = vector.extract_strided_slice %22 {offsets = [0, 32], sizes = [2, 32], strides = [1, 1]} : vector<2x96xf32> to vector<2x32xf32>
    %32 = vector.extract_strided_slice %21 {offsets = [0, 32], sizes = [2, 32], strides = [1, 1]} : vector<2x96xf32> to vector<2x32xf32>
    %33 = arith.addf %31, %32 : vector<2x32xf32>
    %34 = arith.negf %33 : vector<2x32xf32>
    %35 = math.exp %34 : vector<2x32xf32>
    %cst_14 = arith.constant 1.000000e+00 : f32
    %36 = vector.broadcast %cst_14 : f32 to vector<2x32xf32>
    %37 = arith.addf %36, %35 : vector<2x32xf32>
    %38 = arith.divf %36, %37 : vector<2x32xf32>
    %39 = vector.extract_strided_slice %22 {offsets = [0, 64], sizes = [2, 32], strides = [1, 1]} : vector<2x96xf32> to vector<2x32xf32>
    %40 = vector.extract_strided_slice %21 {offsets = [0, 64], sizes = [2, 32], strides = [1, 1]} : vector<2x96xf32> to vector<2x32xf32>
    %41 = arith.addf %40, %14 : vector<2x32xf32>
    %42 = arith.mulf %30, %41 : vector<2x32xf32>
    %43 = arith.addf %39, %42 : vector<2x32xf32>
    %44 = math.tanh %43 : vector<2x32xf32>
    %cst_15 = arith.constant 1.000000e+00 : f32
    %45 = vector.broadcast %cst_15 : f32 to vector<2x32xf32>
    %46 = arith.subf %45, %38 : vector<2x32xf32>
    %47 = arith.mulf %46, %44 : vector<2x32xf32>
    %48 = arith.mulf %38, %19 : vector<2x32xf32>
    %49 = arith.addf %47, %48 : vector<2x32xf32>
    %c0_16 = arith.constant 0 : index
    %c0_17 = arith.constant 0 : index
    %50 = vector.load %arg6[%c0_16, %c0_17] : memref<16x64xf32, #tpu.memory_space<vmem>>, vector<2x32xf32>
    tpu.vector_store %arg6[%c0_16, %c0_17], %49 {strides = array<i32>} : memref<16x64xf32, #tpu.memory_space<vmem>>, vector<2x32xf32>,
    %cst_18 = arith.constant dense<0.000000e+00> : vector<2x96xf32>
    %51 = tpu.matmul %20, %15, %cst_18 {dimension_numbers = #tpu.dot_dimension_numbers<[1], [0], [0], [1], [0, 0, 1, 1], [], []>} : vector<2x32xf32>, vector<32x96xf32>, vector<2x96xf32> -> vector<2x96xf32>
    %52 = vector.extract_strided_slice %10 {offsets = [14, 96], sizes = [2, 96], strides = [1, 1]} : vector<16x192xf32> to vector<2x96xf32>
    %53 = vector.extract_strided_slice %52 {offsets = [0, 0], sizes = [2, 32], strides = [1, 1]} : vector<2x96xf32> to vector<2x32xf32>
    %54 = vector.extract_strided_slice %51 {offsets = [0, 0], sizes = [2, 32], strides = [1, 1]} : vector<2x96xf32> to vector<2x32xf32>
    %55 = arith.addf %53, %54 : vector<2x32xf32>
    %56 = arith.negf %55 : vector<2x32xf32>
    %57 = math.exp %56 : vector<2x32xf32>
    %cst_19 = arith.constant 1.000000e+00 : f32
    %58 = vector.broadcast %cst_19 : f32 to vector<2x32xf32>
    %59 = arith.addf %58, %57 : vector<2x32xf32>
    %60 = arith.divf %58, %59 : vector<2x32xf32>
    %61 = vector.extract_strided_slice %52 {offsets = [0, 32], sizes = [2, 32], strides = [1, 1]} : vector<2x96xf32> to vector<2x32xf32>
    %62 = vector.extract_strided_slice %51 {offsets = [0, 32], sizes = [2, 32], strides = [1, 1]} : vector<2x96xf32> to vector<2x32xf32>
    %63 = arith.addf %61, %62 : vector<2x32xf32>
    %64 = arith.negf %63 : vector<2x32xf32>
    %65 = math.exp %64 : vector<2x32xf32>
    %cst_20 = arith.constant 1.000000e+00 : f32
    %66 = vector.broadcast %cst_20 : f32 to vector<2x32xf32>
    %67 = arith.addf %66, %65 : vector<2x32xf32>
    %68 = arith.divf %66, %67 : vector<2x32xf32>
    %69 = vector.extract_strided_slice %52 {offsets = [0, 64], sizes = [2, 32], strides = [1, 1]} : vector<2x96xf32> to vector<2x32xf32>
    %70 = vector.extract_strided_slice %51 {offsets = [0, 64], sizes = [2, 32], strides = [1, 1]} : vector<2x96xf32> to vector<2x32xf32>
    %71 = arith.addf %70, %18 : vector<2x32xf32>
    %72 = arith.mulf %60, %71 : vector<2x32xf32>
    %73 = arith.addf %69, %72 : vector<2x32xf32>
    %74 = math.tanh %73 : vector<2x32xf32>
    %cst_21 = arith.constant 1.000000e+00 : f32
    %75 = vector.broadcast %cst_21 : f32 to vector<2x32xf32>
    %76 = arith.subf %75, %68 : vector<2x32xf32>
    %77 = arith.mulf %76, %74 : vector<2x32xf32>
    %78 = arith.mulf %68, %20 : vector<2x32xf32>
    %79 = arith.addf %77, %78 : vector<2x32xf32>
    %c14 = arith.constant 14 : index
    %c32_22 = arith.constant 32 : index
    %80 = vector.load %arg6[%c14, %c32_22] : memref<16x64xf32, #tpu.memory_space<vmem>>, vector<2x32xf32>
    tpu.vector_store %arg6[%c14, %c32_22], %79 {strides = array<i32>} : memref<16x64xf32, #tpu.memory_space<vmem>>, vector<2x32xf32>,
    %cst_23 = arith.constant dense<0.000000e+00> : vector<2x96xf32>
    %81 = tpu.matmul %49, %11, %cst_23 {dimension_numbers = #tpu.dot_dimension_numbers<[1], [0], [0], [1], [0, 0, 1, 1], [], []>} : vector<2x32xf32>, vector<32x96xf32>, vector<2x96xf32> -> vector<2x96xf32>
    %82 = vector.extract_strided_slice %10 {offsets = [2, 0], sizes = [2, 96], strides = [1, 1]} : vector<16x192xf32> to vector<2x96xf32>
    %83 = vector.extract_strided_slice %82 {offsets = [0, 0], sizes = [2, 32], strides = [1, 1]} : vector<2x96xf32> to vector<2x32xf32>
    %84 = vector.extract_strided_slice %81 {offsets = [0, 0], sizes = [2, 32], strides = [1, 1]} : vector<2x96xf32> to vector<2x32xf32>
    %85 = arith.addf %83, %84 : vector<2x32xf32>
    %86 = arith.negf %85 : vector<2x32xf32>
    %87 = math.exp %86 : vector<2x32xf32>
    %cst_24 = arith.constant 1.000000e+00 : f32
    %88 = vector.broadcast %cst_24 : f32 to vector<2x32xf32>
    %89 = arith.addf %88, %87 : vector<2x32xf32>
    %90 = arith.divf %88, %89 : vector<2x32xf32>
    %91 = vector.extract_strided_slice %82 {offsets = [0, 32], sizes = [2, 32], strides = [1, 1]} : vector<2x96xf32> to vector<2x32xf32>
    %92 = vector.extract_strided_slice %81 {offsets = [0, 32], sizes = [2, 32], strides = [1, 1]} : vector<2x96xf32> to vector<2x32xf32>
    %93 = arith.addf %91, %92 : vector<2x32xf32>
    %94 = arith.negf %93 : vector<2x32xf32>
    %95 = math.exp %94 : vector<2x32xf32>
    %cst_25 = arith.constant 1.000000e+00 : f32
    %96 = vector.broadcast %cst_25 : f32 to vector<2x32xf32>
    %97 = arith.addf %96, %95 : vector<2x32xf32>
    %98 = arith.divf %96, %97 : vector<2x32xf32>
    %99 = vector.extract_strided_slice %82 {offsets = [0, 64], sizes = [2, 32], strides = [1, 1]} : vector<2x96xf32> to vector<2x32xf32>
    %100 = vector.extract_strided_slice %81 {offsets = [0, 64], sizes = [2, 32], strides = [1, 1]} : vector<2x96xf32> to vector<2x32xf32>
    %101 = arith.addf %100, %14 : vector<2x32xf32>
    %102 = arith.mulf %90, %101 : vector<2x32xf32>
    %103 = arith.addf %99, %102 : vector<2x32xf32>
    %104 = math.tanh %103 : vector<2x32xf32>
    %cst_26 = arith.constant 1.000000e+00 : f32
    %105 = vector.broadcast %cst_26 : f32 to vector<2x32xf32>
    %106 = arith.subf %105, %98 : vector<2x32xf32>
    %107 = arith.mulf %106, %104 : vector<2x32xf32>
    %108 = arith.mulf %98, %49 : vector<2x32xf32>
    %109 = arith.addf %107, %108 : vector<2x32xf32>
    %c2 = arith.constant 2 : index
    %c0_27 = arith.constant 0 : index
    %110 = vector.load %arg6[%c2, %c0_27] : memref<16x64xf32, #tpu.memory_space<vmem>>, vector<2x32xf32>
    tpu.vector_store %arg6[%c2, %c0_27], %109 {strides = array<i32>} : memref<16x64xf32, #tpu.memory_space<vmem>>, vector<2x32xf32>,
    %cst_28 = arith.constant dense<0.000000e+00> : vector<2x96xf32>
    %111 = tpu.matmul %79, %15, %cst_28 {dimension_numbers = #tpu.dot_dimension_numbers<[1], [0], [0], [1], [0, 0, 1, 1], [], []>} : vector<2x32xf32>, vector<32x96xf32>, vector<2x96xf32> -> vector<2x96xf32>
    %112 = vector.extract_strided_slice %10 {offsets = [12, 96], sizes = [2, 96], strides = [1, 1]} : vector<16x192xf32> to vector<2x96xf32>
    %113 = vector.extract_strided_slice %112 {offsets = [0, 0], sizes = [2, 32], strides = [1, 1]} : vector<2x96xf32> to vector<2x32xf32>
    %114 = vector.extract_strided_slice %111 {offsets = [0, 0], sizes = [2, 32], strides = [1, 1]} : vector<2x96xf32> to vector<2x32xf32>
    %115 = arith.addf %113, %114 : vector<2x32xf32>
    %116 = arith.negf %115 : vector<2x32xf32>
    %117 = math.exp %116 : vector<2x32xf32>
    %cst_29 = arith.constant 1.000000e+00 : f32
    %118 = vector.broadcast %cst_29 : f32 to vector<2x32xf32>
    %119 = arith.addf %118, %117 : vector<2x32xf32>
    %120 = arith.divf %118, %119 : vector<2x32xf32>
    %121 = vector.extract_strided_slice %112 {offsets = [0, 32], sizes = [2, 32], strides = [1, 1]} : vector<2x96xf32> to vector<2x32xf32>
    %122 = vector.extract_strided_slice %111 {offsets = [0, 32], sizes = [2, 32], strides = [1, 1]} : vector<2x96xf32> to vector<2x32xf32>
    %123 = arith.addf %121, %122 : vector<2x32xf32>
    %124 = arith.negf %123 : vector<2x32xf32>
    %125 = math.exp %124 : vector<2x32xf32>
    %cst_30 = arith.constant 1.000000e+00 : f32
    %126 = vector.broadcast %cst_30 : f32 to vector<2x32xf32>
    %127 = arith.addf %126, %125 : vector<2x32xf32>
    %128 = arith.divf %126, %127 : vector<2x32xf32>
    %129 = vector.extract_strided_slice %112 {offsets = [0, 64], sizes = [2, 32], strides = [1, 1]} : vector<2x96xf32> to vector<2x32xf32>
    %130 = vector.extract_strided_slice %111 {offsets = [0, 64], sizes = [2, 32], strides = [1, 1]} : vector<2x96xf32> to vector<2x32xf32>
    %131 = arith.addf %130, %18 : vector<2x32xf32>
    %132 = arith.mulf %120, %131 : vector<2x32xf32>
    %133 = arith.addf %129, %132 : vector<2x32xf32>
    %134 = math.tanh %133 : vector<2x32xf32>
    %cst_31 = arith.constant 1.000000e+00 : f32
    %135 = vector.broadcast %cst_31 : f32 to vector<2x32xf32>
    %136 = arith.subf %135, %128 : vector<2x32xf32>
    %137 = arith.mulf %136, %134 : vector<2x32xf32>
    %138 = arith.mulf %128, %79 : vector<2x32xf32>
    %139 = arith.addf %137, %138 : vector<2x32xf32>
    %c12 = arith.constant 12 : index
    %c32_32 = arith.constant 32 : index
    %140 = vector.load %arg6[%c12, %c32_32] : memref<16x64xf32, #tpu.memory_space<vmem>>, vector<2x32xf32>
    tpu.vector_store %arg6[%c12, %c32_32], %139 {strides = array<i32>} : memref<16x64xf32, #tpu.memory_space<vmem>>, vector<2x32xf32>,
    %cst_33 = arith.constant dense<0.000000e+00> : vector<2x96xf32>
    %141 = tpu.matmul %109, %11, %cst_33 {dimension_numbers = #tpu.dot_dimension_numbers<[1], [0], [0], [1], [0, 0, 1, 1], [], []>} : vector<2x32xf32>, vector<32x96xf32>, vector<2x96xf32> -> vector<2x96xf32>
    %142 = vector.extract_strided_slice %10 {offsets = [4, 0], sizes = [2, 96], strides = [1, 1]} : vector<16x192xf32> to vector<2x96xf32>
    %143 = vector.extract_strided_slice %142 {offsets = [0, 0], sizes = [2, 32], strides = [1, 1]} : vector<2x96xf32> to vector<2x32xf32>
    %144 = vector.extract_strided_slice %141 {offsets = [0, 0], sizes = [2, 32], strides = [1, 1]} : vector<2x96xf32> to vector<2x32xf32>
    %145 = arith.addf %143, %144 : vector<2x32xf32>
    %146 = arith.negf %145 : vector<2x32xf32>
    %147 = math.exp %146 : vector<2x32xf32>
    %cst_34 = arith.constant 1.000000e+00 : f32
    %148 = vector.broadcast %cst_34 : f32 to vector<2x32xf32>
    %149 = arith.addf %148, %147 : vector<2x32xf32>
    %150 = arith.divf %148, %149 : vector<2x32xf32>
    %151 = vector.extract_strided_slice %142 {offsets = [0, 32], sizes = [2, 32], strides = [1, 1]} : vector<2x96xf32> to vector<2x32xf32>
    %152 = vector.extract_strided_slice %141 {offsets = [0, 32], sizes = [2, 32], strides = [1, 1]} : vector<2x96xf32> to vector<2x32xf32>
    %153 = arith.addf %151, %152 : vector<2x32xf32>
    %154 = arith.negf %153 : vector<2x32xf32>
    %155 = math.exp %154 : vector<2x32xf32>
    %cst_35 = arith.constant 1.000000e+00 : f32
    %156 = vector.broadcast %cst_35 : f32 to vector<2x32xf32>
    %157 = arith.addf %156, %155 : vector<2x32xf32>
    %158 = arith.divf %156, %157 : vector<2x32xf32>
    %159 = vector.extract_strided_slice %142 {offsets = [0, 64], sizes = [2, 32], strides = [1, 1]} : vector<2x96xf32> to vector<2x32xf32>
    %160 = vector.extract_strided_slice %141 {offsets = [0, 64], sizes = [2, 32], strides = [1, 1]} : vector<2x96xf32> to vector<2x32xf32>
    %161 = arith.addf %160, %14 : vector<2x32xf32>
    %162 = arith.mulf %150, %161 : vector<2x32xf32>
    %163 = arith.addf %159, %162 : vector<2x32xf32>
    %164 = math.tanh %163 : vector<2x32xf32>
    %cst_36 = arith.constant 1.000000e+00 : f32
    %165 = vector.broadcast %cst_36 : f32 to vector<2x32xf32>
    %166 = arith.subf %165, %158 : vector<2x32xf32>
    %167 = arith.mulf %166, %164 : vector<2x32xf32>
    %168 = arith.mulf %158, %109 : vector<2x32xf32>
    %169 = arith.addf %167, %168 : vector<2x32xf32>
    %c4 = arith.constant 4 : index
    %c0_37 = arith.constant 0 : index
    %170 = vector.load %arg6[%c4, %c0_37] : memref<16x64xf32, #tpu.memory_space<vmem>>, vector<2x32xf32>
    tpu.vector_store %arg6[%c4, %c0_37], %169 {strides = array<i32>} : memref<16x64xf32, #tpu.memory_space<vmem>>, vector<2x32xf32>,
    %cst_38 = arith.constant dense<0.000000e+00> : vector<2x96xf32>
    %171 = tpu.matmul %139, %15, %cst_38 {dimension_numbers = #tpu.dot_dimension_numbers<[1], [0], [0], [1], [0, 0, 1, 1], [], []>} : vector<2x32xf32>, vector<32x96xf32>, vector<2x96xf32> -> vector<2x96xf32>
    %172 = vector.extract_strided_slice %10 {offsets = [10, 96], sizes = [2, 96], strides = [1, 1]} : vector<16x192xf32> to vector<2x96xf32>
    %173 = vector.extract_strided_slice %172 {offsets = [0, 0], sizes = [2, 32], strides = [1, 1]} : vector<2x96xf32> to vector<2x32xf32>
    %174 = vector.extract_strided_slice %171 {offsets = [0, 0], sizes = [2, 32], strides = [1, 1]} : vector<2x96xf32> to vector<2x32xf32>
    %175 = arith.addf %173, %174 : vector<2x32xf32>
    %176 = arith.negf %175 : vector<2x32xf32>
    %177 = math.exp %176 : vector<2x32xf32>
    %cst_39 = arith.constant 1.000000e+00 : f32
    %178 = vector.broadcast %cst_39 : f32 to vector<2x32xf32>
    %179 = arith.addf %178, %177 : vector<2x32xf32>
    %180 = arith.divf %178, %179 : vector<2x32xf32>
    %181 = vector.extract_strided_slice %172 {offsets = [0, 32], sizes = [2, 32], strides = [1, 1]} : vector<2x96xf32> to vector<2x32xf32>
    %182 = vector.extract_strided_slice %171 {offsets = [0, 32], sizes = [2, 32], strides = [1, 1]} : vector<2x96xf32> to vector<2x32xf32>
    %183 = arith.addf %181, %182 : vector<2x32xf32>
    %184 = arith.negf %183 : vector<2x32xf32>
    %185 = math.exp %184 : vector<2x32xf32>
    %cst_40 = arith.constant 1.000000e+00 : f32
    %186 = vector.broadcast %cst_40 : f32 to vector<2x32xf32>
    %187 = arith.addf %186, %185 : vector<2x32xf32>
    %188 = arith.divf %186, %187 : vector<2x32xf32>
    %189 = vector.extract_strided_slice %172 {offsets = [0, 64], sizes = [2, 32], strides = [1, 1]} : vector<2x96xf32> to vector<2x32xf32>
    %190 = vector.extract_strided_slice %171 {offsets = [0, 64], sizes = [2, 32], strides = [1, 1]} : vector<2x96xf32> to vector<2x32xf32>
    %191 = arith.addf %190, %18 : vector<2x32xf32>
    %192 = arith.mulf %180, %191 : vector<2x32xf32>
    %193 = arith.addf %189, %192 : vector<2x32xf32>
    %194 = math.tanh %193 : vector<2x32xf32>
    %cst_41 = arith.constant 1.000000e+00 : f32
    %195 = vector.broadcast %cst_41 : f32 to vector<2x32xf32>
    %196 = arith.subf %195, %188 : vector<2x32xf32>
    %197 = arith.mulf %196, %194 : vector<2x32xf32>
    %198 = arith.mulf %188, %139 : vector<2x32xf32>
    %199 = arith.addf %197, %198 : vector<2x32xf32>
    %c10 = arith.constant 10 : index
    %c32_42 = arith.constant 32 : index
    %200 = vector.load %arg6[%c10, %c32_42] : memref<16x64xf32, #tpu.memory_space<vmem>>, vector<2x32xf32>
    tpu.vector_store %arg6[%c10, %c32_42], %199 {strides = array<i32>} : memref<16x64xf32, #tpu.memory_space<vmem>>, vector<2x32xf32>,
    %cst_43 = arith.constant dense<0.000000e+00> : vector<2x96xf32>
    %201 = tpu.matmul %169, %11, %cst_43 {dimension_numbers = #tpu.dot_dimension_numbers<[1], [0], [0], [1], [0, 0, 1, 1], [], []>} : vector<2x32xf32>, vector<32x96xf32>, vector<2x96xf32> -> vector<2x96xf32>
    %202 = vector.extract_strided_slice %10 {offsets = [6, 0], sizes = [2, 96], strides = [1, 1]} : vector<16x192xf32> to vector<2x96xf32>
    %203 = vector.extract_strided_slice %202 {offsets = [0, 0], sizes = [2, 32], strides = [1, 1]} : vector<2x96xf32> to vector<2x32xf32>
    %204 = vector.extract_strided_slice %201 {offsets = [0, 0], sizes = [2, 32], strides = [1, 1]} : vector<2x96xf32> to vector<2x32xf32>
    %205 = arith.addf %203, %204 : vector<2x32xf32>
    %206 = arith.negf %205 : vector<2x32xf32>
    %207 = math.exp %206 : vector<2x32xf32>
    %cst_44 = arith.constant 1.000000e+00 : f32
    %208 = vector.broadcast %cst_44 : f32 to vector<2x32xf32>
    %209 = arith.addf %208, %207 : vector<2x32xf32>
    %210 = arith.divf %208, %209 : vector<2x32xf32>
    %211 = vector.extract_strided_slice %202 {offsets = [0, 32], sizes = [2, 32], strides = [1, 1]} : vector<2x96xf32> to vector<2x32xf32>
    %212 = vector.extract_strided_slice %201 {offsets = [0, 32], sizes = [2, 32], strides = [1, 1]} : vector<2x96xf32> to vector<2x32xf32>
    %213 = arith.addf %211, %212 : vector<2x32xf32>
    %214 = arith.negf %213 : vector<2x32xf32>
    %215 = math.exp %214 : vector<2x32xf32>
    %cst_45 = arith.constant 1.000000e+00 : f32
    %216 = vector.broadcast %cst_45 : f32 to vector<2x32xf32>
    %217 = arith.addf %216, %215 : vector<2x32xf32>
    %218 = arith.divf %216, %217 : vector<2x32xf32>
    %219 = vector.extract_strided_slice %202 {offsets = [0, 64], sizes = [2, 32], strides = [1, 1]} : vector<2x96xf32> to vector<2x32xf32>
    %220 = vector.extract_strided_slice %201 {offsets = [0, 64], sizes = [2, 32], strides = [1, 1]} : vector<2x96xf32> to vector<2x32xf32>
    %221 = arith.addf %220, %14 : vector<2x32xf32>
    %222 = arith.mulf %210, %221 : vector<2x32xf32>
    %223 = arith.addf %219, %222 : vector<2x32xf32>
    %224 = math.tanh %223 : vector<2x32xf32>
    %cst_46 = arith.constant 1.000000e+00 : f32
    %225 = vector.broadcast %cst_46 : f32 to vector<2x32xf32>
    %226 = arith.subf %225, %218 : vector<2x32xf32>
    %227 = arith.mulf %226, %224 : vector<2x32xf32>
    %228 = arith.mulf %218, %169 : vector<2x32xf32>
    %229 = arith.addf %227, %228 : vector<2x32xf32>
    %c6 = arith.constant 6 : index
    %c0_47 = arith.constant 0 : index
    %230 = vector.load %arg6[%c6, %c0_47] : memref<16x64xf32, #tpu.memory_space<vmem>>, vector<2x32xf32>
    tpu.vector_store %arg6[%c6, %c0_47], %229 {strides = array<i32>} : memref<16x64xf32, #tpu.memory_space<vmem>>, vector<2x32xf32>,
    %cst_48 = arith.constant dense<0.000000e+00> : vector<2x96xf32>
    %231 = tpu.matmul %199, %15, %cst_48 {dimension_numbers = #tpu.dot_dimension_numbers<[1], [0], [0], [1], [0, 0, 1, 1], [], []>} : vector<2x32xf32>, vector<32x96xf32>, vector<2x96xf32> -> vector<2x96xf32>
    %232 = vector.extract_strided_slice %10 {offsets = [8, 96], sizes = [2, 96], strides = [1, 1]} : vector<16x192xf32> to vector<2x96xf32>
    %233 = vector.extract_strided_slice %232 {offsets = [0, 0], sizes = [2, 32], strides = [1, 1]} : vector<2x96xf32> to vector<2x32xf32>
    %234 = vector.extract_strided_slice %231 {offsets = [0, 0], sizes = [2, 32], strides = [1, 1]} : vector<2x96xf32> to vector<2x32xf32>
    %235 = arith.addf %233, %234 : vector<2x32xf32>
    %236 = arith.negf %235 : vector<2x32xf32>
    %237 = math.exp %236 : vector<2x32xf32>
    %cst_49 = arith.constant 1.000000e+00 : f32
    %238 = vector.broadcast %cst_49 : f32 to vector<2x32xf32>
    %239 = arith.addf %238, %237 : vector<2x32xf32>
    %240 = arith.divf %238, %239 : vector<2x32xf32>
    %241 = vector.extract_strided_slice %232 {offsets = [0, 32], sizes = [2, 32], strides = [1, 1]} : vector<2x96xf32> to vector<2x32xf32>
    %242 = vector.extract_strided_slice %231 {offsets = [0, 32], sizes = [2, 32], strides = [1, 1]} : vector<2x96xf32> to vector<2x32xf32>
    %243 = arith.addf %241, %242 : vector<2x32xf32>
    %244 = arith.negf %243 : vector<2x32xf32>
    %245 = math.exp %244 : vector<2x32xf32>
    %cst_50 = arith.constant 1.000000e+00 : f32
    %246 = vector.broadcast %cst_50 : f32 to vector<2x32xf32>
    %247 = arith.addf %246, %245 : vector<2x32xf32>
    %248 = arith.divf %246, %247 : vector<2x32xf32>
    %249 = vector.extract_strided_slice %232 {offsets = [0, 64], sizes = [2, 32], strides = [1, 1]} : vector<2x96xf32> to vector<2x32xf32>
    %250 = vector.extract_strided_slice %231 {offsets = [0, 64], sizes = [2, 32], strides = [1, 1]} : vector<2x96xf32> to vector<2x32xf32>
    %251 = arith.addf %250, %18 : vector<2x32xf32>
    %252 = arith.mulf %240, %251 : vector<2x32xf32>
    %253 = arith.addf %249, %252 : vector<2x32xf32>
    %254 = math.tanh %253 : vector<2x32xf32>
    %cst_51 = arith.constant 1.000000e+00 : f32
    %255 = vector.broadcast %cst_51 : f32 to vector<2x32xf32>
    %256 = arith.subf %255, %248 : vector<2x32xf32>
    %257 = arith.mulf %256, %254 : vector<2x32xf32>
    %258 = arith.mulf %248, %199 : vector<2x32xf32>
    %259 = arith.addf %257, %258 : vector<2x32xf32>
    %c8 = arith.constant 8 : index
    %c32_52 = arith.constant 32 : index
    %260 = vector.load %arg6[%c8, %c32_52] : memref<16x64xf32, #tpu.memory_space<vmem>>, vector<2x32xf32>
    tpu.vector_store %arg6[%c8, %c32_52], %259 {strides = array<i32>} : memref<16x64xf32, #tpu.memory_space<vmem>>, vector<2x32xf32>,
    %cst_53 = arith.constant dense<0.000000e+00> : vector<2x96xf32>
    %261 = tpu.matmul %229, %11, %cst_53 {dimension_numbers = #tpu.dot_dimension_numbers<[1], [0], [0], [1], [0, 0, 1, 1], [], []>} : vector<2x32xf32>, vector<32x96xf32>, vector<2x96xf32> -> vector<2x96xf32>
    %262 = vector.extract_strided_slice %10 {offsets = [8, 0], sizes = [2, 96], strides = [1, 1]} : vector<16x192xf32> to vector<2x96xf32>
    %263 = vector.extract_strided_slice %262 {offsets = [0, 0], sizes = [2, 32], strides = [1, 1]} : vector<2x96xf32> to vector<2x32xf32>
    %264 = vector.extract_strided_slice %261 {offsets = [0, 0], sizes = [2, 32], strides = [1, 1]} : vector<2x96xf32> to vector<2x32xf32>
    %265 = arith.addf %263, %264 : vector<2x32xf32>
    %266 = arith.negf %265 : vector<2x32xf32>
    %267 = math.exp %266 : vector<2x32xf32>
    %cst_54 = arith.constant 1.000000e+00 : f32
    %268 = vector.broadcast %cst_54 : f32 to vector<2x32xf32>
    %269 = arith.addf %268, %267 : vector<2x32xf32>
    %270 = arith.divf %268, %269 : vector<2x32xf32>
    %271 = vector.extract_strided_slice %262 {offsets = [0, 32], sizes = [2, 32], strides = [1, 1]} : vector<2x96xf32> to vector<2x32xf32>
    %272 = vector.extract_strided_slice %261 {offsets = [0, 32], sizes = [2, 32], strides = [1, 1]} : vector<2x96xf32> to vector<2x32xf32>
    %273 = arith.addf %271, %272 : vector<2x32xf32>
    %274 = arith.negf %273 : vector<2x32xf32>
    %275 = math.exp %274 : vector<2x32xf32>
    %cst_55 = arith.constant 1.000000e+00 : f32
    %276 = vector.broadcast %cst_55 : f32 to vector<2x32xf32>
    %277 = arith.addf %276, %275 : vector<2x32xf32>
    %278 = arith.divf %276, %277 : vector<2x32xf32>
    %279 = vector.extract_strided_slice %262 {offsets = [0, 64], sizes = [2, 32], strides = [1, 1]} : vector<2x96xf32> to vector<2x32xf32>
    %280 = vector.extract_strided_slice %261 {offsets = [0, 64], sizes = [2, 32], strides = [1, 1]} : vector<2x96xf32> to vector<2x32xf32>
    %281 = arith.addf %280, %14 : vector<2x32xf32>
    %282 = arith.mulf %270, %281 : vector<2x32xf32>
    %283 = arith.addf %279, %282 : vector<2x32xf32>
    %284 = math.tanh %283 : vector<2x32xf32>
    %cst_56 = arith.constant 1.000000e+00 : f32
    %285 = vector.broadcast %cst_56 : f32 to vector<2x32xf32>
    %286 = arith.subf %285, %278 : vector<2x32xf32>
    %287 = arith.mulf %286, %284 : vector<2x32xf32>
    %288 = arith.mulf %278, %229 : vector<2x32xf32>
    %289 = arith.addf %287, %288 : vector<2x32xf32>
    %c8_57 = arith.constant 8 : index
    %c0_58 = arith.constant 0 : index
    %290 = vector.load %arg6[%c8_57, %c0_58] : memref<16x64xf32, #tpu.memory_space<vmem>>, vector<2x32xf32>
    tpu.vector_store %arg6[%c8_57, %c0_58], %289 {strides = array<i32>} : memref<16x64xf32, #tpu.memory_space<vmem>>, vector<2x32xf32>,
    %cst_59 = arith.constant dense<0.000000e+00> : vector<2x96xf32>
    %291 = tpu.matmul %259, %15, %cst_59 {dimension_numbers = #tpu.dot_dimension_numbers<[1], [0], [0], [1], [0, 0, 1, 1], [], []>} : vector<2x32xf32>, vector<32x96xf32>, vector<2x96xf32> -> vector<2x96xf32>
    %292 = vector.extract_strided_slice %10 {offsets = [6, 96], sizes = [2, 96], strides = [1, 1]} : vector<16x192xf32> to vector<2x96xf32>
    %293 = vector.extract_strided_slice %292 {offsets = [0, 0], sizes = [2, 32], strides = [1, 1]} : vector<2x96xf32> to vector<2x32xf32>
    %294 = vector.extract_strided_slice %291 {offsets = [0, 0], sizes = [2, 32], strides = [1, 1]} : vector<2x96xf32> to vector<2x32xf32>
    %295 = arith.addf %293, %294 : vector<2x32xf32>
    %296 = arith.negf %295 : vector<2x32xf32>
    %297 = math.exp %296 : vector<2x32xf32>
    %cst_60 = arith.constant 1.000000e+00 : f32
    %298 = vector.broadcast %cst_60 : f32 to vector<2x32xf32>
    %299 = arith.addf %298, %297 : vector<2x32xf32>
    %300 = arith.divf %298, %299 : vector<2x32xf32>
    %301 = vector.extract_strided_slice %292 {offsets = [0, 32], sizes = [2, 32], strides = [1, 1]} : vector<2x96xf32> to vector<2x32xf32>
    %302 = vector.extract_strided_slice %291 {offsets = [0, 32], sizes = [2, 32], strides = [1, 1]} : vector<2x96xf32> to vector<2x32xf32>
    %303 = arith.addf %301, %302 : vector<2x32xf32>
    %304 = arith.negf %303 : vector<2x32xf32>
    %305 = math.exp %304 : vector<2x32xf32>
    %cst_61 = arith.constant 1.000000e+00 : f32
    %306 = vector.broadcast %cst_61 : f32 to vector<2x32xf32>
    %307 = arith.addf %306, %305 : vector<2x32xf32>
    %308 = arith.divf %306, %307 : vector<2x32xf32>
    %309 = vector.extract_strided_slice %292 {offsets = [0, 64], sizes = [2, 32], strides = [1, 1]} : vector<2x96xf32> to vector<2x32xf32>
    %310 = vector.extract_strided_slice %291 {offsets = [0, 64], sizes = [2, 32], strides = [1, 1]} : vector<2x96xf32> to vector<2x32xf32>
    %311 = arith.addf %310, %18 : vector<2x32xf32>
    %312 = arith.mulf %300, %311 : vector<2x32xf32>
    %313 = arith.addf %309, %312 : vector<2x32xf32>
    %314 = math.tanh %313 : vector<2x32xf32>
    %cst_62 = arith.constant 1.000000e+00 : f32
    %315 = vector.broadcast %cst_62 : f32 to vector<2x32xf32>
    %316 = arith.subf %315, %308 : vector<2x32xf32>
    %317 = arith.mulf %316, %314 : vector<2x32xf32>
    %318 = arith.mulf %308, %259 : vector<2x32xf32>
    %319 = arith.addf %317, %318 : vector<2x32xf32>
    %c6_63 = arith.constant 6 : index
    %c32_64 = arith.constant 32 : index
    %320 = vector.load %arg6[%c6_63, %c32_64] : memref<16x64xf32, #tpu.memory_space<vmem>>, vector<2x32xf32>
    tpu.vector_store %arg6[%c6_63, %c32_64], %319 {strides = array<i32>} : memref<16x64xf32, #tpu.memory_space<vmem>>, vector<2x32xf32>,
    %cst_65 = arith.constant dense<0.000000e+00> : vector<2x96xf32>
    %321 = tpu.matmul %289, %11, %cst_65 {dimension_numbers = #tpu.dot_dimension_numbers<[1], [0], [0], [1], [0, 0, 1, 1], [], []>} : vector<2x32xf32>, vector<32x96xf32>, vector<2x96xf32> -> vector<2x96xf32>
    %322 = vector.extract_strided_slice %10 {offsets = [10, 0], sizes = [2, 96], strides = [1, 1]} : vector<16x192xf32> to vector<2x96xf32>
    %323 = vector.extract_strided_slice %322 {offsets = [0, 0], sizes = [2, 32], strides = [1, 1]} : vector<2x96xf32> to vector<2x32xf32>
    %324 = vector.extract_strided_slice %321 {offsets = [0, 0], sizes = [2, 32], strides = [1, 1]} : vector<2x96xf32> to vector<2x32xf32>
    %325 = arith.addf %323, %324 : vector<2x32xf32>
    %326 = arith.negf %325 : vector<2x32xf32>
    %327 = math.exp %326 : vector<2x32xf32>
    %cst_66 = arith.constant 1.000000e+00 : f32
    %328 = vector.broadcast %cst_66 : f32 to vector<2x32xf32>
    %329 = arith.addf %328, %327 : vector<2x32xf32>
    %330 = arith.divf %328, %329 : vector<2x32xf32>
    %331 = vector.extract_strided_slice %322 {offsets = [0, 32], sizes = [2, 32], strides = [1, 1]} : vector<2x96xf32> to vector<2x32xf32>
    %332 = vector.extract_strided_slice %321 {offsets = [0, 32], sizes = [2, 32], strides = [1, 1]} : vector<2x96xf32> to vector<2x32xf32>
    %333 = arith.addf %331, %332 : vector<2x32xf32>
    %334 = arith.negf %333 : vector<2x32xf32>
    %335 = math.exp %334 : vector<2x32xf32>
    %cst_67 = arith.constant 1.000000e+00 : f32
    %336 = vector.broadcast %cst_67 : f32 to vector<2x32xf32>
    %337 = arith.addf %336, %335 : vector<2x32xf32>
    %338 = arith.divf %336, %337 : vector<2x32xf32>
    %339 = vector.extract_strided_slice %322 {offsets = [0, 64], sizes = [2, 32], strides = [1, 1]} : vector<2x96xf32> to vector<2x32xf32>
    %340 = vector.extract_strided_slice %321 {offsets = [0, 64], sizes = [2, 32], strides = [1, 1]} : vector<2x96xf32> to vector<2x32xf32>
    %341 = arith.addf %340, %14 : vector<2x32xf32>
    %342 = arith.mulf %330, %341 : vector<2x32xf32>
    %343 = arith.addf %339, %342 : vector<2x32xf32>
    %344 = math.tanh %343 : vector<2x32xf32>
    %cst_68 = arith.constant 1.000000e+00 : f32
    %345 = vector.broadcast %cst_68 : f32 to vector<2x32xf32>
    %346 = arith.subf %345, %338 : vector<2x32xf32>
    %347 = arith.mulf %346, %344 : vector<2x32xf32>
    %348 = arith.mulf %338, %289 : vector<2x32xf32>
    %349 = arith.addf %347, %348 : vector<2x32xf32>
    %c10_69 = arith.constant 10 : index
    %c0_70 = arith.constant 0 : index
    %350 = vector.load %arg6[%c10_69, %c0_70] : memref<16x64xf32, #tpu.memory_space<vmem>>, vector<2x32xf32>
    tpu.vector_store %arg6[%c10_69, %c0_70], %349 {strides = array<i32>} : memref<16x64xf32, #tpu.memory_space<vmem>>, vector<2x32xf32>,
    %cst_71 = arith.constant dense<0.000000e+00> : vector<2x96xf32>
    %351 = tpu.matmul %319, %15, %cst_71 {dimension_numbers = #tpu.dot_dimension_numbers<[1], [0], [0], [1], [0, 0, 1, 1], [], []>} : vector<2x32xf32>, vector<32x96xf32>, vector<2x96xf32> -> vector<2x96xf32>
    %352 = vector.extract_strided_slice %10 {offsets = [4, 96], sizes = [2, 96], strides = [1, 1]} : vector<16x192xf32> to vector<2x96xf32>
    %353 = vector.extract_strided_slice %352 {offsets = [0, 0], sizes = [2, 32], strides = [1, 1]} : vector<2x96xf32> to vector<2x32xf32>
    %354 = vector.extract_strided_slice %351 {offsets = [0, 0], sizes = [2, 32], strides = [1, 1]} : vector<2x96xf32> to vector<2x32xf32>
    %355 = arith.addf %353, %354 : vector<2x32xf32>
    %356 = arith.negf %355 : vector<2x32xf32>
    %357 = math.exp %356 : vector<2x32xf32>
    %cst_72 = arith.constant 1.000000e+00 : f32
    %358 = vector.broadcast %cst_72 : f32 to vector<2x32xf32>
    %359 = arith.addf %358, %357 : vector<2x32xf32>
    %360 = arith.divf %358, %359 : vector<2x32xf32>
    %361 = vector.extract_strided_slice %352 {offsets = [0, 32], sizes = [2, 32], strides = [1, 1]} : vector<2x96xf32> to vector<2x32xf32>
    %362 = vector.extract_strided_slice %351 {offsets = [0, 32], sizes = [2, 32], strides = [1, 1]} : vector<2x96xf32> to vector<2x32xf32>
    %363 = arith.addf %361, %362 : vector<2x32xf32>
    %364 = arith.negf %363 : vector<2x32xf32>
    %365 = math.exp %364 : vector<2x32xf32>
    %cst_73 = arith.constant 1.000000e+00 : f32
    %366 = vector.broadcast %cst_73 : f32 to vector<2x32xf32>
    %367 = arith.addf %366, %365 : vector<2x32xf32>
    %368 = arith.divf %366, %367 : vector<2x32xf32>
    %369 = vector.extract_strided_slice %352 {offsets = [0, 64], sizes = [2, 32], strides = [1, 1]} : vector<2x96xf32> to vector<2x32xf32>
    %370 = vector.extract_strided_slice %351 {offsets = [0, 64], sizes = [2, 32], strides = [1, 1]} : vector<2x96xf32> to vector<2x32xf32>
    %371 = arith.addf %370, %18 : vector<2x32xf32>
    %372 = arith.mulf %360, %371 : vector<2x32xf32>
    %373 = arith.addf %369, %372 : vector<2x32xf32>
    %374 = math.tanh %373 : vector<2x32xf32>
    %cst_74 = arith.constant 1.000000e+00 : f32
    %375 = vector.broadcast %cst_74 : f32 to vector<2x32xf32>
    %376 = arith.subf %375, %368 : vector<2x32xf32>
    %377 = arith.mulf %376, %374 : vector<2x32xf32>
    %378 = arith.mulf %368, %319 : vector<2x32xf32>
    %379 = arith.addf %377, %378 : vector<2x32xf32>
    %c4_75 = arith.constant 4 : index
    %c32_76 = arith.constant 32 : index
    %380 = vector.load %arg6[%c4_75, %c32_76] : memref<16x64xf32, #tpu.memory_space<vmem>>, vector<2x32xf32>
    tpu.vector_store %arg6[%c4_75, %c32_76], %379 {strides = array<i32>} : memref<16x64xf32, #tpu.memory_space<vmem>>, vector<2x32xf32>,
    %cst_77 = arith.constant dense<0.000000e+00> : vector<2x96xf32>
    %381 = tpu.matmul %349, %11, %cst_77 {dimension_numbers = #tpu.dot_dimension_numbers<[1], [0], [0], [1], [0, 0, 1, 1], [], []>} : vector<2x32xf32>, vector<32x96xf32>, vector<2x96xf32> -> vector<2x96xf32>
    %382 = vector.extract_strided_slice %10 {offsets = [12, 0], sizes = [2, 96], strides = [1, 1]} : vector<16x192xf32> to vector<2x96xf32>
    %383 = vector.extract_strided_slice %382 {offsets = [0, 0], sizes = [2, 32], strides = [1, 1]} : vector<2x96xf32> to vector<2x32xf32>
    %384 = vector.extract_strided_slice %381 {offsets = [0, 0], sizes = [2, 32], strides = [1, 1]} : vector<2x96xf32> to vector<2x32xf32>
    %385 = arith.addf %383, %384 : vector<2x32xf32>
    %386 = arith.negf %385 : vector<2x32xf32>
    %387 = math.exp %386 : vector<2x32xf32>
    %cst_78 = arith.constant 1.000000e+00 : f32
    %388 = vector.broadcast %cst_78 : f32 to vector<2x32xf32>
    %389 = arith.addf %388, %387 : vector<2x32xf32>
    %390 = arith.divf %388, %389 : vector<2x32xf32>
    %391 = vector.extract_strided_slice %382 {offsets = [0, 32], sizes = [2, 32], strides = [1, 1]} : vector<2x96xf32> to vector<2x32xf32>
    %392 = vector.extract_strided_slice %381 {offsets = [0, 32], sizes = [2, 32], strides = [1, 1]} : vector<2x96xf32> to vector<2x32xf32>
    %393 = arith.addf %391, %392 : vector<2x32xf32>
    %394 = arith.negf %393 : vector<2x32xf32>
    %395 = math.exp %394 : vector<2x32xf32>
    %cst_79 = arith.constant 1.000000e+00 : f32
    %396 = vector.broadcast %cst_79 : f32 to vector<2x32xf32>
    %397 = arith.addf %396, %395 : vector<2x32xf32>
    %398 = arith.divf %396, %397 : vector<2x32xf32>
    %399 = vector.extract_strided_slice %382 {offsets = [0, 64], sizes = [2, 32], strides = [1, 1]} : vector<2x96xf32> to vector<2x32xf32>
    %400 = vector.extract_strided_slice %381 {offsets = [0, 64], sizes = [2, 32], strides = [1, 1]} : vector<2x96xf32> to vector<2x32xf32>
    %401 = arith.addf %400, %14 : vector<2x32xf32>
    %402 = arith.mulf %390, %401 : vector<2x32xf32>
    %403 = arith.addf %399, %402 : vector<2x32xf32>
    %404 = math.tanh %403 : vector<2x32xf32>
    %cst_80 = arith.constant 1.000000e+00 : f32
    %405 = vector.broadcast %cst_80 : f32 to vector<2x32xf32>
    %406 = arith.subf %405, %398 : vector<2x32xf32>
    %407 = arith.mulf %406, %404 : vector<2x32xf32>
    %408 = arith.mulf %398, %349 : vector<2x32xf32>
    %409 = arith.addf %407, %408 : vector<2x32xf32>
    %c12_81 = arith.constant 12 : index
    %c0_82 = arith.constant 0 : index
    %410 = vector.load %arg6[%c12_81, %c0_82] : memref<16x64xf32, #tpu.memory_space<vmem>>, vector<2x32xf32>
    tpu.vector_store %arg6[%c12_81, %c0_82], %409 {strides = array<i32>} : memref<16x64xf32, #tpu.memory_space<vmem>>, vector<2x32xf32>,
    %cst_83 = arith.constant dense<0.000000e+00> : vector<2x96xf32>
    %411 = tpu.matmul %379, %15, %cst_83 {dimension_numbers = #tpu.dot_dimension_numbers<[1], [0], [0], [1], [0, 0, 1, 1], [], []>} : vector<2x32xf32>, vector<32x96xf32>, vector<2x96xf32> -> vector<2x96xf32>
    %412 = vector.extract_strided_slice %10 {offsets = [2, 96], sizes = [2, 96], strides = [1, 1]} : vector<16x192xf32> to vector<2x96xf32>
    %413 = vector.extract_strided_slice %412 {offsets = [0, 0], sizes = [2, 32], strides = [1, 1]} : vector<2x96xf32> to vector<2x32xf32>
    %414 = vector.extract_strided_slice %411 {offsets = [0, 0], sizes = [2, 32], strides = [1, 1]} : vector<2x96xf32> to vector<2x32xf32>
    %415 = arith.addf %413, %414 : vector<2x32xf32>
    %416 = arith.negf %415 : vector<2x32xf32>
    %417 = math.exp %416 : vector<2x32xf32>
    %cst_84 = arith.constant 1.000000e+00 : f32
    %418 = vector.broadcast %cst_84 : f32 to vector<2x32xf32>
    %419 = arith.addf %418, %417 : vector<2x32xf32>
    %420 = arith.divf %418, %419 : vector<2x32xf32>
    %421 = vector.extract_strided_slice %412 {offsets = [0, 32], sizes = [2, 32], strides = [1, 1]} : vector<2x96xf32> to vector<2x32xf32>
    %422 = vector.extract_strided_slice %411 {offsets = [0, 32], sizes = [2, 32], strides = [1, 1]} : vector<2x96xf32> to vector<2x32xf32>
    %423 = arith.addf %421, %422 : vector<2x32xf32>
    %424 = arith.negf %423 : vector<2x32xf32>
    %425 = math.exp %424 : vector<2x32xf32>
    %cst_85 = arith.constant 1.000000e+00 : f32
    %426 = vector.broadcast %cst_85 : f32 to vector<2x32xf32>
    %427 = arith.addf %426, %425 : vector<2x32xf32>
    %428 = arith.divf %426, %427 : vector<2x32xf32>
    %429 = vector.extract_strided_slice %412 {offsets = [0, 64], sizes = [2, 32], strides = [1, 1]} : vector<2x96xf32> to vector<2x32xf32>
    %430 = vector.extract_strided_slice %411 {offsets = [0, 64], sizes = [2, 32], strides = [1, 1]} : vector<2x96xf32> to vector<2x32xf32>
    %431 = arith.addf %430, %18 : vector<2x32xf32>
    %432 = arith.mulf %420, %431 : vector<2x32xf32>
    %433 = arith.addf %429, %432 : vector<2x32xf32>
    %434 = math.tanh %433 : vector<2x32xf32>
    %cst_86 = arith.constant 1.000000e+00 : f32
    %435 = vector.broadcast %cst_86 : f32 to vector<2x32xf32>
    %436 = arith.subf %435, %428 : vector<2x32xf32>
    %437 = arith.mulf %436, %434 : vector<2x32xf32>
    %438 = arith.mulf %428, %379 : vector<2x32xf32>
    %439 = arith.addf %437, %438 : vector<2x32xf32>
    %c2_87 = arith.constant 2 : index
    %c32_88 = arith.constant 32 : index
    %440 = vector.load %arg6[%c2_87, %c32_88] : memref<16x64xf32, #tpu.memory_space<vmem>>, vector<2x32xf32>
    tpu.vector_store %arg6[%c2_87, %c32_88], %439 {strides = array<i32>} : memref<16x64xf32, #tpu.memory_space<vmem>>, vector<2x32xf32>,
    %cst_89 = arith.constant dense<0.000000e+00> : vector<2x96xf32>
    %441 = tpu.matmul %409, %11, %cst_89 {dimension_numbers = #tpu.dot_dimension_numbers<[1], [0], [0], [1], [0, 0, 1, 1], [], []>} : vector<2x32xf32>, vector<32x96xf32>, vector<2x96xf32> -> vector<2x96xf32>
    %442 = vector.extract_strided_slice %10 {offsets = [14, 0], sizes = [2, 96], strides = [1, 1]} : vector<16x192xf32> to vector<2x96xf32>
    %443 = vector.extract_strided_slice %442 {offsets = [0, 0], sizes = [2, 32], strides = [1, 1]} : vector<2x96xf32> to vector<2x32xf32>
    %444 = vector.extract_strided_slice %441 {offsets = [0, 0], sizes = [2, 32], strides = [1, 1]} : vector<2x96xf32> to vector<2x32xf32>
    %445 = arith.addf %443, %444 : vector<2x32xf32>
    %446 = arith.negf %445 : vector<2x32xf32>
    %447 = math.exp %446 : vector<2x32xf32>
    %cst_90 = arith.constant 1.000000e+00 : f32
    %448 = vector.broadcast %cst_90 : f32 to vector<2x32xf32>
    %449 = arith.addf %448, %447 : vector<2x32xf32>
    %450 = arith.divf %448, %449 : vector<2x32xf32>
    %451 = vector.extract_strided_slice %442 {offsets = [0, 32], sizes = [2, 32], strides = [1, 1]} : vector<2x96xf32> to vector<2x32xf32>
    %452 = vector.extract_strided_slice %441 {offsets = [0, 32], sizes = [2, 32], strides = [1, 1]} : vector<2x96xf32> to vector<2x32xf32>
    %453 = arith.addf %451, %452 : vector<2x32xf32>
    %454 = arith.negf %453 : vector<2x32xf32>
    %455 = math.exp %454 : vector<2x32xf32>
    %cst_91 = arith.constant 1.000000e+00 : f32
    %456 = vector.broadcast %cst_91 : f32 to vector<2x32xf32>
    %457 = arith.addf %456, %455 : vector<2x32xf32>
    %458 = arith.divf %456, %457 : vector<2x32xf32>
    %459 = vector.extract_strided_slice %442 {offsets = [0, 64], sizes = [2, 32], strides = [1, 1]} : vector<2x96xf32> to vector<2x32xf32>
    %460 = vector.extract_strided_slice %441 {offsets = [0, 64], sizes = [2, 32], strides = [1, 1]} : vector<2x96xf32> to vector<2x32xf32>
    %461 = arith.addf %460, %14 : vector<2x32xf32>
    %462 = arith.mulf %450, %461 : vector<2x32xf32>
    %463 = arith.addf %459, %462 : vector<2x32xf32>
    %464 = math.tanh %463 : vector<2x32xf32>
    %cst_92 = arith.constant 1.000000e+00 : f32
    %465 = vector.broadcast %cst_92 : f32 to vector<2x32xf32>
    %466 = arith.subf %465, %458 : vector<2x32xf32>
    %467 = arith.mulf %466, %464 : vector<2x32xf32>
    %468 = arith.mulf %458, %409 : vector<2x32xf32>
    %469 = arith.addf %467, %468 : vector<2x32xf32>
    %c14_93 = arith.constant 14 : index
    %c0_94 = arith.constant 0 : index
    %470 = vector.load %arg6[%c14_93, %c0_94] : memref<16x64xf32, #tpu.memory_space<vmem>>, vector<2x32xf32>
    tpu.vector_store %arg6[%c14_93, %c0_94], %469 {strides = array<i32>} : memref<16x64xf32, #tpu.memory_space<vmem>>, vector<2x32xf32>,
    %cst_95 = arith.constant dense<0.000000e+00> : vector<2x96xf32>
    %471 = tpu.matmul %439, %15, %cst_95 {dimension_numbers = #tpu.dot_dimension_numbers<[1], [0], [0], [1], [0, 0, 1, 1], [], []>} : vector<2x32xf32>, vector<32x96xf32>, vector<2x96xf32> -> vector<2x96xf32>
    %472 = vector.extract_strided_slice %10 {offsets = [0, 96], sizes = [2, 96], strides = [1, 1]} : vector<16x192xf32> to vector<2x96xf32>
    %473 = vector.extract_strided_slice %472 {offsets = [0, 0], sizes = [2, 32], strides = [1, 1]} : vector<2x96xf32> to vector<2x32xf32>
    %474 = vector.extract_strided_slice %471 {offsets = [0, 0], sizes = [2, 32], strides = [1, 1]} : vector<2x96xf32> to vector<2x32xf32>
    %475 = arith.addf %473, %474 : vector<2x32xf32>
    %476 = arith.negf %475 : vector<2x32xf32>
    %477 = math.exp %476 : vector<2x32xf32>
    %cst_96 = arith.constant 1.000000e+00 : f32
    %478 = vector.broadcast %cst_96 : f32 to vector<2x32xf32>
    %479 = arith.addf %478, %477 : vector<2x32xf32>
    %480 = arith.divf %478, %479 : vector<2x32xf32>
    %481 = vector.extract_strided_slice %472 {offsets = [0, 32], sizes = [2, 32], strides = [1, 1]} : vector<2x96xf32> to vector<2x32xf32>
    %482 = vector.extract_strided_slice %471 {offsets = [0, 32], sizes = [2, 32], strides = [1, 1]} : vector<2x96xf32> to vector<2x32xf32>
    %483 = arith.addf %481, %482 : vector<2x32xf32>
    %484 = arith.negf %483 : vector<2x32xf32>
    %485 = math.exp %484 : vector<2x32xf32>
    %cst_97 = arith.constant 1.000000e+00 : f32
    %486 = vector.broadcast %cst_97 : f32 to vector<2x32xf32>
    %487 = arith.addf %486, %485 : vector<2x32xf32>
    %488 = arith.divf %486, %487 : vector<2x32xf32>
    %489 = vector.extract_strided_slice %472 {offsets = [0, 64], sizes = [2, 32], strides = [1, 1]} : vector<2x96xf32> to vector<2x32xf32>
    %490 = vector.extract_strided_slice %471 {offsets = [0, 64], sizes = [2, 32], strides = [1, 1]} : vector<2x96xf32> to vector<2x32xf32>
    %491 = arith.addf %490, %18 : vector<2x32xf32>
    %492 = arith.mulf %480, %491 : vector<2x32xf32>
    %493 = arith.addf %489, %492 : vector<2x32xf32>
    %494 = math.tanh %493 : vector<2x32xf32>
    %cst_98 = arith.constant 1.000000e+00 : f32
    %495 = vector.broadcast %cst_98 : f32 to vector<2x32xf32>
    %496 = arith.subf %495, %488 : vector<2x32xf32>
    %497 = arith.mulf %496, %494 : vector<2x32xf32>
    %498 = arith.mulf %488, %439 : vector<2x32xf32>
    %499 = arith.addf %497, %498 : vector<2x32xf32>
    %c0_99 = arith.constant 0 : index
    %c32_100 = arith.constant 32 : index
    %500 = vector.load %arg6[%c0_99, %c32_100] : memref<16x64xf32, #tpu.memory_space<vmem>>, vector<2x32xf32>
    tpu.vector_store %arg6[%c0_99, %c32_100], %499 {strides = array<i32>} : memref<16x64xf32, #tpu.memory_space<vmem>>, vector<2x32xf32>,
    %c0_101 = arith.constant 0 : index
    %c0_102 = arith.constant 0 : index
    %501 = vector.load %arg6[%c0_101, %c0_102] : memref<16x64xf32, #tpu.memory_space<vmem>>, vector<16x64xf32>
    %c32_103 = arith.constant 32 : index
    %c0_104 = arith.constant 0 : index
    %502 = vector.load %arg1[%c32_103, %c0_104] : memref<96x192xf32, #tpu.memory_space<vmem>>, vector<64x192xf32>
    %c1 = arith.constant 1 : index
    %c0_105 = arith.constant 0 : index
    %503 = vector.load %arg3[%c1, %c0_105] : memref<2x256xf32, #tpu.memory_space<vmem>>, vector<1x192xf32>
    %cst_106 = arith.constant dense<0.000000e+00> : vector<16x192xf32>
    %504 = tpu.matmul %501, %502, %cst_106 {dimension_numbers = #tpu.dot_dimension_numbers<[1], [0], [0], [1], [0, 0, 1, 1], [], []>} : vector<16x64xf32>, vector<64x192xf32>, vector<16x192xf32> -> vector<16x192xf32>
    %505 = vector.broadcast %503 : vector<1x192xf32> to vector<16x192xf32>
    %506 = arith.addf %504, %505 : vector<16x192xf32>
    %c64 = arith.constant 64 : index
    %c0_107 = arith.constant 0 : index
    %507 = vector.load %arg2[%c64, %c0_107] : memref<128x96xf32, #tpu.memory_space<vmem>>, vector<32x96xf32>
    %c1_108 = arith.constant 1 : index
    %c192_109 = arith.constant 192 : index
    %508 = vector.load %arg3[%c1_108, %c192_109] : memref<2x256xf32, #tpu.memory_space<vmem>>, vector<1x32xf32>
    %509 = vector.shape_cast %508 : vector<1x32xf32> to vector<1x32xf32>
    %510 = vector.broadcast %509 : vector<1x32xf32> to vector<2x32xf32>
    %c96 = arith.constant 96 : index
    %c0_110 = arith.constant 0 : index
    %511 = vector.load %arg2[%c96, %c0_110] : memref<128x96xf32, #tpu.memory_space<vmem>>, vector<32x96xf32>
    %c1_111 = arith.constant 1 : index
    %c224_112 = arith.constant 224 : index
    %512 = vector.load %arg3[%c1_111, %c224_112] : memref<2x256xf32, #tpu.memory_space<vmem>>, vector<1x32xf32>
    %513 = vector.shape_cast %512 : vector<1x32xf32> to vector<1x32xf32>
    %514 = vector.broadcast %513 : vector<1x32xf32> to vector<2x32xf32>
    %cst_113 = arith.constant 0.000000e+00 : f32
    %515 = vector.broadcast %cst_113 : f32 to vector<2x32xf32>
    %cst_114 = arith.constant 0.000000e+00 : f32
    %516 = vector.broadcast %cst_114 : f32 to vector<2x32xf32>
    %cst_115 = arith.constant dense<0.000000e+00> : vector<2x96xf32>
    %517 = tpu.matmul %515, %507, %cst_115 {dimension_numbers = #tpu.dot_dimension_numbers<[1], [0], [0], [1], [0, 0, 1, 1], [], []>} : vector<2x32xf32>, vector<32x96xf32>, vector<2x96xf32> -> vector<2x96xf32>
    %518 = vector.extract_strided_slice %506 {offsets = [0, 0], sizes = [2, 96], strides = [1, 1]} : vector<16x192xf32> to vector<2x96xf32>
    %519 = vector.extract_strided_slice %518 {offsets = [0, 0], sizes = [2, 32], strides = [1, 1]} : vector<2x96xf32> to vector<2x32xf32>
    %520 = vector.extract_strided_slice %517 {offsets = [0, 0], sizes = [2, 32], strides = [1, 1]} : vector<2x96xf32> to vector<2x32xf32>
    %521 = arith.addf %519, %520 : vector<2x32xf32>
    %522 = arith.negf %521 : vector<2x32xf32>
    %523 = math.exp %522 : vector<2x32xf32>
    %cst_116 = arith.constant 1.000000e+00 : f32
    %524 = vector.broadcast %cst_116 : f32 to vector<2x32xf32>
    %525 = arith.addf %524, %523 : vector<2x32xf32>
    %526 = arith.divf %524, %525 : vector<2x32xf32>
    %527 = vector.extract_strided_slice %518 {offsets = [0, 32], sizes = [2, 32], strides = [1, 1]} : vector<2x96xf32> to vector<2x32xf32>
    %528 = vector.extract_strided_slice %517 {offsets = [0, 32], sizes = [2, 32], strides = [1, 1]} : vector<2x96xf32> to vector<2x32xf32>
    %529 = arith.addf %527, %528 : vector<2x32xf32>
    %530 = arith.negf %529 : vector<2x32xf32>
    %531 = math.exp %530 : vector<2x32xf32>
    %cst_117 = arith.constant 1.000000e+00 : f32
    %532 = vector.broadcast %cst_117 : f32 to vector<2x32xf32>
    %533 = arith.addf %532, %531 : vector<2x32xf32>
    %534 = arith.divf %532, %533 : vector<2x32xf32>
    %535 = vector.extract_strided_slice %518 {offsets = [0, 64], sizes = [2, 32], strides = [1, 1]} : vector<2x96xf32> to vector<2x32xf32>
    %536 = vector.extract_strided_slice %517 {offsets = [0, 64], sizes = [2, 32], strides = [1, 1]} : vector<2x96xf32> to vector<2x32xf32>
    %537 = arith.addf %536, %510 : vector<2x32xf32>
    %538 = arith.mulf %526, %537 : vector<2x32xf32>
    %539 = arith.addf %535, %538 : vector<2x32xf32>
    %540 = math.tanh %539 : vector<2x32xf32>
    %cst_118 = arith.constant 1.000000e+00 : f32
    %541 = vector.broadcast %cst_118 : f32 to vector<2x32xf32>
    %542 = arith.subf %541, %534 : vector<2x32xf32>
    %543 = arith.mulf %542, %540 : vector<2x32xf32>
    %544 = arith.mulf %534, %515 : vector<2x32xf32>
    %545 = arith.addf %543, %544 : vector<2x32xf32>
    %cst_119 = arith.constant dense<0.000000e+00> : vector<2x96xf32>
    %546 = tpu.matmul %516, %511, %cst_119 {dimension_numbers = #tpu.dot_dimension_numbers<[1], [0], [0], [1], [0, 0, 1, 1], [], []>} : vector<2x32xf32>, vector<32x96xf32>, vector<2x96xf32> -> vector<2x96xf32>
    %547 = vector.extract_strided_slice %506 {offsets = [14, 96], sizes = [2, 96], strides = [1, 1]} : vector<16x192xf32> to vector<2x96xf32>
    %548 = vector.extract_strided_slice %547 {offsets = [0, 0], sizes = [2, 32], strides = [1, 1]} : vector<2x96xf32> to vector<2x32xf32>
    %549 = vector.extract_strided_slice %546 {offsets = [0, 0], sizes = [2, 32], strides = [1, 1]} : vector<2x96xf32> to vector<2x32xf32>
    %550 = arith.addf %548, %549 : vector<2x32xf32>
    %551 = arith.negf %550 : vector<2x32xf32>
    %552 = math.exp %551 : vector<2x32xf32>
    %cst_120 = arith.constant 1.000000e+00 : f32
    %553 = vector.broadcast %cst_120 : f32 to vector<2x32xf32>
    %554 = arith.addf %553, %552 : vector<2x32xf32>
    %555 = arith.divf %553, %554 : vector<2x32xf32>
    %556 = vector.extract_strided_slice %547 {offsets = [0, 32], sizes = [2, 32], strides = [1, 1]} : vector<2x96xf32> to vector<2x32xf32>
    %557 = vector.extract_strided_slice %546 {offsets = [0, 32], sizes = [2, 32], strides = [1, 1]} : vector<2x96xf32> to vector<2x32xf32>
    %558 = arith.addf %556, %557 : vector<2x32xf32>
    %559 = arith.negf %558 : vector<2x32xf32>
    %560 = math.exp %559 : vector<2x32xf32>
    %cst_121 = arith.constant 1.000000e+00 : f32
    %561 = vector.broadcast %cst_121 : f32 to vector<2x32xf32>
    %562 = arith.addf %561, %560 : vector<2x32xf32>
    %563 = arith.divf %561, %562 : vector<2x32xf32>
    %564 = vector.extract_strided_slice %547 {offsets = [0, 64], sizes = [2, 32], strides = [1, 1]} : vector<2x96xf32> to vector<2x32xf32>
    %565 = vector.extract_strided_slice %546 {offsets = [0, 64], sizes = [2, 32], strides = [1, 1]} : vector<2x96xf32> to vector<2x32xf32>
    %566 = arith.addf %565, %514 : vector<2x32xf32>
    %567 = arith.mulf %555, %566 : vector<2x32xf32>
    %568 = arith.addf %564, %567 : vector<2x32xf32>
    %569 = math.tanh %568 : vector<2x32xf32>
    %cst_122 = arith.constant 1.000000e+00 : f32
    %570 = vector.broadcast %cst_122 : f32 to vector<2x32xf32>
    %571 = arith.subf %570, %563 : vector<2x32xf32>
    %572 = arith.mulf %571, %569 : vector<2x32xf32>
    %573 = arith.mulf %563, %516 : vector<2x32xf32>
    %574 = arith.addf %572, %573 : vector<2x32xf32>
    %cst_123 = arith.constant dense<0.000000e+00> : vector<2x96xf32>
    %575 = tpu.matmul %545, %507, %cst_123 {dimension_numbers = #tpu.dot_dimension_numbers<[1], [0], [0], [1], [0, 0, 1, 1], [], []>} : vector<2x32xf32>, vector<32x96xf32>, vector<2x96xf32> -> vector<2x96xf32>
    %576 = vector.extract_strided_slice %506 {offsets = [2, 0], sizes = [2, 96], strides = [1, 1]} : vector<16x192xf32> to vector<2x96xf32>
    %577 = vector.extract_strided_slice %576 {offsets = [0, 0], sizes = [2, 32], strides = [1, 1]} : vector<2x96xf32> to vector<2x32xf32>
    %578 = vector.extract_strided_slice %575 {offsets = [0, 0], sizes = [2, 32], strides = [1, 1]} : vector<2x96xf32> to vector<2x32xf32>
    %579 = arith.addf %577, %578 : vector<2x32xf32>
    %580 = arith.negf %579 : vector<2x32xf32>
    %581 = math.exp %580 : vector<2x32xf32>
    %cst_124 = arith.constant 1.000000e+00 : f32
    %582 = vector.broadcast %cst_124 : f32 to vector<2x32xf32>
    %583 = arith.addf %582, %581 : vector<2x32xf32>
    %584 = arith.divf %582, %583 : vector<2x32xf32>
    %585 = vector.extract_strided_slice %576 {offsets = [0, 32], sizes = [2, 32], strides = [1, 1]} : vector<2x96xf32> to vector<2x32xf32>
    %586 = vector.extract_strided_slice %575 {offsets = [0, 32], sizes = [2, 32], strides = [1, 1]} : vector<2x96xf32> to vector<2x32xf32>
    %587 = arith.addf %585, %586 : vector<2x32xf32>
    %588 = arith.negf %587 : vector<2x32xf32>
    %589 = math.exp %588 : vector<2x32xf32>
    %cst_125 = arith.constant 1.000000e+00 : f32
    %590 = vector.broadcast %cst_125 : f32 to vector<2x32xf32>
    %591 = arith.addf %590, %589 : vector<2x32xf32>
    %592 = arith.divf %590, %591 : vector<2x32xf32>
    %593 = vector.extract_strided_slice %576 {offsets = [0, 64], sizes = [2, 32], strides = [1, 1]} : vector<2x96xf32> to vector<2x32xf32>
    %594 = vector.extract_strided_slice %575 {offsets = [0, 64], sizes = [2, 32], strides = [1, 1]} : vector<2x96xf32> to vector<2x32xf32>
    %595 = arith.addf %594, %510 : vector<2x32xf32>
    %596 = arith.mulf %584, %595 : vector<2x32xf32>
    %597 = arith.addf %593, %596 : vector<2x32xf32>
    %598 = math.tanh %597 : vector<2x32xf32>
    %cst_126 = arith.constant 1.000000e+00 : f32
    %599 = vector.broadcast %cst_126 : f32 to vector<2x32xf32>
    %600 = arith.subf %599, %592 : vector<2x32xf32>
    %601 = arith.mulf %600, %598 : vector<2x32xf32>
    %602 = arith.mulf %592, %545 : vector<2x32xf32>
    %603 = arith.addf %601, %602 : vector<2x32xf32>
    %cst_127 = arith.constant dense<0.000000e+00> : vector<2x96xf32>
    %604 = tpu.matmul %603, %507, %cst_127 {dimension_numbers = #tpu.dot_dimension_numbers<[1], [0], [0], [1], [0, 0, 1, 1], [], []>} : vector<2x32xf32>, vector<32x96xf32>, vector<2x96xf32> -> vector<2x96xf32>
    %605 = vector.extract_strided_slice %506 {offsets = [4, 0], sizes = [2, 96], strides = [1, 1]} : vector<16x192xf32> to vector<2x96xf32>
    %606 = vector.extract_strided_slice %605 {offsets = [0, 0], sizes = [2, 32], strides = [1, 1]} : vector<2x96xf32> to vector<2x32xf32>
    %607 = vector.extract_strided_slice %604 {offsets = [0, 0], sizes = [2, 32], strides = [1, 1]} : vector<2x96xf32> to vector<2x32xf32>
    %608 = arith.addf %606, %607 : vector<2x32xf32>
    %609 = arith.negf %608 : vector<2x32xf32>
    %610 = math.exp %609 : vector<2x32xf32>
    %cst_128 = arith.constant 1.000000e+00 : f32
    %611 = vector.broadcast %cst_128 : f32 to vector<2x32xf32>
    %612 = arith.addf %611, %610 : vector<2x32xf32>
    %613 = arith.divf %611, %612 : vector<2x32xf32>
    %614 = vector.extract_strided_slice %605 {offsets = [0, 32], sizes = [2, 32], strides = [1, 1]} : vector<2x96xf32> to vector<2x32xf32>
    %615 = vector.extract_strided_slice %604 {offsets = [0, 32], sizes = [2, 32], strides = [1, 1]} : vector<2x96xf32> to vector<2x32xf32>
    %616 = arith.addf %614, %615 : vector<2x32xf32>
    %617 = arith.negf %616 : vector<2x32xf32>
    %618 = math.exp %617 : vector<2x32xf32>
    %cst_129 = arith.constant 1.000000e+00 : f32
    %619 = vector.broadcast %cst_129 : f32 to vector<2x32xf32>
    %620 = arith.addf %619, %618 : vector<2x32xf32>
    %621 = arith.divf %619, %620 : vector<2x32xf32>
    %622 = vector.extract_strided_slice %605 {offsets = [0, 64], sizes = [2, 32], strides = [1, 1]} : vector<2x96xf32> to vector<2x32xf32>
    %623 = vector.extract_strided_slice %604 {offsets = [0, 64], sizes = [2, 32], strides = [1, 1]} : vector<2x96xf32> to vector<2x32xf32>
    %624 = arith.addf %623, %510 : vector<2x32xf32>
    %625 = arith.mulf %613, %624 : vector<2x32xf32>
    %626 = arith.addf %622, %625 : vector<2x32xf32>
    %627 = math.tanh %626 : vector<2x32xf32>
    %cst_130 = arith.constant 1.000000e+00 : f32
    %628 = vector.broadcast %cst_130 : f32 to vector<2x32xf32>
    %629 = arith.subf %628, %621 : vector<2x32xf32>
    %630 = arith.mulf %629, %627 : vector<2x32xf32>
    %631 = arith.mulf %621, %603 : vector<2x32xf32>
    %632 = arith.addf %630, %631 : vector<2x32xf32>
    %cst_131 = arith.constant dense<0.000000e+00> : vector<2x96xf32>
    %633 = tpu.matmul %632, %507, %cst_131 {dimension_numbers = #tpu.dot_dimension_numbers<[1], [0], [0], [1], [0, 0, 1, 1], [], []>} : vector<2x32xf32>, vector<32x96xf32>, vector<2x96xf32> -> vector<2x96xf32>
    %634 = vector.extract_strided_slice %506 {offsets = [6, 0], sizes = [2, 96], strides = [1, 1]} : vector<16x192xf32> to vector<2x96xf32>
    %635 = vector.extract_strided_slice %634 {offsets = [0, 0], sizes = [2, 32], strides = [1, 1]} : vector<2x96xf32> to vector<2x32xf32>
    %636 = vector.extract_strided_slice %633 {offsets = [0, 0], sizes = [2, 32], strides = [1, 1]} : vector<2x96xf32> to vector<2x32xf32>
    %637 = arith.addf %635, %636 : vector<2x32xf32>
    %638 = arith.negf %637 : vector<2x32xf32>
    %639 = math.exp %638 : vector<2x32xf32>
    %cst_132 = arith.constant 1.000000e+00 : f32
    %640 = vector.broadcast %cst_132 : f32 to vector<2x32xf32>
    %641 = arith.addf %640, %639 : vector<2x32xf32>
    %642 = arith.divf %640, %641 : vector<2x32xf32>
    %643 = vector.extract_strided_slice %634 {offsets = [0, 32], sizes = [2, 32], strides = [1, 1]} : vector<2x96xf32> to vector<2x32xf32>
    %644 = vector.extract_strided_slice %633 {offsets = [0, 32], sizes = [2, 32], strides = [1, 1]} : vector<2x96xf32> to vector<2x32xf32>
    %645 = arith.addf %643, %644 : vector<2x32xf32>
    %646 = arith.negf %645 : vector<2x32xf32>
    %647 = math.exp %646 : vector<2x32xf32>
    %cst_133 = arith.constant 1.000000e+00 : f32
    %648 = vector.broadcast %cst_133 : f32 to vector<2x32xf32>
    %649 = arith.addf %648, %647 : vector<2x32xf32>
    %650 = arith.divf %648, %649 : vector<2x32xf32>
    %651 = vector.extract_strided_slice %634 {offsets = [0, 64], sizes = [2, 32], strides = [1, 1]} : vector<2x96xf32> to vector<2x32xf32>
    %652 = vector.extract_strided_slice %633 {offsets = [0, 64], sizes = [2, 32], strides = [1, 1]} : vector<2x96xf32> to vector<2x32xf32>
    %653 = arith.addf %652, %510 : vector<2x32xf32>
    %654 = arith.mulf %642, %653 : vector<2x32xf32>
    %655 = arith.addf %651, %654 : vector<2x32xf32>
    %656 = math.tanh %655 : vector<2x32xf32>
    %cst_134 = arith.constant 1.000000e+00 : f32
    %657 = vector.broadcast %cst_134 : f32 to vector<2x32xf32>
    %658 = arith.subf %657, %650 : vector<2x32xf32>
    %659 = arith.mulf %658, %656 : vector<2x32xf32>
    %660 = arith.mulf %650, %632 : vector<2x32xf32>
    %661 = arith.addf %659, %660 : vector<2x32xf32>
    %cst_135 = arith.constant dense<0.000000e+00> : vector<2x96xf32>
    %662 = tpu.matmul %661, %507, %cst_135 {dimension_numbers = #tpu.dot_dimension_numbers<[1], [0], [0], [1], [0, 0, 1, 1], [], []>} : vector<2x32xf32>, vector<32x96xf32>, vector<2x96xf32> -> vector<2x96xf32>
    %663 = vector.extract_strided_slice %506 {offsets = [8, 0], sizes = [2, 96], strides = [1, 1]} : vector<16x192xf32> to vector<2x96xf32>
    %664 = vector.extract_strided_slice %663 {offsets = [0, 0], sizes = [2, 32], strides = [1, 1]} : vector<2x96xf32> to vector<2x32xf32>
    %665 = vector.extract_strided_slice %662 {offsets = [0, 0], sizes = [2, 32], strides = [1, 1]} : vector<2x96xf32> to vector<2x32xf32>
    %666 = arith.addf %664, %665 : vector<2x32xf32>
    %667 = arith.negf %666 : vector<2x32xf32>
    %668 = math.exp %667 : vector<2x32xf32>
    %cst_136 = arith.constant 1.000000e+00 : f32
    %669 = vector.broadcast %cst_136 : f32 to vector<2x32xf32>
    %670 = arith.addf %669, %668 : vector<2x32xf32>
    %671 = arith.divf %669, %670 : vector<2x32xf32>
    %672 = vector.extract_strided_slice %663 {offsets = [0, 32], sizes = [2, 32], strides = [1, 1]} : vector<2x96xf32> to vector<2x32xf32>
    %673 = vector.extract_strided_slice %662 {offsets = [0, 32], sizes = [2, 32], strides = [1, 1]} : vector<2x96xf32> to vector<2x32xf32>
    %674 = arith.addf %672, %673 : vector<2x32xf32>
    %675 = arith.negf %674 : vector<2x32xf32>
    %676 = math.exp %675 : vector<2x32xf32>
    %cst_137 = arith.constant 1.000000e+00 : f32
    %677 = vector.broadcast %cst_137 : f32 to vector<2x32xf32>
    %678 = arith.addf %677, %676 : vector<2x32xf32>
    %679 = arith.divf %677, %678 : vector<2x32xf32>
    %680 = vector.extract_strided_slice %663 {offsets = [0, 64], sizes = [2, 32], strides = [1, 1]} : vector<2x96xf32> to vector<2x32xf32>
    %681 = vector.extract_strided_slice %662 {offsets = [0, 64], sizes = [2, 32], strides = [1, 1]} : vector<2x96xf32> to vector<2x32xf32>
    %682 = arith.addf %681, %510 : vector<2x32xf32>
    %683 = arith.mulf %671, %682 : vector<2x32xf32>
    %684 = arith.addf %680, %683 : vector<2x32xf32>
    %685 = math.tanh %684 : vector<2x32xf32>
    %cst_138 = arith.constant 1.000000e+00 : f32
    %686 = vector.broadcast %cst_138 : f32 to vector<2x32xf32>
    %687 = arith.subf %686, %679 : vector<2x32xf32>
    %688 = arith.mulf %687, %685 : vector<2x32xf32>
    %689 = arith.mulf %679, %661 : vector<2x32xf32>
    %690 = arith.addf %688, %689 : vector<2x32xf32>
    %cst_139 = arith.constant dense<0.000000e+00> : vector<2x96xf32>
    %691 = tpu.matmul %690, %507, %cst_139 {dimension_numbers = #tpu.dot_dimension_numbers<[1], [0], [0], [1], [0, 0, 1, 1], [], []>} : vector<2x32xf32>, vector<32x96xf32>, vector<2x96xf32> -> vector<2x96xf32>
    %692 = vector.extract_strided_slice %506 {offsets = [10, 0], sizes = [2, 96], strides = [1, 1]} : vector<16x192xf32> to vector<2x96xf32>
    %693 = vector.extract_strided_slice %692 {offsets = [0, 0], sizes = [2, 32], strides = [1, 1]} : vector<2x96xf32> to vector<2x32xf32>
    %694 = vector.extract_strided_slice %691 {offsets = [0, 0], sizes = [2, 32], strides = [1, 1]} : vector<2x96xf32> to vector<2x32xf32>
    %695 = arith.addf %693, %694 : vector<2x32xf32>
    %696 = arith.negf %695 : vector<2x32xf32>
    %697 = math.exp %696 : vector<2x32xf32>
    %cst_140 = arith.constant 1.000000e+00 : f32
    %698 = vector.broadcast %cst_140 : f32 to vector<2x32xf32>
    %699 = arith.addf %698, %697 : vector<2x32xf32>
    %700 = arith.divf %698, %699 : vector<2x32xf32>
    %701 = vector.extract_strided_slice %692 {offsets = [0, 32], sizes = [2, 32], strides = [1, 1]} : vector<2x96xf32> to vector<2x32xf32>
    %702 = vector.extract_strided_slice %691 {offsets = [0, 32], sizes = [2, 32], strides = [1, 1]} : vector<2x96xf32> to vector<2x32xf32>
    %703 = arith.addf %701, %702 : vector<2x32xf32>
    %704 = arith.negf %703 : vector<2x32xf32>
    %705 = math.exp %704 : vector<2x32xf32>
    %cst_141 = arith.constant 1.000000e+00 : f32
    %706 = vector.broadcast %cst_141 : f32 to vector<2x32xf32>
    %707 = arith.addf %706, %705 : vector<2x32xf32>
    %708 = arith.divf %706, %707 : vector<2x32xf32>
    %709 = vector.extract_strided_slice %692 {offsets = [0, 64], sizes = [2, 32], strides = [1, 1]} : vector<2x96xf32> to vector<2x32xf32>
    %710 = vector.extract_strided_slice %691 {offsets = [0, 64], sizes = [2, 32], strides = [1, 1]} : vector<2x96xf32> to vector<2x32xf32>
    %711 = arith.addf %710, %510 : vector<2x32xf32>
    %712 = arith.mulf %700, %711 : vector<2x32xf32>
    %713 = arith.addf %709, %712 : vector<2x32xf32>
    %714 = math.tanh %713 : vector<2x32xf32>
    %cst_142 = arith.constant 1.000000e+00 : f32
    %715 = vector.broadcast %cst_142 : f32 to vector<2x32xf32>
    %716 = arith.subf %715, %708 : vector<2x32xf32>
    %717 = arith.mulf %716, %714 : vector<2x32xf32>
    %718 = arith.mulf %708, %690 : vector<2x32xf32>
    %719 = arith.addf %717, %718 : vector<2x32xf32>
    %cst_143 = arith.constant dense<0.000000e+00> : vector<2x96xf32>
    %720 = tpu.matmul %719, %507, %cst_143 {dimension_numbers = #tpu.dot_dimension_numbers<[1], [0], [0], [1], [0, 0, 1, 1], [], []>} : vector<2x32xf32>, vector<32x96xf32>, vector<2x96xf32> -> vector<2x96xf32>
    %721 = vector.extract_strided_slice %506 {offsets = [12, 0], sizes = [2, 96], strides = [1, 1]} : vector<16x192xf32> to vector<2x96xf32>
    %722 = vector.extract_strided_slice %721 {offsets = [0, 0], sizes = [2, 32], strides = [1, 1]} : vector<2x96xf32> to vector<2x32xf32>
    %723 = vector.extract_strided_slice %720 {offsets = [0, 0], sizes = [2, 32], strides = [1, 1]} : vector<2x96xf32> to vector<2x32xf32>
    %724 = arith.addf %722, %723 : vector<2x32xf32>
    %725 = arith.negf %724 : vector<2x32xf32>
    %726 = math.exp %725 : vector<2x32xf32>
    %cst_144 = arith.constant 1.000000e+00 : f32
    %727 = vector.broadcast %cst_144 : f32 to vector<2x32xf32>
    %728 = arith.addf %727, %726 : vector<2x32xf32>
    %729 = arith.divf %727, %728 : vector<2x32xf32>
    %730 = vector.extract_strided_slice %721 {offsets = [0, 32], sizes = [2, 32], strides = [1, 1]} : vector<2x96xf32> to vector<2x32xf32>
    %731 = vector.extract_strided_slice %720 {offsets = [0, 32], sizes = [2, 32], strides = [1, 1]} : vector<2x96xf32> to vector<2x32xf32>
    %732 = arith.addf %730, %731 : vector<2x32xf32>
    %733 = arith.negf %732 : vector<2x32xf32>
    %734 = math.exp %733 : vector<2x32xf32>
    %cst_145 = arith.constant 1.000000e+00 : f32
    %735 = vector.broadcast %cst_145 : f32 to vector<2x32xf32>
    %736 = arith.addf %735, %734 : vector<2x32xf32>
    %737 = arith.divf %735, %736 : vector<2x32xf32>
    %738 = vector.extract_strided_slice %721 {offsets = [0, 64], sizes = [2, 32], strides = [1, 1]} : vector<2x96xf32> to vector<2x32xf32>
    %739 = vector.extract_strided_slice %720 {offsets = [0, 64], sizes = [2, 32], strides = [1, 1]} : vector<2x96xf32> to vector<2x32xf32>
    %740 = arith.addf %739, %510 : vector<2x32xf32>
    %741 = arith.mulf %729, %740 : vector<2x32xf32>
    %742 = arith.addf %738, %741 : vector<2x32xf32>
    %743 = math.tanh %742 : vector<2x32xf32>
    %cst_146 = arith.constant 1.000000e+00 : f32
    %744 = vector.broadcast %cst_146 : f32 to vector<2x32xf32>
    %745 = arith.subf %744, %737 : vector<2x32xf32>
    %746 = arith.mulf %745, %743 : vector<2x32xf32>
    %747 = arith.mulf %737, %719 : vector<2x32xf32>
    %748 = arith.addf %746, %747 : vector<2x32xf32>
    %cst_147 = arith.constant dense<0.000000e+00> : vector<2x96xf32>
    %749 = tpu.matmul %748, %507, %cst_147 {dimension_numbers = #tpu.dot_dimension_numbers<[1], [0], [0], [1], [0, 0, 1, 1], [], []>} : vector<2x32xf32>, vector<32x96xf32>, vector<2x96xf32> -> vector<2x96xf32>
    %750 = vector.extract_strided_slice %506 {offsets = [14, 0], sizes = [2, 96], strides = [1, 1]} : vector<16x192xf32> to vector<2x96xf32>
    %751 = vector.extract_strided_slice %750 {offsets = [0, 0], sizes = [2, 32], strides = [1, 1]} : vector<2x96xf32> to vector<2x32xf32>
    %752 = vector.extract_strided_slice %749 {offsets = [0, 0], sizes = [2, 32], strides = [1, 1]} : vector<2x96xf32> to vector<2x32xf32>
    %753 = arith.addf %751, %752 : vector<2x32xf32>
    %754 = arith.negf %753 : vector<2x32xf32>
    %755 = math.exp %754 : vector<2x32xf32>
    %cst_148 = arith.constant 1.000000e+00 : f32
    %756 = vector.broadcast %cst_148 : f32 to vector<2x32xf32>
    %757 = arith.addf %756, %755 : vector<2x32xf32>
    %758 = arith.divf %756, %757 : vector<2x32xf32>
    %759 = vector.extract_strided_slice %750 {offsets = [0, 32], sizes = [2, 32], strides = [1, 1]} : vector<2x96xf32> to vector<2x32xf32>
    %760 = vector.extract_strided_slice %749 {offsets = [0, 32], sizes = [2, 32], strides = [1, 1]} : vector<2x96xf32> to vector<2x32xf32>
    %761 = arith.addf %759, %760 : vector<2x32xf32>
    %762 = arith.negf %761 : vector<2x32xf32>
    %763 = math.exp %762 : vector<2x32xf32>
    %cst_149 = arith.constant 1.000000e+00 : f32
    %764 = vector.broadcast %cst_149 : f32 to vector<2x32xf32>
    %765 = arith.addf %764, %763 : vector<2x32xf32>
    %766 = arith.divf %764, %765 : vector<2x32xf32>
    %767 = vector.extract_strided_slice %750 {offsets = [0, 64], sizes = [2, 32], strides = [1, 1]} : vector<2x96xf32> to vector<2x32xf32>
    %768 = vector.extract_strided_slice %749 {offsets = [0, 64], sizes = [2, 32], strides = [1, 1]} : vector<2x96xf32> to vector<2x32xf32>
    %769 = arith.addf %768, %510 : vector<2x32xf32>
    %770 = arith.mulf %758, %769 : vector<2x32xf32>
    %771 = arith.addf %767, %770 : vector<2x32xf32>
    %772 = math.tanh %771 : vector<2x32xf32>
    %cst_150 = arith.constant 1.000000e+00 : f32
    %773 = vector.broadcast %cst_150 : f32 to vector<2x32xf32>
    %774 = arith.subf %773, %766 : vector<2x32xf32>
    %775 = arith.mulf %774, %772 : vector<2x32xf32>
    %776 = arith.mulf %766, %748 : vector<2x32xf32>
    %777 = arith.addf %775, %776 : vector<2x32xf32>
    %c0_151 = arith.constant 0 : index
    %c0_152 = arith.constant 0 : index
    %778 = vector.load %arg4[%c0_151, %c0_152] : memref<65x32xf32, #tpu.memory_space<vmem>>, vector<65x32xf32>
    %779 = vector.extract_strided_slice %778 {offsets = [0, 0], sizes = [32, 32], strides = [1, 1]} : vector<65x32xf32> to vector<32x32xf32>
    %cst_153 = arith.constant dense<0.000000e+00> : vector<2x32xf32>
    %780 = tpu.matmul %777, %779, %cst_153 {dimension_numbers = #tpu.dot_dimension_numbers<[1], [0], [0], [1], [0, 0, 1, 1], [], []>} : vector<2x32xf32>, vector<32x32xf32>, vector<2x32xf32> -> vector<2x32xf32>
    %781 = vector.extract_strided_slice %778 {offsets = [32, 0], sizes = [32, 32], strides = [1, 1]} : vector<65x32xf32> to vector<32x32xf32>
    %cst_154 = arith.constant dense<0.000000e+00> : vector<2x32xf32>
    %782 = tpu.matmul %574, %781, %cst_154 {dimension_numbers = #tpu.dot_dimension_numbers<[1], [0], [0], [1], [0, 0, 1, 1], [], []>} : vector<2x32xf32>, vector<32x32xf32>, vector<2x32xf32> -> vector<2x32xf32>
    %783 = arith.addf %780, %782 : vector<2x32xf32>
    %784 = vector.extract_strided_slice %778 {offsets = [64, 0], sizes = [1, 32], strides = [1, 1]} : vector<65x32xf32> to vector<1x32xf32>
    %785 = vector.broadcast %784 : vector<1x32xf32> to vector<2x32xf32>
    %786 = arith.addf %783, %785 : vector<2x32xf32>
    %c0_155 = arith.constant 0 : index
    %c0_156 = arith.constant 0 : index
    %787 = vector.load %arg5[%c0_155, %c0_156] : memref<2x32xf32, #tpu.memory_space<vmem>>, vector<2x32xf32>
    tpu.vector_store %arg5[%c0_155, %c0_156], %786 {strides = array<i32>} : memref<2x32xf32, #tpu.memory_space<vmem>>, vector<2x32xf32>,
    return
  }
}

</mosaic_0001>

<bundles_post_ra>
// kernel: gru_model_forward.1
= control target key start
LH: loop header
LB: loop body
LE: loop exit
PB: predicated region body
PF: predicated region fallthrough
CT: control target
= control target key end

     0   :  { %v4177_v2 = vmov 0   ;;  %v4178_v7 = vmov 0.0|0.0   ;;  %v4179_v13 = vmov 0.0   ;;  %vm4180_vm0 = vmmov 0   ;;  %s4958_s0 = inlined_call_operand.vmem [shape: s32[16,1], index: 0, kind: input, shape index: {}]   ;;  %s4959_s1 = inlined_call_operand.vmem [shape: f32[96,192], index: 1, kind: input, shape index: {}]   ;;  %s4960_s2 = inlined_call_operand.vmem [shape: f32[128,96], index: 2, kind: input, shape index: {}]   ;;  %s4961_s3 = inlined_call_operand.vmem [shape: f32[2,256], index: 3, kind: input, shape index: {}]   ;;  %s4962_s4 = inlined_call_operand.vmem [shape: f32[65,32], index: 4, kind: input, shape index: {}]   ;;  %s4963_s5 = inlined_call_operand.hbm [shape: f32[2,32], index: 5, kind: output, shape index: {}]  }
   0x1   :  { %v21_v0 = vld [vmem:[%s4958_s0] sm:$0xff]  ;;  %v38_v1 = vld [vmem:[%s4959_s1 + $0x8] sm:$0xff]  ;;  %3965 = vset.pattern.permute.xlu0 %v4177_v2  ;;  %v40_v4 = vld [vmem:[%s4959_s1 + $0x18] sm:$0xff]  ;;  %3779 = vmatprep.subr.bf16.mxu1 %v4178_v7 }
   0x2   :  { %v22_v3 = vld [vmem:[%s4958_s0 + $0x8] sm:$0xff]  ;;  %v37_v5 = vld [vmem:[%s4959_s1] sm:$0xff]  ;;  %v39_v6 = vld [vmem:[%s4959_s1 + $0x10] sm:$0xff]  ;;  %26 = vperm.xlu0 %3965, %v21_v0   ;;  %v3771_v8 = vpack.c.bf16 %v40_v4, %v38_v1  ;;  %128 = vmatprep.mubr.f32.mxu0 %v4179_v13 }
   0x3   :  { %v3773_v9 = vpack.c.bf16 %v39_v6, %v37_v5  ;;  %v42_v10 = vld [vmem:[%s4959_s1 + $0x28] sm:$0xff]  ;;  %v44_v11 = vld [vmem:[%s4959_s1 + $0x38] sm:$0xff]  ;;  %v141_v12 = vld [vmem:[%s4960_s2] sm:$0xff]  ;;  %3482 = vmatprep.mubr.msk.f32.mxu1 %vm4180_vm0, %v4179_v13 }
   0x4   :  { %v3775_v14 = vpack.c.bf16 %v44_v11, %v42_v10  ;;  %v142_v15 = vld [vmem:[%s4960_s2 + $0x8] sm:$0xff]  ;;  %v41_v16 = vld [vmem:[%s4959_s1 + $0x20] sm:$0xff]  ;;  %v43_v17 = vld [vmem:[%s4959_s1 + $0x30] sm:$0xff]  ;;  %3772 = vmatprep.subr.bf16.mxu0 %v3771_v8 }
   0x5   :  { %v4253_v18 = vpack.c.bf16 %v142_v15, %v141_v12  ;;  %v143_v19 = vld [vmem:[%s4960_s2 + $0x10] sm:$0xff]  ;;  %v144_v20 = vld [vmem:[%s4960_s2 + $0x18] sm:$0xff]  ;;  %3774 = vmatpush1.bf16.msra.mxu0 %v3773_v9  ;;  %v3777_v21 = vpack.c.bf16 %v43_v17, %v41_v16 }
   0x6   :  { %10 = vsyncpa [#allocation4], 0  ;;  %29 = vperm.xlu0 %3965, %v22_v3   ;;  %3776 = vmatprep.subr.bf16.mxu0 %v3775_v14  ;;  %v4264_v22 = vpack.c.bf16 %v144_v20, %v143_v19  ;;  %v4272_v23 = vld [vmem:[%s4961_s3 + $0x2] ss:$0 sm:$0xff]  ;;  %s4181_s22 = smov 96   ;;  %v23_v24 = vlaneseq  ;;  %v151_v27 = vld [vmem:[%s4960_s2 + $0x28] sm:$0xff] }
   0x7   :  { %3781 = vmatpush3.bf16.msra.mxu1 %v4253_v18  ;;  %350 = vrot.lane.b32.xlu1 %v4272_v23, %s4181_s22  ;;  %v150_v26 = vld [vmem:[%s4960_s2 + $0x20] sm:$0xff]  ;;  %vm57_vm1 = vcmask 261120   ;;  %v152_v30 = vld [vmem:[%s4960_s2 + $0x30] sm:$0xff]  ;;  %v153_v31 = vld [vmem:[%s4960_s2 + $0x38] sm:$0xff]  ;;  %s4182_s7 = smov 32   ;;  %s4183_s8 = smov 64  }
   0x8   :  { %3782 = vmatprep.subr.bf16.mxu1 %v4178_v7  ;;  %v24_v25 = vand.u32 127, %v23_v24  ;;  %v4290_v29 = vpack.c.bf16 %v151_v27, %v150_v26  ;;  %v4302_v34 = vpack.c.bf16 %v153_v31, %v152_v30  ;;  %v4318_v38 = vshrl.u32 %v23_v24, 7  ;;  %v45_v40 = vld [vmem:[%s4961_s3] ss:$2 sm:$0x3] }
   0x9   :  { %3778 = vmatpush1.bf16.msra.mxu0 %v3777_v21  ;;  %vm258_vm4 = vcmask 254976   ;;  %vm489_vm5 = vcmask 257026   ;;  %vm959_vm6 = vcmask 261126   ;;  %vm1077_vm7 = vcmask 517376  }
   0xa   :  { %3785 = vmatprep.subr.bf16.mxu0 %v4178_v7  ;;  %v49_v39 = vsub.s32 0, %v4318_v38  ;;  %v53_v41 = vsub.s32 1, %v4318_v38  ;;  %vm724_vm8 = vcmask 259076   ;;  %vm610_vm9 = vcmask 521476   ;;  %v3099_v38 = vld [vmem:[%s4962_s4 + $0x30] sm:$0xff] }
   0xb   :  { %3784 = vmatpush3.bf16.msra.mxu1 %v4264_v22  ;;  %vm378_vm10 = vcmask 523526   ;;  %vm845_vm11 = vcmask 519426   ;;  %vm2030_vm12 = vcmask 523264  }
   0xc   :  { %3791 = vmatprep.subr.bf16.mxu1 %v4178_v7  ;;  %v50_v42 = vrot.slane %v45_v40, %v49_v39  ;;  %v54_v43 = vrot.slane %v45_v40, %v53_v41 }
   0xe   :  { %3483 = vmatmul.mubr.f32.vlgmr.msra.gmra.mrb[0].mxu1 %v4179_v13 }
   0xf   :  { %3793 = vmatpush3.bf16.msra.mxu1 %v4253_v18  ;;  %3504 = vmatprep.mubr.msk.f32.mxu1 %vm4180_vm0, %v4179_v13 }
  0x10   :  { %3794 = vmatprep.subr.bf16.mxu1 %v4178_v7 }
  0x13   :  { %3796 = vmatpush3.bf16.msra.mxu1 %v4264_v22 }
  0x14   :  { %3803 = vmatprep.subr.bf16.mxu1 %v4178_v7 }
  0x79   :  { %v4333_v50 = vpop.permute.xlu1 %350 }
  0x81   :  { %v27_v28 = vpop.permute.xlu0 %26 }
  0x82   :  { %vm31_vm2 = vcmp.eq.s32.totalorder %v24_v25, %v27_v28 }
  0x83   :  { %v3272_v32 = vsel %vm31_vm2, 1.0, %v4179_v13 }
  0x84   :  { %3274 = vmatmul.mubr.msk.f32.vlgmr.msra.gmra.mrb[0].mxu0 %vm57_vm1, %v3272_v32 }
  0x85   :  { %3787 = vmatpush3.bf16.msra.mxu0 %v4290_v29  ;;  %v30_v33 = vpop.permute.xlu0 %29  ;;  %134 = vmatprep.mubr.f32.mxu0 %v4179_v13 }
  0x86   :  { %vm32_vm3 = vcmp.eq.s32.totalorder %v24_v25, %v30_v33  ;;  %3788 = vmatprep.subr.bf16.mxu0 %v4178_v7 }
  0x87   :  { %v3273_v35 = vsel %vm32_vm3, 1.0, %v4179_v13 }
  0x88   :  { %3275 = vmatmul.mubr.msk.f32.gmra.mrb[2].mxu0 %vm57_vm1, %v3273_v35 }
  0x89   :  { %3790 = vmatpush3.bf16.msra.mxu0 %v4302_v34  ;;  %3493 = vmatprep.mubr.msk.f32.mxu0 %vm4180_vm0, %v4179_v13 }
  0x8a   :  { %3797 = vmatprep.subr.bf16.mxu0 %v4178_v7 }
  0x8c   :  { %3494 = vmatmul.mubr.f32.vlgmr.msra.gmra.mrb[4].mxu0 %v4179_v13 }
  0x8d   :  { %3799 = vmatpush3.bf16.msra.mxu0 %v4290_v29  ;;  %3515 = vmatprep.mubr.msk.f32.mxu0 %vm4180_vm0, %v4179_v13 }
  0x8e   :  { %3800 = vmatprep.subr.bf16.mxu0 %v4178_v7 }
  0x91   :  { %3802 = vmatpush3.bf16.msra.mxu0 %v4302_v34 }
  0x92   :  { %3809 = vmatprep.subr.bf16.mxu0 %v4178_v7 }
  0xe1   :  { %v223_v36 = vpop.f32.mrb[0].mxu1 }
  0xe2   :  { %v3484_v37 = vpop.f32.mrb[1].mxu1  ;;  %v234_v1 = vadd.f32 %v4272_v23, %v223_v36 }
 0x157   :  { %v130_v44 = vpop.f32.mrb[0].mxu0 }
 0x158   :  { %v4329_v45 = vadd.f32 %v130_v44, %v50_v42  ;;  %v132_v46 = vpop.f32.mrb[1].mxu0 }
 0x159   :  { %v4331_v47 = vadd.f32 %v132_v46, %v54_v43 }
 0x15a   :  { %v227_v2 = vadd.f32 %v223_v36, %v4329_v45 }
 0x15b   :  { %v136_v48 = vpop.f32.mrb[2].mxu0 }
 0x15c   :  { %v138_v49 = vpop.f32.mrb[3].mxu0  ;;  %v4338_v56 = vadd.f32 %v136_v48, %v50_v42  ;;  %v3277_v3 = vmul.f32 -1.442695, %v227_v2 }
 0x15d   :  { %v4345_v5 = vadd.f32 %v138_v49, %v54_v43 }
 0x15f   :  { %v326_v51 = vpop.f32.mrb[4].mxu0 }
 0x160   :  { %v331_v52 = vrot.slane %v326_v51, 2  ;;  %v353_v53 = vadd.f32 %v4333_v50, %v326_v51  ;;  %v3495_v54 = vpop.f32.mrb[5].mxu0 }
 0x162   :  { %v355_v55 = vrot.slane %v353_v53, 2  ;;  %332 = vrot.lane.b32.xlu1 %v331_v52, %s4181_s22 }
 0x164   :  { %356 = vrot.lane.b32.xlu0 %v355_v55, %s4182_s7 }
 0x1d4   :  { %v333_v57 = vpop.permute.xlu1 %332 }
 0x1d5   :  { %v335_v58 = vadd.f32 %v333_v57, %v4338_v56  ;;  %v342_v15 = vadd.f32 %v333_v57, %v4345_v5 }
 0x1d6   :  { %v357_v63 = vpop.permute.xlu0 %356 }
 0x1d7   :  { %v3278_v59 = vmul.f32 -1.442695, %v335_v58  ;;  %v3279_v16 = vmul.f32 -1.442695, %v342_v15 }
 0x1d9   :  { %3966 = vpow2.f32 %v3278_v59 }
 0x1e3   :  { %v3967_v60 = vpop.eup %3966 }
 0x1e4   :  { %v339_v61 = vadd.f32 1.0, %v3967_v60 }
 0x1e6   :  { %3968 = vrcp.f32 %v339_v61 }
 0x1e7   :  { %3970 = vpow2.f32 %v3277_v3 }
 0x1f0   :  { %v3969_v62 = vpop.eup %3968 }
 0x1f1   :  { %v359_v0 = vmul.f32 %v3969_v62, %v357_v63  ;;  %v3971_v4 = vpop.eup %3970 }
 0x1f2   :  { %v231_v8 = vadd.f32 1.0, %v3971_v4 }
 0x1f3   :  { %361 = vrot.lane.b32.xlu1 %v359_v0, %s4183_s8 }
 0x1f7   :  { %236 = vrot.lane.b32.xlu1 %v234_v1, %s4183_s8 }
 0x265   :  { %v362_v6 = vpop.permute.xlu1 %361 }
 0x266   :  { %v364_v9 = vadd.f32 %v362_v6, %v4345_v5 }
 0x268   :  { %3972 = vtanh.f32 %v364_v9 }
 0x269   :  { %3974 = vrcp.f32 %v231_v8  ;;  %v237_v11 = vpop.permute.xlu1 %236 }
 0x26a   :  { %3976 = vpow2.f32 %v3279_v16 }
 0x272   :  { %v3973_v10 = vpop.eup %3972 }
 0x273   :  { %368 = vrot.lane.b32.xlu0 %v3973_v10, %s4181_s22  ;;  %v3975_v12 = vpop.eup %3974 }
 0x274   :  { %v239_v14 = vmul.f32 %v3975_v12, %v237_v11  ;;  %v3977_v17 = vpop.eup %3976  ;;  %v246_v33 = vsub.f32 1.0, %v3975_v12  ;;  %v252_v36 = vmul.f32 0.0, %v3975_v12 }
 0x275   :  { %v346_v19 = vadd.f32 1.0, %v3977_v17 }
 0x277   :  { %241 = vrot.lane.b32.xlu0 %v239_v14, %s4183_s8  ;;  %3978 = vrcp.f32 %v346_v19 }
 0x281   :  { %v3979_v20 = vpop.eup %3978 }
 0x282   :  { %v366_v21 = vsub.f32 1.0, %v3979_v20  ;;  %v372_v25 = vmul.f32 0.0, %v3979_v20 }
 0x2e5   :  { %v369_v24 = vpop.permute.xlu0 %368 }
 0x2e6   :  { %v371_v26 = vmul.f32 %v369_v24, %v366_v21 }
 0x2e8   :  { %v4351_v27 = vadd.f32 %v372_v25, %v371_v26 }
 0x2e9   :  { %v242_v28 = vpop.permute.xlu0 %241 }
 0x2ea   :  { %v491_v30 = vrot.slane %v4351_v27, 6  ;;  %v244_v31 = vadd.f32 %v242_v28, %v4329_v45  ;;  %v602_v21 = vrot.slane %v4351_v27, 2 }
 0x2ec   :  { %3980 = vtanh.f32 %v244_v31  ;;  %3516 = vmatmul.mubr.msk.f32.vlgmr.msra.gmra.mrb[6].mxu0 %vm57_vm1, %v491_v30 }
 0x2ed   :  { %3811 = vmatpush3.bf16.msra.mxu0 %v4290_v29  ;;  %3537 = vmatprep.mubr.msk.f32.mxu0 %vm4180_vm0, %v4179_v13 }
 0x2ee   :  { %3812 = vmatprep.subr.bf16.mxu0 %v4178_v7 }
 0x2f1   :  { %3814 = vmatpush3.bf16.msra.mxu0 %v4302_v34 }
 0x2f2   :  { %3821 = vmatprep.subr.bf16.mxu0 %v4178_v7 }
 0x2f6   :  { %v3981_v32 = vpop.eup %3980 }
 0x2f7   :  { %248 = vrot.lane.b32.xlu1 %v3981_v32, %s4181_s22 }
 0x369   :  { %v249_v35 = vpop.permute.xlu1 %248 }
 0x36a   :  { %v251_v37 = vmul.f32 %v249_v35, %v246_v33 }
 0x36c   :  { %v4363_v40 = vadd.f32 %v252_v36, %v251_v37 }
 0x36e   :  { %255 = vrot.lane.b32.xlu0 %v4363_v40, %s4181_s22  ;;  %v481_v35 = vrot.slane %v4363_v40, 6 }
 0x3bf   :  { %v560_v42 = vpop.f32.mrb[6].mxu0 }
 0x3c0   :  { %v565_v43 = vrot.slane %v560_v42, 4  ;;  %v583_v44 = vadd.f32 %v560_v42, %v4333_v50  ;;  %v3517_v46 = vpop.f32.mrb[7].mxu0 }
 0x3c2   :  { %v585_v48 = vrot.slane %v583_v44, 4  ;;  %566 = vrot.lane.b32.xlu1 %v565_v43, %s4181_s22 }
 0x3c4   :  { %586 = vrot.lane.b32.xlu0 %v585_v48, %s4182_s7 }
 0x3e0   :  { %v256_v49 = vpop.permute.xlu0 %255 }
 0x3e1   :  { %259 = vst.msk [vmem:[#allocation2] sm:$0x3] %vm258_vm4, %v256_v49  ;;  %3505 = vmatmul.mubr.msk.f32.vlgmr.msra.gmra.mrb[2].mxu1 %vm57_vm1, %v256_v49 }
 0x3e2   :  { %3805 = vmatpush3.bf16.msra.mxu1 %v4253_v18  ;;  %3526 = vmatprep.mubr.msk.f32.mxu1 %vm4180_vm0, %v4179_v13 }
 0x3e3   :  { %3806 = vmatprep.subr.bf16.mxu1 %v4178_v7 }
 0x3e6   :  { %3808 = vmatpush3.bf16.msra.mxu1 %v4264_v22 }
 0x3e7   :  { %3815 = vmatprep.subr.bf16.mxu1 %v4178_v7 }
 0x434   :  { %v567_v51 = vpop.permute.xlu1 %566 }
 0x435   :  { %v569_v52 = vadd.f32 %v567_v51, %v4338_v56  ;;  %v576_v10 = vadd.f32 %v567_v51, %v4345_v5 }
 0x436   :  { %v587_v58 = vpop.permute.xlu0 %586 }
 0x437   :  { %v3283_v53 = vmul.f32 -1.442695, %v569_v52  ;;  %v3284_v11 = vmul.f32 -1.442695, %v576_v10 }
 0x439   :  { %3982 = vpow2.f32 %v3283_v53 }
 0x443   :  { %v3983_v54 = vpop.eup %3982 }
 0x444   :  { %v573_v55 = vadd.f32 1.0, %v3983_v54 }
 0x446   :  { %3984 = vrcp.f32 %v573_v55 }
 0x450   :  { %v3985_v57 = vpop.eup %3984 }
 0x451   :  { %v589_v59 = vmul.f32 %v3985_v57, %v587_v58 }
 0x453   :  { %591 = vrot.lane.b32.xlu1 %v589_v59, %s4183_s8 }
 0x4b4   :  { %v448_v60 = vpop.f32.mrb[2].mxu1 }
 0x4b5   :  { %v462_v61 = vadd.f32 %v4272_v23, %v448_v60  ;;  %v3506_v62 = vpop.f32.mrb[3].mxu1  ;;  %v453_v3 = vrot.slane %v448_v60, 6 }
 0x4b7   :  { %v464_v63 = vrot.slane %v462_v61, 6  ;;  %v455_v4 = vadd.f32 %v453_v3, %v4329_v45 }
 0x4b9   :  { %465 = vrot.lane.b32.xlu1 %v464_v63, %s4183_s8  ;;  %v3281_v6 = vmul.f32 -1.442695, %v455_v4 }
 0x4c5   :  { %v592_v0 = vpop.permute.xlu1 %591 }
 0x4c6   :  { %v594_v1 = vadd.f32 %v592_v0, %v4345_v5 }
 0x4c8   :  { %3986 = vtanh.f32 %v594_v1 }
 0x4c9   :  { %3988 = vpow2.f32 %v3281_v6 }
 0x4d2   :  { %v3987_v2 = vpop.eup %3986 }
 0x4d3   :  { %598 = vrot.lane.b32.xlu0 %v3987_v2, %s4181_s22  ;;  %v3989_v8 = vpop.eup %3988 }
 0x4d4   :  { %v459_v9 = vadd.f32 1.0, %v3989_v8 }
 0x4d6   :  { %3990 = vrcp.f32 %v459_v9 }
 0x4d7   :  { %3992 = vpow2.f32 %v3284_v11 }
 0x4e0   :  { %v3991_v12 = vpop.eup %3990 }
 0x4e1   :  { %v3993_v16 = vpop.eup %3992  ;;  %v475_v36 = vsub.f32 1.0, %v3991_v12  ;;  %v483_v48 = vmul.f32 %v3991_v12, %v481_v35 }
 0x4e2   :  { %v580_v17 = vadd.f32 1.0, %v3993_v16 }
 0x4e4   :  { %3994 = vrcp.f32 %v580_v17 }
 0x4ee   :  { %v3995_v19 = vpop.eup %3994 }
 0x4ef   :  { %v596_v20 = vsub.f32 1.0, %v3995_v19  ;;  %v604_v25 = vmul.f32 %v3995_v19, %v602_v21 }
 0x52b   :  { %v466_v14 = vpop.permute.xlu1 %465 }
 0x52c   :  { %v468_v15 = vmul.f32 %v3991_v12, %v466_v14 }
 0x52e   :  { %470 = vrot.lane.b32.xlu0 %v468_v15, %s4183_s8 }
 0x545   :  { %v599_v24 = vpop.permute.xlu0 %598 }
 0x546   :  { %v601_v26 = vmul.f32 %v599_v24, %v596_v20 }
 0x548   :  { %v4388_v28 = vadd.f32 %v604_v25, %v601_v26 }
 0x54a   :  { %v726_v30 = vrot.slane %v4388_v28, 4  ;;  %v837_v15 = vrot.slane %v4388_v28, 2 }
 0x54c   :  { %3538 = vmatmul.mubr.msk.f32.vlgmr.msra.gmra.mrb[8].mxu0 %vm57_vm1, %v726_v30 }
 0x54d   :  { %3823 = vmatpush3.bf16.msra.mxu0 %v4290_v29  ;;  %3559 = vmatprep.mubr.msk.f32.mxu0 %vm4180_vm0, %v4179_v13 }
 0x54e   :  { %3824 = vmatprep.subr.bf16.mxu0 %v4178_v7 }
 0x551   :  { %3826 = vmatpush3.bf16.msra.mxu0 %v4302_v34 }
 0x552   :  { %3833 = vmatprep.subr.bf16.mxu0 %v4178_v7 }
 0x5a0   :  { %v471_v31 = vpop.permute.xlu0 %470 }
 0x5a1   :  { %v473_v32 = vadd.f32 %v471_v31, %v4329_v45 }
 0x5a3   :  { %3996 = vtanh.f32 %v473_v32 }
 0x5ad   :  { %v3997_v33 = vpop.eup %3996 }
 0x5ae   :  { %477 = vrot.lane.b32.xlu1 %v3997_v33, %s4181_s22 }
 0x61f   :  { %v795_v37 = vpop.f32.mrb[8].mxu0 }
 0x620   :  { %v478_v42 = vpop.permute.xlu1 %477  ;;  %v800_v43 = vrot.slane %v795_v37, 6  ;;  %v818_v44 = vadd.f32 %v795_v37, %v4333_v50  ;;  %v3539_v46 = vpop.f32.mrb[9].mxu0 }
 0x621   :  { %v480_v49 = vmul.f32 %v478_v42, %v475_v36 }
 0x622   :  { %801 = vrot.lane.b32.xlu0 %v800_v43, %s4181_s22  ;;  %v820_v52 = vrot.slane %v818_v44, 6 }
 0x623   :  { %v4402_v51 = vadd.f32 %v483_v48, %v480_v49 }
 0x625   :  { %v612_v53 = vrot.slane %v4402_v51, 2  ;;  %v716_v49 = vrot.slane %v4402_v51, 6 }
 0x626   :  { %821 = vrot.lane.b32.xlu0 %v820_v52, %s4182_s7 }
 0x627   :  { %613 = vrot.lane.b32.xlu1 %v612_v53, %s4181_s22 }
 0x694   :  { %v802_v40 = vpop.permute.xlu0 %801 }
 0x695   :  { %v804_v54 = vadd.f32 %v802_v40, %v4338_v56  ;;  %v811_v8 = vadd.f32 %v802_v40, %v4345_v5 }
 0x697   :  { %v3288_v55 = vmul.f32 -1.442695, %v804_v54  ;;  %v3289_v9 = vmul.f32 -1.442695, %v811_v8 }
 0x698   :  { %v822_v61 = vpop.permute.xlu0 %821 }
 0x699   :  { %v614_v57 = vpop.permute.xlu1 %613  ;;  %3998 = vpow2.f32 %v3288_v55 }
 0x69a   :  { %3527 = vmatmul.mubr.msk.f32.vlgmr.msra.gmra.mrb[4].mxu1 %vm57_vm1, %v614_v57 }
 0x69b   :  { %3817 = vmatpush3.bf16.msra.mxu1 %v4253_v18  ;;  %3548 = vmatprep.mubr.msk.f32.mxu1 %vm4180_vm0, %v4179_v13 }
 0x69c   :  { %3818 = vmatprep.subr.bf16.mxu1 %v4178_v7 }
 0x69f   :  { %3820 = vmatpush3.bf16.msra.mxu1 %v4264_v22 }
 0x6a0   :  { %3827 = vmatprep.subr.bf16.mxu1 %v4178_v7 }
 0x6a3   :  { %v3999_v58 = vpop.eup %3998 }
 0x6a4   :  { %v808_v59 = vadd.f32 1.0, %v3999_v58 }
 0x6a6   :  { %4000 = vrcp.f32 %v808_v59 }
 0x6b0   :  { %v4001_v60 = vpop.eup %4000 }
 0x6b1   :  { %v824_v62 = vmul.f32 %v4001_v60, %v822_v61 }
 0x6b3   :  { %826 = vrot.lane.b32.xlu1 %v824_v62, %s4183_s8 }
 0x725   :  { %v827_v63 = vpop.permute.xlu1 %826 }
 0x726   :  { %v829_v0 = vadd.f32 %v827_v63, %v4345_v5 }
 0x728   :  { %4002 = vtanh.f32 %v829_v0 }
 0x729   :  { %4004 = vpow2.f32 %v3289_v9 }
 0x732   :  { %v4003_v1 = vpop.eup %4002 }
 0x733   :  { %833 = vrot.lane.b32.xlu0 %v4003_v1, %s4181_s22  ;;  %v4005_v10 = vpop.eup %4004 }
 0x734   :  { %v815_v11 = vadd.f32 1.0, %v4005_v10 }
 0x736   :  { %4006 = vrcp.f32 %v815_v11 }
 0x740   :  { %v4007_v12 = vpop.eup %4006 }
 0x741   :  { %v831_v14 = vsub.f32 1.0, %v4007_v12  ;;  %v839_v17 = vmul.f32 %v4007_v12, %v837_v15 }
 0x76d   :  { %v683_v2 = vpop.f32.mrb[4].mxu1 }
 0x76e   :  { %v697_v3 = vadd.f32 %v4272_v23, %v683_v2  ;;  %v3528_v4 = vpop.f32.mrb[5].mxu1  ;;  %v688_v24 = vrot.slane %v683_v2, 4 }
 0x770   :  { %v699_v6 = vrot.slane %v697_v3, 4  ;;  %v690_v25 = vadd.f32 %v688_v24, %v4329_v45 }
 0x772   :  { %700 = vrot.lane.b32.xlu1 %v699_v6, %s4183_s8  ;;  %v3286_v26 = vmul.f32 -1.442695, %v690_v25 }
 0x774   :  { %4008 = vpow2.f32 %v3286_v26 }
 0x77e   :  { %v4009_v30 = vpop.eup %4008 }
 0x77f   :  { %v694_v31 = vadd.f32 1.0, %v4009_v30 }
 0x781   :  { %4010 = vrcp.f32 %v694_v31 }
 0x78b   :  { %v4011_v32 = vpop.eup %4010 }
 0x78c   :  { %v710_v48 = vsub.f32 1.0, %v4011_v32  ;;  %v718_v53 = vmul.f32 %v4011_v32, %v716_v49 }
 0x7a5   :  { %v834_v16 = vpop.permute.xlu0 %833 }
 0x7a6   :  { %v836_v19 = vmul.f32 %v834_v16, %v831_v14 }
 0x7a8   :  { %v4423_v20 = vadd.f32 %v839_v17, %v836_v19 }
 0x7aa   :  { %v961_v21 = vrot.slane %v4423_v20, 2 }
 0x7ac   :  { %3560 = vmatmul.mubr.msk.f32.vlgmr.msra.gmra.mrb[10].mxu0 %vm57_vm1, %v961_v21 }
 0x7ad   :  { %3835 = vmatpush3.bf16.msra.mxu0 %v4290_v29  ;;  %3581 = vmatprep.mubr.msk.f32.mxu0 %vm4180_vm0, %v4179_v13 }
 0x7ae   :  { %3836 = vmatprep.subr.bf16.mxu0 %v4178_v7 }
 0x7b1   :  { %3838 = vmatpush3.bf16.msra.mxu0 %v4302_v34 }
 0x7b2   :  { %3845 = vmatprep.subr.bf16.mxu0 %v4178_v7 }
 0x7e4   :  { %v701_v33 = vpop.permute.xlu1 %700 }
 0x7e5   :  { %v703_v35 = vmul.f32 %v4011_v32, %v701_v33 }
 0x7e7   :  { %705 = vrot.lane.b32.xlu0 %v703_v35, %s4183_s8 }
 0x859   :  { %v706_v36 = vpop.permute.xlu0 %705 }
 0x85a   :  { %v708_v37 = vadd.f32 %v706_v36, %v4329_v45 }
 0x85c   :  { %4012 = vtanh.f32 %v708_v37 }
 0x866   :  { %v4013_v42 = vpop.eup %4012 }
 0x867   :  { %712 = vrot.lane.b32.xlu1 %v4013_v42, %s4181_s22 }
 0x87f   :  { %v1030_v43 = vpop.f32.mrb[10].mxu0 }
 0x880   :  { %v1052_v44 = vadd.f32 %v1030_v43, %v4333_v50  ;;  %v3561_v46 = vpop.f32.mrb[11].mxu0  ;;  %1035 = vrot.lane.b32.xlu0 %v1030_v43, %s4181_s22 }
 0x882   :  { %1054 = vrot.lane.b32.xlu1 %v1052_v44, %s4182_s7 }
 0x8d9   :  { %v713_v52 = vpop.permute.xlu1 %712 }
 0x8da   :  { %v715_v40 = vmul.f32 %v713_v52, %v710_v48 }
 0x8dc   :  { %v4443_v54 = vadd.f32 %v718_v53, %v715_v40 }
 0x8de   :  { %v847_v55 = vrot.slane %v4443_v54, 4 }
 0x8e0   :  { %848 = vrot.lane.b32.xlu0 %v847_v55, %s4181_s22 }
 0x8f2   :  { %v1036_v57 = vpop.permute.xlu0 %1035 }
 0x8f3   :  { %v1038_v58 = vadd.f32 %v1036_v57, %v4338_v56  ;;  %v1045_v6 = vadd.f32 %v1036_v57, %v4345_v5 }
 0x8f4   :  { %v1055_v63 = vpop.permute.xlu1 %1054 }
 0x8f5   :  { %v3293_v59 = vmul.f32 -1.442695, %v1038_v58  ;;  %v3294_v8 = vmul.f32 -1.442695, %v1045_v6 }
 0x8f7   :  { %4014 = vpow2.f32 %v3293_v59 }
 0x901   :  { %v4015_v60 = vpop.eup %4014 }
 0x902   :  { %v1042_v61 = vadd.f32 1.0, %v4015_v60 }
 0x904   :  { %4016 = vrcp.f32 %v1042_v61 }
 0x90e   :  { %v4017_v62 = vpop.eup %4016 }
 0x90f   :  { %v1057_v0 = vmul.f32 %v4017_v62, %v1055_v63  ;;  %v951_v63 = vrot.slane %v4443_v54, 6 }
 0x911   :  { %1059 = vrot.lane.b32.xlu1 %v1057_v0, %s4183_s8 }
 0x952   :  { %v849_v1 = vpop.permute.xlu0 %848 }
 0x953   :  { %3549 = vmatmul.mubr.msk.f32.vlgmr.msra.gmra.mrb[6].mxu1 %vm57_vm1, %v849_v1 }
 0x954   :  { %3829 = vmatpush3.bf16.msra.mxu1 %v4253_v18  ;;  %3570 = vmatprep.mubr.msk.f32.mxu1 %vm4180_vm0, %v4179_v13 }
 0x955   :  { %3830 = vmatprep.subr.bf16.mxu1 %v4178_v7 }
 0x958   :  { %3832 = vmatpush3.bf16.msra.mxu1 %v4264_v22 }
 0x959   :  { %3839 = vmatprep.subr.bf16.mxu1 %v4178_v7 }
 0x983   :  { %v1060_v2 = vpop.permute.xlu1 %1059 }
 0x984   :  { %v1062_v3 = vadd.f32 %v1060_v2, %v4345_v5 }
 0x986   :  { %4018 = vtanh.f32 %v1062_v3 }
 0x987   :  { %4020 = vpow2.f32 %v3294_v8 }
 0x990   :  { %v4019_v4 = vpop.eup %4018 }
 0x991   :  { %1066 = vrot.lane.b32.xlu0 %v4019_v4, %s4181_s22  ;;  %v4021_v9 = vpop.eup %4020 }
 0x992   :  { %v1049_v10 = vadd.f32 1.0, %v4021_v9 }
 0x994   :  { %4022 = vrcp.f32 %v1049_v10 }
 0x99e   :  { %v4023_v11 = vpop.eup %4022 }
 0x99f   :  { %v1064_v12 = vsub.f32 1.0, %v4023_v11  ;;  %v1071_v15 = vmul.f32 %v4023_v11, %v961_v21 }
 0xa03   :  { %v1067_v14 = vpop.permute.xlu0 %1066 }
 0xa04   :  { %v1069_v16 = vmul.f32 %v1067_v14, %v1064_v12 }
 0xa06   :  { %v4461_v17 = vadd.f32 %v1071_v15, %v1069_v16 }
 0xa08   :  { %3582 = vmatmul.mubr.msk.f32.vlgmr.msra.gmra.mrb[12].mxu0 %vm57_vm1, %v4461_v17 }
 0xa09   :  { %3847 = vmatpush3.bf16.msra.mxu0 %v4290_v29  ;;  %3603 = vmatprep.mubr.msk.f32.mxu0 %vm4180_vm0, %v4179_v13 }
 0xa0a   :  { %3848 = vmatprep.subr.bf16.mxu0 %v4178_v7 }
 0xa0d   :  { %3850 = vmatpush3.bf16.msra.mxu0 %v4302_v34 }
 0xa0e   :  { %3857 = vmatprep.subr.bf16.mxu0 %v4178_v7 }
 0xa26   :  { %v918_v5 = vpop.f32.mrb[6].mxu1 }
 0xa27   :  { %v932_v19 = vadd.f32 %v4272_v23, %v918_v5  ;;  %v3550_v21 = vpop.f32.mrb[7].mxu1  ;;  %v923_v25 = vrot.slane %v918_v5, 2 }
 0xa29   :  { %v934_v24 = vrot.slane %v932_v19, 2  ;;  %v925_v26 = vadd.f32 %v923_v25, %v4329_v45  ;;  %v1297_v19 = vrot.slane %v4461_v17, 2 }
 0xa2b   :  { %935 = vrot.lane.b32.xlu1 %v934_v24, %s4183_s8  ;;  %v3291_v30 = vmul.f32 -1.442695, %v925_v26 }
 0xa2d   :  { %4024 = vpow2.f32 %v3291_v30 }
 0xa37   :  { %v4025_v31 = vpop.eup %4024 }
 0xa38   :  { %v929_v32 = vadd.f32 1.0, %v4025_v31 }
 0xa3a   :  { %4026 = vrcp.f32 %v929_v32 }
 0xa44   :  { %v4027_v33 = vpop.eup %4026 }
 0xa45   :  { %v945_v62 = vsub.f32 1.0, %v4027_v33  ;;  %v953_v1 = vmul.f32 %v4027_v33, %v951_v63 }
 0xa9d   :  { %v936_v35 = vpop.permute.xlu1 %935 }
 0xa9e   :  { %v938_v36 = vmul.f32 %v4027_v33, %v936_v35 }
 0xaa0   :  { %940 = vrot.lane.b32.xlu0 %v938_v36, %s4183_s8 }
 0xadb   :  { %v1255_v37 = vpop.f32.mrb[12].mxu0 }
 0xadc   :  { %v1260_v42 = vrot.slane %v1255_v37, 2  ;;  %v1278_v43 = vadd.f32 %v1255_v37, %v4333_v50  ;;  %v3583_v44 = vpop.f32.mrb[13].mxu0 }
 0xade   :  { %1261 = vrot.lane.b32.xlu1 %v1260_v42, %s4181_s22  ;;  %v1280_v46 = vrot.slane %v1278_v43, 2 }
 0xae2   :  { %1281 = vrot.lane.b32.xlu1 %v1280_v46, %s4182_s7 }
 0xb12   :  { %v941_v48 = vpop.permute.xlu0 %940 }
 0xb13   :  { %v943_v49 = vadd.f32 %v941_v48, %v4329_v45 }
 0xb15   :  { %4028 = vtanh.f32 %v943_v49 }
 0xb1f   :  { %v4029_v52 = vpop.eup %4028 }
 0xb20   :  { %947 = vrot.lane.b32.xlu0 %v4029_v52, %s4181_s22 }
 0xb50   :  { %v1262_v53 = vpop.permute.xlu1 %1261 }
 0xb51   :  { %v1264_v40 = vadd.f32 %v1262_v53, %v4329_v45  ;;  %v1271_v11 = vadd.f32 %v1262_v53, %v4331_v47 }
 0xb53   :  { %v3298_v55 = vmul.f32 -1.442695, %v1264_v40  ;;  %v3299_v12 = vmul.f32 -1.442695, %v1271_v11 }
 0xb54   :  { %v1282_v60 = vpop.permute.xlu1 %1281 }
 0xb55   :  { %4030 = vpow2.f32 %v3298_v55 }
 0xb5f   :  { %v4031_v57 = vpop.eup %4030 }
 0xb60   :  { %v1268_v58 = vadd.f32 1.0, %v4031_v57 }
 0xb62   :  { %4032 = vrcp.f32 %v1268_v58 }
 0xb6c   :  { %v4033_v59 = vpop.eup %4032 }
 0xb6d   :  { %v1284_v61 = vmul.f32 %v4033_v59, %v1282_v60 }
 0xb6f   :  { %1286 = vrot.lane.b32.xlu0 %v1284_v61, %s4183_s8 }
 0xb92   :  { %v948_v0 = vpop.permute.xlu0 %947 }
 0xb93   :  { %v950_v2 = vmul.f32 %v948_v0, %v945_v62 }
 0xb95   :  { %v4483_v3 = vadd.f32 %v953_v1, %v950_v2 }
 0xb97   :  { %v1079_v4 = vrot.slane %v4483_v3, 6 }
 0xb99   :  { %1080 = vrot.lane.b32.xlu1 %v1079_v4, %s4181_s22 }
 0xbe1   :  { %v1287_v6 = vpop.permute.xlu0 %1286 }
 0xbe2   :  { %v1289_v8 = vadd.f32 %v1287_v6, %v4331_v47 }
 0xbe4   :  { %4034 = vtanh.f32 %v1289_v8 }
 0xbe5   :  { %4036 = vpow2.f32 %v3299_v12 }
 0xbee   :  { %v4035_v9 = vpop.eup %4034 }
 0xbef   :  { %1293 = vrot.lane.b32.xlu0 %v4035_v9, %s4181_s22  ;;  %v4037_v14 = vpop.eup %4036 }
 0xbf0   :  { %v1275_v15 = vadd.f32 1.0, %v4037_v14 }
 0xbf2   :  { %4038 = vrcp.f32 %v1275_v15 }
 0xbfc   :  { %v4039_v16 = vpop.eup %4038 }
 0xbfd   :  { %v1291_v5 = vsub.f32 1.0, %v4039_v16  ;;  %v1299_v24 = vmul.f32 %v4039_v16, %v1297_v19 }
 0xc0b   :  { %v1081_v10 = vpop.permute.xlu1 %1080 }
 0xc0c   :  { %3571 = vmatmul.mubr.msk.f32.vlgmr.msra.gmra.mrb[8].mxu1 %vm57_vm1, %v1081_v10 }
 0xc0d   :  { %3841 = vmatpush3.bf16.msra.mxu1 %v4253_v18  ;;  %3592 = vmatprep.mubr.msk.f32.mxu1 %vm4180_vm0, %v4179_v13 }
 0xc0e   :  { %3842 = vmatprep.subr.bf16.mxu1 %v4178_v7 }
 0xc11   :  { %3844 = vmatpush3.bf16.msra.mxu1 %v4264_v22 }
 0xc12   :  { %3851 = vmatprep.subr.bf16.mxu1 %v4178_v7 }
 0xc61   :  { %v1294_v21 = vpop.permute.xlu0 %1293 }
 0xc62   :  { %v1296_v25 = vmul.f32 %v1294_v21, %v1291_v5 }
 0xc64   :  { %v4500_v26 = vadd.f32 %v1299_v24, %v1296_v25 }
 0xc66   :  { %v1416_v30 = vrot.slane %v4500_v26, 6 }
 0xc68   :  { %3604 = vmatmul.mubr.msk.f32.vlgmr.msra.gmra.mrb[14].mxu0 %vm57_vm1, %v1416_v30  ;;  %v1527_v30 = vrot.slane %v4500_v26, 2 }
 0xc69   :  { %3859 = vmatpush3.bf16.msra.mxu0 %v4290_v29  ;;  %3625 = vmatprep.mubr.msk.f32.mxu0 %vm4180_vm0, %v4179_v13 }
 0xc6a   :  { %3860 = vmatprep.subr.bf16.mxu0 %v4178_v7 }
 0xc6d   :  { %3862 = vmatpush3.bf16.msra.mxu0 %v4302_v34 }
 0xc6e   :  { %3869 = vmatprep.subr.bf16.mxu0 %v4178_v7 }
 0xcdf   :  { %v1150_v31 = vpop.f32.mrb[8].mxu1 }
 0xce0   :  { %v1161_v32 = vadd.f32 %v4272_v23, %v1150_v31  ;;  %v3572_v33 = vpop.f32.mrb[9].mxu1  ;;  %v1154_v35 = vadd.f32 %v1150_v31, %v4338_v56 }
 0xce2   :  { %1163 = vrot.lane.b32.xlu1 %v1161_v32, %s4183_s8  ;;  %v3296_v36 = vmul.f32 -1.442695, %v1154_v35 }
 0xce4   :  { %4040 = vpow2.f32 %v3296_v36 }
 0xcee   :  { %v4041_v44 = vpop.eup %4040 }
 0xcef   :  { %v1158_v46 = vadd.f32 1.0, %v4041_v44 }
 0xcf1   :  { %4042 = vrcp.f32 %v1158_v46 }
 0xcfb   :  { %v4043_v48 = vpop.eup %4042 }
 0xcfc   :  { %v1173_v9 = vsub.f32 1.0, %v4043_v48  ;;  %v1180_v11 = vmul.f32 %v4043_v48, %v1079_v4 }
 0xd3b   :  { %v1485_v37 = vpop.f32.mrb[14].mxu0 }
 0xd3c   :  { %v1490_v42 = vrot.slane %v1485_v37, 4  ;;  %v3605_v43 = vpop.f32.mrb[15].mxu0  ;;  %v1508_v52 = vadd.f32 %v1485_v37, %v4333_v50 }
 0xd3e   :  { %1491 = vrot.lane.b32.xlu1 %v1490_v42, %s4181_s22  ;;  %v1510_v40 = vrot.slane %v1508_v52, 4 }
 0xd54   :  { %v1164_v49 = vpop.permute.xlu1 %1163 }
 0xd55   :  { %v1166_v53 = vmul.f32 %v4043_v48, %v1164_v49 }
 0xd57   :  { %1168 = vrot.lane.b32.xlu0 %v1166_v53, %s4183_s8 }
 0xd5b   :  { %1511 = vrot.lane.b32.xlu0 %v1510_v40, %s4182_s7 }
 0xdb0   :  { %v1492_v55 = vpop.permute.xlu1 %1491 }
 0xdb1   :  { %v1494_v57 = vadd.f32 %v1492_v55, %v4329_v45  ;;  %v1501_v16 = vadd.f32 %v1492_v55, %v4331_v47 }
 0xdb3   :  { %v3303_v58 = vmul.f32 -1.442695, %v1494_v57  ;;  %v3304_v5 = vmul.f32 -1.442695, %v1501_v16 }
 0xdb5   :  { %4044 = vpow2.f32 %v3303_v58 }
 0xdbf   :  { %v4045_v59 = vpop.eup %4044 }
 0xdc0   :  { %v1498_v60 = vadd.f32 1.0, %v4045_v59 }
 0xdc2   :  { %4046 = vrcp.f32 %v1498_v60 }
 0xdc9   :  { %v1169_v61 = vpop.permute.xlu0 %1168 }
 0xdca   :  { %v1171_v62 = vadd.f32 %v1169_v61, %v4338_v56 }
 0xdcc   :  { %4048 = vtanh.f32 %v1171_v62  ;;  %v4047_v63 = vpop.eup %4046 }
 0xdcd   :  { %v1512_v0 = vpop.permute.xlu0 %1511 }
 0xdce   :  { %v1514_v1 = vmul.f32 %v4047_v63, %v1512_v0 }
 0xdd0   :  { %1516 = vrot.lane.b32.xlu0 %v1514_v1, %s4183_s8 }
 0xdd6   :  { %v4049_v2 = vpop.eup %4048 }
 0xdd7   :  { %1175 = vrot.lane.b32.xlu1 %v4049_v2, %s4181_s22 }
 0xe42   :  { %v1517_v6 = vpop.permute.xlu0 %1516 }
 0xe43   :  { %v1519_v8 = vadd.f32 %v1517_v6, %v4331_v47 }
 0xe45   :  { %4050 = vtanh.f32 %v1519_v8 }
 0xe46   :  { %4052 = vpow2.f32 %v3304_v5 }
 0xe49   :  { %v1176_v10 = vpop.permute.xlu1 %1175 }
 0xe4a   :  { %v1178_v12 = vmul.f32 %v1176_v10, %v1173_v9 }
 0xe4c   :  { %v4524_v14 = vadd.f32 %v1180_v11, %v1178_v12 }
 0xe4e   :  { %1183 = vrot.lane.b32.xlu1 %v4524_v14, %s4181_s22  ;;  %v1407_v5 = vrot.slane %v4524_v14, 6 }
 0xe4f   :  { %v4051_v15 = vpop.eup %4050 }
 0xe50   :  { %1523 = vrot.lane.b32.xlu0 %v4051_v15, %s4181_s22  ;;  %v4053_v19 = vpop.eup %4052 }
 0xe51   :  { %v1505_v21 = vadd.f32 1.0, %v4053_v19 }
 0xe53   :  { %4054 = vrcp.f32 %v1505_v21 }
 0xe5d   :  { %v4055_v24 = vpop.eup %4054 }
 0xe5e   :  { %v1521_v4 = vsub.f32 1.0, %v4055_v24  ;;  %v1529_v32 = vmul.f32 %v4055_v24, %v1527_v30 }
 0xec0   :  { %v4530_v25 = vpop.permute.xlu1 %1183 }
 0xec1   :  { %3593 = vmatmul.mubr.msk.f32.vlgmr.msra.gmra.mrb[10].mxu1 %vm57_vm1, %v4530_v25 }
 0xec2   :  { %v1524_v31 = vpop.permute.xlu0 %1523  ;;  %3853 = vmatpush3.bf16.msra.mxu1 %v4253_v18  ;;  %3614 = vmatprep.mubr.msk.f32.mxu1 %vm4180_vm0, %v4179_v13 }
 0xec3   :  { %v1526_v33 = vmul.f32 %v1524_v31, %v1521_v4  ;;  %3854 = vmatprep.subr.bf16.mxu1 %v4178_v7 }
 0xec5   :  { %v4539_v35 = vadd.f32 %v1529_v32, %v1526_v33 }
 0xec6   :  { %3856 = vmatpush3.bf16.msra.mxu1 %v4264_v22 }
 0xec7   :  { %v1649_v36 = vrot.slane %v4539_v35, 4  ;;  %3863 = vmatprep.subr.bf16.mxu1 %v4178_v7 }
 0xec9   :  { %3626 = vmatmul.mubr.msk.f32.vlgmr.msra.gmra.mrb[16].mxu0 %vm57_vm1, %v1649_v36 }
 0xeca   :  { %3871 = vmatpush3.bf16.msra.mxu0 %v4290_v29  ;;  %3647 = vmatprep.mubr.msk.f32.mxu0 %vm4180_vm0, %v4179_v13 }
 0xecb   :  { %3872 = vmatprep.subr.bf16.mxu0 %v4178_v7 }
 0xece   :  { %3874 = vmatpush3.bf16.msra.mxu0 %v4302_v34 }
 0xecf   :  { %3891 = vmatprep.subr.bf16.mxu0 %v4178_v7 }
 0xf94   :  { %v1374_v37 = vpop.f32.mrb[10].mxu1 }
 0xf95   :  { %v1388_v42 = vadd.f32 %v4272_v23, %v1374_v37  ;;  %v3594_v43 = vpop.f32.mrb[11].mxu1  ;;  %v1379_v34 = vrot.slane %v1374_v37, 6 }
 0xf96   :  { %v1760_v43 = vrot.slane %v4539_v35, 2 }
 0xf97   :  { %v1390_v44 = vrot.slane %v1388_v42, 6  ;;  %v1381_v53 = vadd.f32 %v1379_v34, %v4338_v56 }
 0xf99   :  { %1391 = vrot.lane.b32.xlu1 %v1390_v44, %s4183_s8  ;;  %v3301_v40 = vmul.f32 -1.442695, %v1381_v53 }
 0xf9b   :  { %4056 = vpow2.f32 %v3301_v40  ;;  %v4589_v40 = vld [vmem:[%s4961_s3 + $0x2] ss:$0 sm:$0xff] }
 0xf9c   :  { %v1718_v46 = vpop.f32.mrb[16].mxu0 }
 0xf9d   :  { %v1723_v48 = vrot.slane %v1718_v46, 6  ;;  %v1741_v29 = vadd.f32 %v1718_v46, %v4333_v50  ;;  %v3627_v49 = vpop.f32.mrb[17].mxu0 }
 0xf9f   :  { %1724 = vrot.lane.b32.xlu0 %v1723_v48, %s4181_s22  ;;  %v1743_v52 = vrot.slane %v1741_v29, 6 }
 0xfa3   :  { %1744 = vrot.lane.b32.xlu0 %v1743_v52, %s4182_s7 }
 0xfa5   :  { %v4057_v23 = vpop.eup %4056 }
 0xfa6   :  { %v1385_v55 = vadd.f32 1.0, %v4057_v23 }
 0xfa8   :  { %4058 = vrcp.f32 %v1385_v55 }
 0xfb2   :  { %v4059_v57 = vpop.eup %4058 }
 0xfb3   :  { %v1401_v21 = vsub.f32 1.0, %v4059_v57  ;;  %v1409_v30 = vmul.f32 %v4059_v57, %v1407_v5 }
0x100b   :  { %v1392_v58 = vpop.permute.xlu1 %1391 }
0x100c   :  { %v1394_v59 = vmul.f32 %v4059_v57, %v1392_v58 }
0x100e   :  { %1396 = vrot.lane.b32.xlu1 %v1394_v59, %s4183_s8 }
0x1011   :  { %v1725_v60 = vpop.permute.xlu0 %1724 }
0x1012   :  { %v1727_v61 = vadd.f32 %v1725_v60, %v4329_v45  ;;  %v1734_v16 = vadd.f32 %v1725_v60, %v4331_v47 }
0x1014   :  { %v3308_v62 = vmul.f32 -1.442695, %v1727_v61  ;;  %v3309_v19 = vmul.f32 -1.442695, %v1734_v16 }
0x1015   :  { %v1745_v2 = vpop.permute.xlu0 %1744 }
0x1016   :  { %4060 = vpow2.f32 %v3308_v62 }
0x1020   :  { %v4061_v63 = vpop.eup %4060 }
0x1021   :  { %v1731_v0 = vadd.f32 1.0, %v4061_v63 }
0x1023   :  { %4062 = vrcp.f32 %v1731_v0 }
0x102d   :  { %v4063_v1 = vpop.eup %4062 }
0x102e   :  { %v1747_v6 = vmul.f32 %v4063_v1, %v1745_v2 }
0x1030   :  { %1749 = vrot.lane.b32.xlu0 %v1747_v6, %s4183_s8 }
0x1080   :  { %v1397_v8 = vpop.permute.xlu1 %1396 }
0x1081   :  { %v1399_v9 = vadd.f32 %v1397_v8, %v4338_v56 }
0x1083   :  { %4064 = vtanh.f32 %v1399_v9 }
0x108d   :  { %v4065_v10 = vpop.eup %4064 }
0x108e   :  { %1403 = vrot.lane.b32.xlu1 %v4065_v10, %s4181_s22 }
0x10a2   :  { %v1750_v11 = vpop.permute.xlu0 %1749 }
0x10a3   :  { %v1752_v12 = vadd.f32 %v1750_v11, %v4331_v47 }
0x10a5   :  { %4066 = vtanh.f32 %v1752_v12 }
0x10a6   :  { %4068 = vpow2.f32 %v3309_v19 }
0x10af   :  { %v4067_v15 = vpop.eup %4066 }
0x10b0   :  { %1756 = vrot.lane.b32.xlu0 %v4067_v15, %s4181_s22  ;;  %v4069_v33 = vpop.eup %4068 }
0x10b1   :  { %v1738_v36 = vadd.f32 1.0, %v4069_v33 }
0x10b3   :  { %4070 = vrcp.f32 %v1738_v36 }
0x10bd   :  { %v4071_v37 = vpop.eup %4070 }
0x10be   :  { %v1754_v42 = vsub.f32 1.0, %v4071_v37  ;;  %v1762_v44 = vmul.f32 %v4071_v37, %v1760_v43  ;;  %v2004_v43 = vld [vmem:[%s4959_s1 + $0x58] sm:$0xff] }
0x1100   :  { %v1404_v24 = vpop.permute.xlu1 %1403 }
0x1101   :  { %v1406_v4 = vmul.f32 %v1404_v24, %v1401_v21  ;;  %v2113_v21 = vld [vmem:[%s4960_s2 + $0x40] sm:$0xff]  ;;  %v2114_v24 = vld [vmem:[%s4960_s2 + $0x48] sm:$0xff] }
0x1103   :  { %v4566_v31 = vadd.f32 %v1409_v30, %v1406_v4  ;;  %v2115_v4 = vld [vmem:[%s4960_s2 + $0x50] sm:$0xff]  ;;  %v4612_v30 = vpack.c.bf16 %v2114_v24, %v2113_v21  ;;  %v2016_v21 = vld [vmem:[%s4959_s1 + $0xb8] sm:$0xff] }
0x1105   :  { %v1536_v32 = vrot.slane %v4566_v31, 2 }
0x1107   :  { %1537 = vrot.lane.b32.xlu1 %v1536_v32, %s4181_s22  ;;  %v2116_v32 = vld [vmem:[%s4960_s2 + $0x58] sm:$0xff] }
0x1108   :  { %v4620_v33 = vpack.c.bf16 %v2116_v32, %v2115_v4  ;;  %v2013_v32 = vld [vmem:[%s4959_s1 + $0xa0] sm:$0xff] }
0x1122   :  { %v1757_v14 = vpop.permute.xlu0 %1756 }
0x1123   :  { %v1759_v46 = vmul.f32 %v1757_v14, %v1754_v42 }
0x1125   :  { %v4571_v48 = vadd.f32 %v1762_v44, %v1759_v46  ;;  %v1640_v44 = vrot.slane %v4566_v31, 6 }
0x1127   :  { %v1882_v29 = vrot.slane %v4571_v48, 2 }
0x1129   :  { %3648 = vmatmul.mubr.msk.f32.vlgmr.msra.gmra.mrb[18].mxu0 %vm57_vm1, %v1882_v29 }
0x112a   :  { %3658 = vmatprep.mubr.msk.f32.mxu0 %vm4180_vm0, %v4179_v13  ;;  %3893 = vmatpush3.bf16.msra.mxu0 %v4612_v30 }
0x112b   :  { %3894 = vmatprep.subr.bf16.mxu0 %v4178_v7 }
0x112e   :  { %3896 = vmatpush3.bf16.msra.mxu0 %v4620_v33 }
0x112f   :  { %3897 = vmatprep.subr.bf16.mxu0 %v4178_v7 }
0x1131   :  { %3659 = vmatmul.mubr.f32.vlgmr.msra.gmra.mrb[20].mxu0 %v4179_v13 }
0x1132   :  { %3669 = vmatprep.mubr.msk.f32.mxu0 %vm4180_vm0, %v4179_v13 }
0x1179   :  { %v1538_v49 = vpop.permute.xlu1 %1537 }
0x117a   :  { %3615 = vmatmul.mubr.msk.f32.vlgmr.msra.gmra.mrb[12].mxu1 %vm57_vm1, %v1538_v49 }
0x117b   :  { %3865 = vmatpush3.bf16.msra.mxu1 %v4253_v18  ;;  %3636 = vmatprep.mubr.msk.f32.mxu1 %vm4180_vm0, %v4179_v13 }
0x117c   :  { %3866 = vmatprep.subr.bf16.mxu1 %v4178_v7 }
0x117f   :  { %3868 = vmatpush3.bf16.msra.mxu1 %v4264_v22 }
0x11fc   :  { %v1951_v52 = vpop.f32.mrb[18].mxu0 }
0x11fd   :  { %1956 = vrot.lane.b32.xlu0 %v1951_v52, %s4181_s22  ;;  %v3649_v34 = vpop.f32.mrb[19].mxu0  ;;  %v1973_v57 = vadd.f32 %v1951_v52, %v4333_v50 }
0x124d   :  { %v1607_v53 = vpop.f32.mrb[12].mxu1 }
0x124e   :  { %v1621_v23 = vadd.f32 %v4589_v40, %v1607_v53  ;;  %v3616_v18 = vpop.f32.mrb[13].mxu1  ;;  %v1612_v22 = vrot.slane %v1607_v53, 4 }
0x1250   :  { %v1623_v55 = vrot.slane %v1621_v23, 4  ;;  %v1614_v58 = vadd.f32 %v1612_v22, %v4338_v56 }
0x1252   :  { %1624 = vrot.lane.b32.xlu1 %v1623_v55, %s4183_s8  ;;  %v3306_v60 = vmul.f32 -1.442695, %v1614_v58 }
0x1254   :  { %4072 = vpow2.f32 %v3306_v60  ;;  %v4660_v60 = vpop.f32.mrb[20].mxu0 }
0x1256   :  { %1975 = vrot.lane.b32.xlu1 %v1973_v57, %s4182_s7 }
0x125e   :  { %v4073_v63 = vpop.eup %4072 }
0x125f   :  { %v1618_v0 = vadd.f32 1.0, %v4073_v63  ;;  %v2008_v63 = vld [vmem:[%s4959_s1 + $0x78] sm:$0xff] }
0x126f   :  { %v1957_v59 = vpop.permute.xlu0 %1956 }
0x1270   :  { %v1959_v61 = vadd.f32 %v1957_v59, %v4329_v45 }
0x1272   :  { %v3313_v62 = vmul.f32 -1.442695, %v1959_v61 }
0x1274   :  { %4074 = vpow2.f32 %v3313_v62  ;;  %v2006_v62 = vld [vmem:[%s4959_s1 + $0x68] sm:$0xff] }
0x1275   :  { %4076 = vrcp.f32 %v1618_v0 }
0x127e   :  { %v4075_v1 = vpop.eup %4074 }
0x127f   :  { %v1963_v2 = vadd.f32 1.0, %v4075_v1  ;;  %v4077_v6 = vpop.eup %4076 }
0x1281   :  { %4078 = vrcp.f32 %v1963_v2  ;;  %v3879_v2 = vpack.c.bf16 %v2008_v63, %v2006_v62 }
0x128b   :  { %v4079_v9 = vpop.eup %4078 }
0x12c4   :  { %v1625_v50 = vpop.permute.xlu1 %1624 }
0x12c5   :  { %v1627_v8 = vmul.f32 %v4077_v6, %v1625_v50  ;;  %v2007_v50 = vld [vmem:[%s4959_s1 + $0x70] sm:$0xff] }
0x12c7   :  { %1629 = vrot.lane.b32.xlu0 %v1627_v8, %s4183_s8 }
0x12c8   :  { %v1976_v10 = vpop.permute.xlu1 %1975 }
0x12c9   :  { %v1978_v11 = vmul.f32 %v4079_v9, %v1976_v10  ;;  %v2010_v9 = vld [vmem:[%s4959_s1 + $0x88] sm:$0xff]  ;;  %v2012_v10 = vld [vmem:[%s4959_s1 + $0x98] sm:$0xff] }
0x12cb   :  { %1980 = vrot.lane.b32.xlu1 %v1978_v11, %s4183_s8 }
0x1339   :  { %v1630_v45 = vpop.permute.xlu0 %1629 }
0x133a   :  { %v1632_v12 = vadd.f32 %v1630_v45, %v4338_v56 }
0x133c   :  { %4080 = vtanh.f32 %v1632_v12  ;;  %v3883_v12 = vpack.c.bf16 %v2012_v10, %v2010_v9 }
0x133d   :  { %v1981_v15 = vpop.permute.xlu1 %1980 }
0x133e   :  { %v1983_v16 = vadd.f32 %v1981_v15, %v4331_v47  ;;  %v2009_v15 = vld [vmem:[%s4959_s1 + $0x80] sm:$0xff] }
0x1340   :  { %4082 = vtanh.f32 %v1983_v16  ;;  %v2011_v16 = vld [vmem:[%s4959_s1 + $0x90] sm:$0xff] }
0x1341   :  { %v3885_v24 = vpack.c.bf16 %v2011_v16, %v2009_v15 }
0x1346   :  { %v4081_v5 = vpop.eup %4080 }
0x1347   :  { %1636 = vrot.lane.b32.xlu0 %v4081_v5, %s4181_s22 }
0x134a   :  { %v4083_v19 = vpop.eup %4082 }
0x134b   :  { %1987 = vrot.lane.b32.xlu1 %v4083_v19, %s4181_s22  ;;  %v2014_v19 = vld [vmem:[%s4959_s1 + $0xa8] sm:$0xff] }
0x134c   :  { %v3887_v4 = vpack.c.bf16 %v2016_v21, %v2014_v19 }
0x134f   :  { %486 = vrot.lane.b32.xlu1 %v4402_v51, %s4181_s22  ;;  %v1966_v51 = vadd.f32 %v1957_v59, %v4331_v47  ;;  %v1642_v47 = vmul.f32 %v4077_v6, %v1640_v44 }
0x1351   :  { %v3314_v36 = vmul.f32 -1.442695, %v1966_v51  ;;  %v2015_v51 = vld [vmem:[%s4959_s1 + $0xb0] sm:$0xff] }
0x1353   :  { %956 = vrot.lane.b32.xlu1 %v4483_v3, %s4181_s22  ;;  %4084 = vpow2.f32 %v3314_v36  ;;  %v2002_v3 = vld [vmem:[%s4959_s1 + $0x48] sm:$0xff] }
0x1354   :  { %v3875_v14 = vpack.c.bf16 %v2004_v43, %v2002_v3 }
0x1356   :  { %3876 = vmatprep.subr.bf16.mxu1 %v3875_v14 }
0x1357   :  { %1532 = vrot.lane.b32.xlu1 %v4539_v35, %s4182_s7  ;;  %v1634_v35 = vsub.f32 1.0, %v4077_v6  ;;  %v2005_v6 = vld [vmem:[%s4959_s1 + $0x60] sm:$0xff] }
0x1358   :  { %v3881_v45 = vpack.c.bf16 %v2007_v50, %v2005_v6 }
0x135d   :  { %v4085_v37 = vpop.eup %4084 }
0x135e   :  { %v1970_v42 = vadd.f32 1.0, %v4085_v37  ;;  %v3889_v37 = vpack.c.bf16 %v2015_v51, %v2013_v32 }
0x1360   :  { %4086 = vrcp.f32 %v1970_v42 }
0x136a   :  { %v4087_v46 = vpop.eup %4086 }
0x136b   :  { %v1985_v53 = vsub.f32 1.0, %v4087_v46  ;;  %v1992_v18 = vmul.f32 %v4087_v46, %v1882_v29  ;;  %v4658_v29 = vld [vmem:[%s4961_s3 + $0x3] ss:$0 sm:$0xff] }
0x136c   :  { %v2203_v61 = vadd.f32 %v4658_v29, %v4660_v60  ;;  %v4726_v46 = vld [vmem:[%s4961_s3 + $0x1] ss:$2 sm:$0x3] }
0x13b9   :  { %v1637_v49 = vpop.permute.xlu0 %1636 }
0x13ba   :  { %v1639_v52 = vmul.f32 %v1637_v49, %v1634_v35  ;;  %v4731_v49 = vrot.slane %v4726_v46, %v49_v39 }
0x13bc   :  { %v4640_v34 = vadd.f32 %v1642_v47, %v1639_v52 }
0x13bd   :  { %v1988_v23 = vpop.permute.xlu1 %1987 }
0x13be   :  { %v1990_v55 = vmul.f32 %v1988_v23, %v1985_v53  ;;  %v1769_v57 = vrot.slane %v4640_v34, 4 }
0x13c0   :  { %v1993_v22 = vadd.f32 %v1992_v18, %v1990_v55  ;;  %1770 = vrot.lane.b32.xlu0 %v1769_v57, %s4181_s22 }
0x13c1   :  { %v487_v58 = vpop.permute.xlu1 %486 }
0x13c2   :  { %490 = vst.msk [vmem:[#allocation2] sm:$0xc] %vm489_vm5, %v487_v58  ;;  %1995 = vrot.lane.b32.xlu1 %v1993_v22, %s4182_s7 }
0x13c4   :  { %721 = vrot.lane.b32.xlu0 %v4443_v54, %s4181_s22  ;;  %v3660_v54 = vpop.f32.mrb[21].mxu0 }
0x13c5   :  { %v957_v59 = vpop.permute.xlu1 %956 }
0x13c6   :  { %960 = vst.msk [vmem:[#allocation2] sm:$0xc0] %vm959_vm6, %v957_v59  ;;  %2205 = vrot.lane.b32.xlu1 %v2203_v61, %s4183_s8 }
0x13c8   :  { %1302 = vrot.lane.b32.xlu0 %v4500_v26, %s4182_s7  ;;  %v2001_v26 = vld [vmem:[%s4959_s1 + $0x40] sm:$0xff] }
0x13c9   :  { %v1533_v0 = vpop.permute.xlu1 %1532 }
0x13cc   :  { %1765 = vrot.lane.b32.xlu0 %v4571_v48, %s4182_s7  ;;  %v2003_v48 = vld [vmem:[%s4959_s1 + $0x50] sm:$0xff]  ;;  %s4184_s1 = smov [#allocation3]  }
0x13cd   :  { %v3877_v1 = vpack.c.bf16 %v2003_v48, %v2001_v26  ;;  %s3264_s0 = sshll.u32 %s4184_s1, 4  ;;  %s3265_s0 = int_to_ptr.vmem [resolvable:$true] %s3264_s0 }
0x13ce   :  { %p4158_p1 = scmp.lt.s32.totalorder %s3265_s0, %s3265_s0 }
0x1432   :  { %v1771_v8 = vpop.permute.xlu0 %1770 }
0x1433   :  { %3637 = vmatmul.mubr.msk.f32.vlgmr.msra.gmra.mrb[14].mxu1 %vm57_vm1, %v1771_v8 }
0x1434   :  { %v1996_v11 = vpop.permute.xlu1 %1995  ;;  %3878 = vmatpush1.bf16.msra.mxu1 %v3877_v1  ;;  %2101 = vmatprep.mubr.f32.mxu1 %v4179_v13 }
0x1435   :  { %1998 = vst.msk [vmem:[#allocation2] sm:$0x3] %vm1077_vm7, %v1996_v11  ;;  %3880 = vmatprep.subr.bf16.mxu1 %v3879_v2 }
0x1436   :  { %v722_v5 = vpop.permute.xlu0 %721 }
0x1437   :  { %725 = vst.msk [vmem:[#allocation2] sm:$0x30] %vm724_vm8, %v722_v5 }
0x1438   :  { %1535 = vst.msk [vmem:[#allocation2] sm:$0x30] %vm610_vm9, %v1533_v0  ;;  %3882 = vmatpush1.bf16.msra.mxu1 %v3881_v45  ;;  %v2206_v57 = vpop.permute.xlu1 %2205 }
0x1439   :  { %3884 = vmatprep.subr.bf16.mxu1 %v3883_v12 }
0x143a   :  { %v1303_v36 = vpop.permute.xlu0 %1302 }
0x143b   :  { %1305 = vst.msk [vmem:[#allocation2] sm:$0xc0] %vm378_vm10, %v1303_v36 }
0x143c   :  { %3886 = vmatpush1.bf16.msra.mxu1 %v3885_v24 }
0x143d   :  { %3888 = vmatprep.subr.bf16.mxu1 %v3887_v4 }
0x143e   :  { %v1766_v42 = vpop.permute.xlu0 %1765 }
0x143f   :  { %1768 = vst.msk [vmem:[#allocation2] sm:$0xc] %vm845_vm11, %v1766_v42 }
0x1440   :  { %3890 = vmatpush1.bf16.msra.mxu1 %v3889_v37 }
0x1441   :  { %3903 = vmatprep.subr.bf16.mxu1 %v4178_v7 }
0x1446   :  { %v1999_v3 = vld [vmem:[#allocation2] sm:$0xff] }
0x1447   :  { %3316 = vmatmul.mubr.msk.f32.vlgmr.msra.gmra.mrb[16].mxu1 %vm2030_vm12, %v1999_v3 }
0x1448   :  { %3905 = vmatpush3.bf16.msra.mxu1 %v4612_v30  ;;  %2106 = vmatprep.mubr.f32.mxu1 %v4179_v13 }
0x1449   :  { %3906 = vmatprep.subr.bf16.mxu1 %v4178_v7 }
0x144c   :  { %3908 = vmatpush3.bf16.msra.mxu1 %v4620_v33 }
0x144d   :  { %3915 = vmatprep.subr.bf16.mxu1 %v4178_v7 }
0x1506   :  { %v1840_v43 = vpop.f32.mrb[14].mxu1 }
0x1507   :  { %v1854_v14 = vadd.f32 %v4589_v40, %v1840_v43  ;;  %v3638_v35 = vpop.f32.mrb[15].mxu1  ;;  %v1845_v39 = vrot.slane %v1840_v43, 2 }
0x1509   :  { %v1856_v44 = vrot.slane %v1854_v14, 2  ;;  %v1847_v59 = vadd.f32 %v1845_v39, %v4338_v56  ;;  %v2125_v39 = vld [vmem:[%s4960_s2 + $0x78] sm:$0xff] }
0x150b   :  { %1857 = vrot.lane.b32.xlu0 %v1856_v44, %s4183_s8  ;;  %v3311_v61 = vmul.f32 -1.442695, %v1847_v59 }
0x151a   :  { %v2103_v47 = vpop.f32.mrb[16].mxu1 }
0x151b   :  { %v4734_v52 = vadd.f32 %v2103_v47, %v4731_v49  ;;  %v2105_v53 = vpop.f32.mrb[17].mxu1 }
0x151d   :  { %v2196_v40 = vadd.f32 %v4660_v60, %v4734_v52 }
0x151f   :  { %v3319_v23 = vmul.f32 -1.442695, %v2196_v40 }
0x1521   :  { %4088 = vpow2.f32 %v3319_v23 }
0x152b   :  { %v4089_v18 = vpop.eup %4088 }
0x152c   :  { %v2200_v55 = vadd.f32 1.0, %v4089_v18 }
0x152e   :  { %4090 = vrcp.f32 %v2200_v55  ;;  %v2122_v55 = vld [vmem:[%s4960_s2 + $0x60] sm:$0xff] }
0x152f   :  { %4092 = vpow2.f32 %v3311_v61 }
0x1538   :  { %v4091_v22 = vpop.eup %4090 }
0x1539   :  { %v2208_v58 = vmul.f32 %v4091_v22, %v2206_v57  ;;  %v4093_v54 = vpop.eup %4092  ;;  %v2221_v8 = vmul.f32 0.0, %v4091_v22  ;;  %v2123_v57 = vld [vmem:[%s4960_s2 + $0x68] sm:$0xff] }
0x153a   :  { %v1851_v26 = vadd.f32 1.0, %v4093_v54 }
0x153b   :  { %2210 = vrot.lane.b32.xlu1 %v2208_v58, %s4183_s8  ;;  %v3898_v58 = vpack.c.bf16 %v2123_v57, %v2122_v55 }
0x153c   :  { %4094 = vrcp.f32 %v1851_v26 }
0x153d   :  { %3899 = vmatpush3.bf16.msra.mxu0 %v3898_v58 }
0x153e   :  { %3900 = vmatprep.subr.bf16.mxu0 %v4178_v7 }
0x1546   :  { %v4095_v48 = vpop.eup %4094 }
0x157d   :  { %v1858_v60 = vpop.permute.xlu0 %1857 }
0x157e   :  { %v1860_v62 = vmul.f32 %v4095_v48, %v1858_v60 }
0x1580   :  { %1862 = vrot.lane.b32.xlu0 %v1860_v62, %s4183_s8 }
0x15ad   :  { %v2211_v63 = vpop.permute.xlu1 %2210 }
0x15ae   :  { %v2213_v0 = vadd.f32 %v2211_v63, %v4734_v52 }
0x15b0   :  { %4096 = vtanh.f32 %v2213_v0 }
0x15ba   :  { %v4097_v1 = vpop.eup %4096 }
0x15bb   :  { %2217 = vrot.lane.b32.xlu1 %v4097_v1, %s4181_s22 }
0x15bf   :  { %607 = vrot.lane.b32.xlu1 %v4388_v28, %s4182_s7  ;;  %v2215_v28 = vsub.f32 1.0, %v4091_v22  ;;  %v2124_v22 = vld [vmem:[%s4960_s2 + $0x70] sm:$0xff] }
0x15c0   :  { %v3901_v59 = vpack.c.bf16 %v2125_v39, %v2124_v22 }
0x15c2   :  { %3902 = vmatpush3.bf16.msra.mxu0 %v3901_v59 }
0x15c3   :  { %1074 = vrot.lane.b32.xlu1 %v4461_v17, %s4182_s7  ;;  %3909 = vmatprep.subr.bf16.mxu0 %v4178_v7 }
0x15c5   :  { %3670 = vmatmul.mubr.f32.vlgmr.msra.gmra.mrb[22].mxu0 %v4179_v13 }
0x15c6   :  { %3911 = vmatpush3.bf16.msra.mxu0 %v4612_v30  ;;  %3691 = vmatprep.mubr.msk.f32.mxu0 %vm4180_vm0, %v4179_v13 }
0x15c7   :  { %1645 = vrot.lane.b32.xlu1 %v4640_v34, %s4181_s22  ;;  %3912 = vmatprep.subr.bf16.mxu0 %v4178_v7 }
0x15ca   :  { %3914 = vmatpush3.bf16.msra.mxu0 %v4620_v33 }
0x15cb   :  { %3921 = vmatprep.subr.bf16.mxu0 %v4178_v7 }
0x15f2   :  { %v1863_v2 = vpop.permute.xlu0 %1862 }
0x15f3   :  { %v1865_v6 = vadd.f32 %v1863_v2, %v4338_v56 }
0x15f5   :  { %4098 = vtanh.f32 %v1865_v6 }
0x15ff   :  { %v4099_v50 = vpop.eup %4098 }
0x1600   :  { %1869 = vrot.lane.b32.xlu0 %v4099_v50, %s4181_s22 }
0x1604   :  { %375 = vrot.lane.b32.xlu0 %v4351_v27, %s4182_s7 }
0x1608   :  { %842 = vrot.lane.b32.xlu0 %v4423_v20, %s4182_s7  ;;  %v1867_v20 = vsub.f32 1.0, %v4095_v48 }
0x160c   :  { %1412 = vrot.lane.b32.xlu0 %v4566_v31, %s4181_s22  ;;  %v1873_v31 = vrot.slane %v4640_v34, 6 }
0x160e   :  { %v1875_v12 = vmul.f32 %v4095_v48, %v1873_v31 }
0x162d   :  { %v2218_v17 = vpop.permute.xlu1 %2217 }
0x162e   :  { %v2220_v9 = vmul.f32 %v2218_v17, %v2215_v28 }
0x1630   :  { %v4757_v10 = vadd.f32 %v2221_v8, %v2220_v9 }
0x1631   :  { %v608_v56 = vpop.permute.xlu1 %607 }
0x1632   :  { %611 = vst.msk [vmem:[#allocation2 + $0x8] sm:$0x30] %vm610_vm9, %v608_v56  ;;  %2338 = vrot.lane.b32.xlu1 %v4757_v10, %s4181_s22  ;;  %v2441_v54 = vrot.slane %v4757_v10, 6 }
0x1635   :  { %v1075_v11 = vpop.permute.xlu1 %1074 }
0x1636   :  { %1078 = vst.msk [vmem:[#allocation2 + $0x8] sm:$0x3] %vm1077_vm7, %v1075_v11 }
0x1637   :  { %1186 = vst.msk [vmem:[#allocation2 + $0x8] sm:$0x3] %vm258_vm4, %v4530_v25 }
0x1639   :  { %v1646_v27 = vpop.permute.xlu1 %1645 }
0x163a   :  { %1648 = vst.msk [vmem:[#allocation2 + $0x8] sm:$0x30] %vm724_vm8, %v1646_v27 }
0x1672   :  { %v1870_v45 = vpop.permute.xlu0 %1869 }
0x1673   :  { %v1872_v15 = vmul.f32 %v1870_v45, %v1867_v20 }
0x1675   :  { %v1876_v16 = vadd.f32 %v1875_v12, %v1872_v15 }
0x1676   :  { %v376_v5 = vpop.permute.xlu0 %375 }
0x1677   :  { %379 = vst.msk [vmem:[#allocation2 + $0x8] sm:$0xc0] %vm378_vm10, %v376_v5  ;;  %1878 = vrot.lane.b32.xlu0 %v1876_v16, %s4181_s22 }
0x167a   :  { %v843_v19 = vpop.permute.xlu0 %842 }
0x167b   :  { %846 = vst.msk [vmem:[#allocation2 + $0x8] sm:$0xc] %vm845_vm11, %v843_v19 }
0x167e   :  { %v1413_v21 = vpop.permute.xlu0 %1412 }
0x167f   :  { %1415 = vst.msk [vmem:[#allocation2 + $0x8] sm:$0xc] %vm489_vm5, %v1413_v21 }
0x1698   :  { %v4815_v1 = vpop.f32.mrb[22].mxu0 }
0x1699   :  { %v3671_v2 = vpop.f32.mrb[23].mxu0 }
0x16a4   :  { %v2339_v34 = vpop.permute.xlu1 %2338 }
0x16e9   :  { %v1879_v25 = vpop.permute.xlu0 %1878 }
0x16ea   :  { %1881 = vst.msk [vmem:[#allocation2 + $0x8] sm:$0xc0] %vm959_vm6, %v1879_v25 }
0x16f1   :  { %v2000_v24 = vld [vmem:[#allocation2 + $0x8] sm:$0xff] }
0x16f2   :  { %3317 = vmatmul.mubr.msk.f32.gmra.mrb[18].mxu1 %vm2030_vm12, %v2000_v24 }
0x16f3   :  { %3680 = vmatprep.mubr.msk.f32.mxu1 %vm4180_vm0, %v4179_v13 }
0x16f6   :  { %3681 = vmatmul.mubr.msk.f32.vlgmr.msra.gmra.mrb[20].mxu1 %vm57_vm1, %v2339_v34 }
0x16f7   :  { %3917 = vmatpush3.bf16.msra.mxu1 %v4612_v30  ;;  %3702 = vmatprep.mubr.msk.f32.mxu1 %vm4180_vm0, %v4179_v13 }
0x16f8   :  { %3918 = vmatprep.subr.bf16.mxu1 %v4178_v7 }
0x16fb   :  { %3920 = vmatpush3.bf16.msra.mxu1 %v4620_v33 }
0x16fc   :  { %3927 = vmatprep.subr.bf16.mxu1 %v4178_v7 }
0x17c5   :  { %v4782_v4 = vpop.f32.mrb[18].mxu1 }
0x17c6   :  { %v4784_v32 = vpop.f32.mrb[19].mxu1 }
0x17c9   :  { %v2408_v51 = vpop.f32.mrb[20].mxu1 }
0x17ca   :  { %v2422_v36 = vadd.f32 %v4658_v29, %v2408_v51  ;;  %v3682_v37 = vpop.f32.mrb[21].mxu1  ;;  %v2413_v3 = vrot.slane %v2408_v51, 6 }
0x17cc   :  { %v2424_v42 = vrot.slane %v2422_v36, 6  ;;  %v2415_v43 = vadd.f32 %v2413_v3, %v4734_v52 }
0x17ce   :  { %2425 = vrot.lane.b32.xlu0 %v2424_v42, %s4183_s8  ;;  %v3323_v14 = vmul.f32 -1.442695, %v2415_v43 }
0x17d0   :  { %4100 = vpow2.f32 %v3323_v14 }
0x17da   :  { %v4101_v35 = vpop.eup %4100 }
0x17db   :  { %v2419_v44 = vadd.f32 1.0, %v4101_v35 }
0x17dd   :  { %4102 = vrcp.f32 %v2419_v44 }
0x17e7   :  { %v4103_v47 = vpop.eup %4102 }
0x17e8   :  { %v2435_v26 = vsub.f32 1.0, %v4103_v47  ;;  %v2443_v60 = vmul.f32 %v4103_v47, %v2441_v54 }
0x1840   :  { %v2426_v53 = vpop.permute.xlu0 %2425 }
0x1841   :  { %v2428_v40 = vmul.f32 %v4103_v47, %v2426_v53 }
0x1843   :  { %2430 = vrot.lane.b32.xlu1 %v2428_v40, %s4183_s8 }
0x18b5   :  { %v2431_v23 = vpop.permute.xlu1 %2430 }
0x18b6   :  { %v2433_v18 = vadd.f32 %v2431_v23, %v4734_v52 }
0x18b8   :  { %4104 = vtanh.f32 %v2433_v18 }
0x18c2   :  { %v4105_v61 = vpop.eup %4104 }
0x18c3   :  { %2437 = vrot.lane.b32.xlu0 %v4105_v61, %s4181_s22 }
0x1935   :  { %v2438_v48 = vpop.permute.xlu0 %2437 }
0x1936   :  { %v2440_v62 = vmul.f32 %v2438_v48, %v2435_v26 }
0x1938   :  { %v2444_v63 = vadd.f32 %v2443_v60, %v2440_v62 }
0x193a   :  { %v2446_v0 = vrot.slane %v2444_v63, 2  ;;  %v2550_v5 = vrot.slane %v2444_v63, 6 }
0x193c   :  { %2447 = vrot.lane.b32.xlu1 %v2446_v0, %s4181_s22  ;;  %v4856_v0 = vadd.f32 %v4782_v4, %v4731_v49 }
0x19ae   :  { %v2448_v6 = vpop.permute.xlu1 %2447 }
0x19af   :  { %3692 = vmatmul.mubr.msk.f32.vlgmr.msra.gmra.mrb[24].mxu0 %vm57_vm1, %v2448_v6 }
0x19b0   :  { %3923 = vmatpush3.bf16.msra.mxu0 %v4612_v30  ;;  %3713 = vmatprep.mubr.msk.f32.mxu0 %vm4180_vm0, %v4179_v13 }
0x19b1   :  { %3924 = vmatprep.subr.bf16.mxu0 %v4178_v7 }
0x19b4   :  { %3926 = vmatpush3.bf16.msra.mxu0 %v4620_v33 }
0x19b5   :  { %3933 = vmatprep.subr.bf16.mxu0 %v4178_v7 }
0x1a82   :  { %v2517_v50 = vpop.f32.mrb[24].mxu0 }
0x1a83   :  { %v2531_v28 = vadd.f32 %v4658_v29, %v2517_v50  ;;  %v3693_v17 = vpop.f32.mrb[25].mxu0  ;;  %v2522_v9 = vrot.slane %v2517_v50, 4 }
0x1a85   :  { %v2533_v8 = vrot.slane %v2531_v28, 4  ;;  %v2524_v10 = vadd.f32 %v2522_v9, %v4734_v52 }
0x1a87   :  { %2534 = vrot.lane.b32.xlu0 %v2533_v8, %s4183_s8  ;;  %v3325_v56 = vmul.f32 -1.442695, %v2524_v10 }
0x1a89   :  { %4106 = vpow2.f32 %v3325_v56 }
0x1a93   :  { %v4107_v11 = vpop.eup %4106 }
0x1a94   :  { %v2528_v27 = vadd.f32 1.0, %v4107_v11 }
0x1a96   :  { %4108 = vrcp.f32 %v2528_v27 }
0x1aa0   :  { %v4109_v20 = vpop.eup %4108 }
0x1aa1   :  { %v2544_v19 = vsub.f32 1.0, %v4109_v20  ;;  %v2552_v25 = vmul.f32 %v4109_v20, %v2550_v5 }
0x1af9   :  { %v2535_v31 = vpop.permute.xlu0 %2534 }
0x1afa   :  { %v2537_v45 = vmul.f32 %v4109_v20, %v2535_v31 }
0x1afc   :  { %2539 = vrot.lane.b32.xlu1 %v2537_v45, %s4183_s8 }
0x1b6e   :  { %v2540_v12 = vpop.permute.xlu1 %2539 }
0x1b6f   :  { %v2542_v15 = vadd.f32 %v2540_v12, %v4734_v52 }
0x1b71   :  { %4110 = vtanh.f32 %v2542_v15 }
0x1b7b   :  { %v4111_v16 = vpop.eup %4110 }
0x1b7c   :  { %2546 = vrot.lane.b32.xlu0 %v4111_v16, %s4181_s22 }
0x1bee   :  { %v2547_v21 = vpop.permute.xlu0 %2546 }
0x1bef   :  { %v2549_v24 = vmul.f32 %v2547_v21, %v2544_v19 }
0x1bf1   :  { %v2553_v34 = vadd.f32 %v2552_v25, %v2549_v24 }
0x1bf3   :  { %v2555_v51 = vrot.slane %v2553_v34, 4  ;;  %v2659_v58 = vrot.slane %v2553_v34, 6 }
0x1bf5   :  { %2556 = vrot.lane.b32.xlu1 %v2555_v51, %s4181_s22 }
0x1c67   :  { %v2557_v36 = vpop.permute.xlu1 %2556 }
0x1c68   :  { %3703 = vmatmul.mubr.msk.f32.vlgmr.msra.gmra.mrb[22].mxu1 %vm57_vm1, %v2557_v36 }
0x1c69   :  { %3929 = vmatpush3.bf16.msra.mxu1 %v4612_v30  ;;  %3724 = vmatprep.mubr.msk.f32.mxu1 %vm4180_vm0, %v4179_v13 }
0x1c6a   :  { %3930 = vmatprep.subr.bf16.mxu1 %v4178_v7 }
0x1c6d   :  { %3932 = vmatpush3.bf16.msra.mxu1 %v4620_v33 }
0x1c6e   :  { %3939 = vmatprep.subr.bf16.mxu1 %v4178_v7 }
0x1d3b   :  { %v2626_v37 = vpop.f32.mrb[22].mxu1 }
0x1d3c   :  { %v2640_v42 = vadd.f32 %v4658_v29, %v2626_v37  ;;  %v3704_v3 = vpop.f32.mrb[23].mxu1  ;;  %v2631_v14 = vrot.slane %v2626_v37, 2 }
0x1d3e   :  { %v2642_v43 = vrot.slane %v2640_v42, 2  ;;  %v2633_v35 = vadd.f32 %v2631_v14, %v4734_v52 }
0x1d40   :  { %2643 = vrot.lane.b32.xlu0 %v2642_v43, %s4183_s8  ;;  %v3327_v44 = vmul.f32 -1.442695, %v2633_v35 }
0x1d42   :  { %4112 = vpow2.f32 %v3327_v44 }
0x1d4c   :  { %v4113_v47 = vpop.eup %4112 }
0x1d4d   :  { %v2637_v53 = vadd.f32 1.0, %v4113_v47 }
0x1d4f   :  { %4114 = vrcp.f32 %v2637_v53 }
0x1d59   :  { %v4115_v40 = vpop.eup %4114 }
0x1d5a   :  { %v2653_v39 = vsub.f32 1.0, %v4115_v40  ;;  %v2661_v61 = vmul.f32 %v4115_v40, %v2659_v58 }
0x1db2   :  { %v2644_v23 = vpop.permute.xlu0 %2643 }
0x1db3   :  { %v2646_v18 = vmul.f32 %v4115_v40, %v2644_v23 }
0x1db5   :  { %2648 = vrot.lane.b32.xlu1 %v2646_v18, %s4183_s8 }
0x1e27   :  { %v2649_v55 = vpop.permute.xlu1 %2648 }
0x1e28   :  { %v2651_v57 = vadd.f32 %v2649_v55, %v4734_v52 }
0x1e2a   :  { %4116 = vtanh.f32 %v2651_v57 }
0x1e34   :  { %v4117_v22 = vpop.eup %4116 }
0x1e35   :  { %2655 = vrot.lane.b32.xlu0 %v4117_v22, %s4181_s22 }
0x1ea7   :  { %v2656_v59 = vpop.permute.xlu0 %2655 }
0x1ea8   :  { %v2658_v54 = vmul.f32 %v2656_v59, %v2653_v39 }
0x1eaa   :  { %v2662_v26 = vadd.f32 %v2661_v61, %v2658_v54 }
0x1eac   :  { %v2664_v48 = vrot.slane %v2662_v26, 6 }
0x1eae   :  { %2665 = vrot.lane.b32.xlu1 %v2664_v48, %s4181_s22 }
0x1f20   :  { %v2666_v60 = vpop.permute.xlu1 %2665 }
0x1f21   :  { %3714 = vmatmul.mubr.msk.f32.vlgmr.msra.gmra.mrb[26].mxu0 %vm57_vm1, %v2666_v60 }
0x1f22   :  { %3935 = vmatpush3.bf16.msra.mxu0 %v4612_v30  ;;  %3735 = vmatprep.mubr.msk.f32.mxu0 %vm4180_vm0, %v4179_v13 }
0x1f23   :  { %3936 = vmatprep.subr.bf16.mxu0 %v4178_v7 }
0x1f26   :  { %3938 = vmatpush3.bf16.msra.mxu0 %v4620_v33 }
0x1f27   :  { %3945 = vmatprep.subr.bf16.mxu0 %v4178_v7 }
0x1ff4   :  { %v2735_v52 = vpop.f32.mrb[26].mxu0 }
0x1ff5   :  { %v2746_v62 = vadd.f32 %v4658_v29, %v2735_v52  ;;  %v3715_v63 = vpop.f32.mrb[27].mxu0  ;;  %v2739_v2 = vadd.f32 %v2735_v52, %v4856_v0 }
0x1ff6   :  { %v2294_v63 = vrot.slane %v4815_v1, 2 }
0x1ff7   :  { %2748 = vrot.lane.b32.xlu0 %v2746_v62, %s4183_s8  ;;  %v3329_v6 = vmul.f32 -1.442695, %v2739_v2 }
0x1ff9   :  { %4118 = vpow2.f32 %v3329_v6 }
0x2003   :  { %v4119_v50 = vpop.eup %4118 }
0x2004   :  { %v2743_v28 = vadd.f32 1.0, %v4119_v50 }
0x2006   :  { %4120 = vrcp.f32 %v2743_v28 }
0x2010   :  { %v4121_v17 = vpop.eup %4120 }
0x2011   :  { %v2758_v49 = vsub.f32 1.0, %v4121_v17  ;;  %v2765_v27 = vmul.f32 %v4121_v17, %v2664_v48 }
0x2069   :  { %v2749_v8 = vpop.permute.xlu0 %2748 }
0x206a   :  { %v2751_v9 = vmul.f32 %v4121_v17, %v2749_v8 }
0x206c   :  { %2753 = vrot.lane.b32.xlu1 %v2751_v9, %s4183_s8 }
0x20de   :  { %v2754_v10 = vpop.permute.xlu1 %2753 }
0x20df   :  { %v2756_v56 = vadd.f32 %v2754_v10, %v4856_v0 }
0x20e1   :  { %4122 = vtanh.f32 %v2756_v56 }
0x20eb   :  { %v4123_v11 = vpop.eup %4122 }
0x20ec   :  { %2760 = vrot.lane.b32.xlu0 %v4123_v11, %s4181_s22 }
0x215e   :  { %v2761_v4 = vpop.permute.xlu0 %2760 }
0x215f   :  { %v2763_v20 = vmul.f32 %v2761_v4, %v2758_v49 }
0x2161   :  { %v2766_v31 = vadd.f32 %v2765_v27, %v2763_v20 }
0x2163   :  { %2768 = vrot.lane.b32.xlu1 %v2766_v31, %s4181_s22  ;;  %v2871_v3 = vrot.slane %v2766_v31, 6 }
0x21d5   :  { %v2769_v45 = vpop.permute.xlu1 %2768 }
0x21d6   :  { %3725 = vmatmul.mubr.msk.f32.vlgmr.msra.gmra.mrb[24].mxu1 %vm57_vm1, %v2769_v45 }
0x21d7   :  { %3941 = vmatpush3.bf16.msra.mxu1 %v4612_v30  ;;  %3746 = vmatprep.mubr.msk.f32.mxu1 %vm4180_vm0, %v4179_v13 }
0x21d8   :  { %3942 = vmatprep.subr.bf16.mxu1 %v4178_v7 }
0x21db   :  { %3944 = vmatpush3.bf16.msra.mxu1 %v4620_v33 }
0x21dc   :  { %3951 = vmatprep.subr.bf16.mxu1 %v4178_v7 }
0x22a9   :  { %v2838_v12 = vpop.f32.mrb[24].mxu1 }
0x22aa   :  { %v2852_v15 = vadd.f32 %v4658_v29, %v2838_v12  ;;  %v3726_v16 = vpop.f32.mrb[25].mxu1  ;;  %v2843_v19 = vrot.slane %v2838_v12, 6 }
0x22ac   :  { %v2854_v5 = vrot.slane %v2852_v15, 6  ;;  %v2845_v21 = vadd.f32 %v2843_v19, %v4856_v0 }
0x22ae   :  { %2855 = vrot.lane.b32.xlu0 %v2854_v5, %s4183_s8  ;;  %v3331_v30 = vmul.f32 -1.442695, %v2845_v21 }
0x22b0   :  { %4124 = vpow2.f32 %v3331_v30 }
0x22ba   :  { %v4125_v25 = vpop.eup %4124 }
0x22bb   :  { %v2849_v24 = vadd.f32 1.0, %v4125_v25 }
0x22bd   :  { %4126 = vrcp.f32 %v2849_v24 }
0x22c7   :  { %v4127_v34 = vpop.eup %4126 }
0x22c8   :  { %v2865_v43 = vsub.f32 1.0, %v4127_v34  ;;  %v2873_v44 = vmul.f32 %v4127_v34, %v2871_v3 }
0x2320   :  { %v2856_v51 = vpop.permute.xlu0 %2855 }
0x2321   :  { %v2858_v33 = vmul.f32 %v4127_v34, %v2856_v51 }
0x2323   :  { %2860 = vrot.lane.b32.xlu1 %v2858_v33, %s4183_s8 }
0x2395   :  { %v2861_v36 = vpop.permute.xlu1 %2860 }
0x2396   :  { %v2863_v37 = vadd.f32 %v2861_v36, %v4856_v0  ;;  %v2027_v36 = vrot.slane %v4726_v46, %v53_v41  ;;  %v3100_v41 = vld [vmem:[%s4962_s4 + $0x38] sm:$0xff] }
0x2397   :  { %v3949_v46 = vpack.c.bf16 %v3100_v41, %v3099_v38 }
0x2398   :  { %4128 = vtanh.f32 %v2863_v37  ;;  %v2111_v3 = vadd.f32 %v4784_v32, %v2027_v36  ;;  %v3093_v32 = vld [vmem:[%s4962_s4] sm:$0xff] }
0x23a2   :  { %v4129_v42 = vpop.eup %4128 }
0x23a3   :  { %2867 = vrot.lane.b32.xlu0 %v4129_v42, %s4181_s22 }
0x2415   :  { %v2868_v14 = vpop.permute.xlu0 %2867 }
0x2416   :  { %v2870_v35 = vmul.f32 %v2868_v14, %v2865_v43  ;;  %v3097_v43 = vld [vmem:[%s4962_s4 + $0x20] sm:$0xff]  ;;  %v3098_v14 = vld [vmem:[%s4962_s4 + $0x28] sm:$0xff] }
0x2418   :  { %v2874_v47 = vadd.f32 %v2873_v44, %v2870_v35  ;;  %v3946_v44 = vpack.c.bf16 %v3098_v14, %v3097_v43 }
0x241a   :  { %v2876_v53 = vrot.slane %v2874_v47, 2  ;;  %v2980_v2 = vrot.slane %v2874_v47, 6 }
0x241c   :  { %2877 = vrot.lane.b32.xlu1 %v2876_v53, %s4181_s22  ;;  %v3095_v53 = vld [vmem:[%s4962_s4 + $0x10] sm:$0xff] }
0x248e   :  { %v2878_v40 = vpop.permute.xlu1 %2877 }
0x248f   :  { %3736 = vmatmul.mubr.msk.f32.vlgmr.msra.gmra.mrb[28].mxu0 %vm57_vm1, %v2878_v40 }
0x2490   :  { %3757 = vmatprep.mubr.msk.f32.mxu0 %vm4180_vm0, %v4179_v13  ;;  %3947 = vmatpush3.bf16.msra.mxu0 %v3946_v44 }
0x2491   :  { %3948 = vmatprep.subr.bf16.mxu0 %v4178_v7 }
0x2494   :  { %3950 = vmatpush3.bf16.msra.mxu0 %v3949_v46 }
0x2562   :  { %v2947_v23 = vpop.f32.mrb[28].mxu0 }
0x2563   :  { %v2961_v18 = vadd.f32 %v4658_v29, %v2947_v23  ;;  %v3737_v55 = vpop.f32.mrb[29].mxu0  ;;  %v2952_v22 = vrot.slane %v2947_v23, 4  ;;  %v3096_v23 = vld [vmem:[%s4962_s4 + $0x18] sm:$0xff] }
0x2564   :  { %v3955_v55 = vpack.c.bf16 %v3096_v23, %v3095_v53 }
0x2565   :  { %v2963_v57 = vrot.slane %v2961_v18, 4  ;;  %v2954_v58 = vadd.f32 %v2952_v22, %v4856_v0 }
0x2567   :  { %2964 = vrot.lane.b32.xlu0 %v2963_v57, %s4183_s8  ;;  %v3333_v39 = vmul.f32 -1.442695, %v2954_v58 }
0x2569   :  { %4130 = vpow2.f32 %v3333_v39 }
0x2573   :  { %v4131_v59 = vpop.eup %4130 }
0x2574   :  { %v2958_v61 = vadd.f32 1.0, %v4131_v59 }
0x2576   :  { %4132 = vrcp.f32 %v2958_v61 }
0x2580   :  { %v4133_v54 = vpop.eup %4132 }
0x2581   :  { %v2974_v6 = vsub.f32 1.0, %v4133_v54  ;;  %v2982_v28 = vmul.f32 %v4133_v54, %v2980_v2 }
0x25d9   :  { %v2965_v26 = vpop.permute.xlu0 %2964 }
0x25da   :  { %v2967_v48 = vmul.f32 %v4133_v54, %v2965_v26 }
0x25dc   :  { %2969 = vrot.lane.b32.xlu1 %v2967_v48, %s4183_s8 }
0x264e   :  { %v2970_v60 = vpop.permute.xlu1 %2969 }
0x264f   :  { %v2972_v52 = vadd.f32 %v2970_v60, %v4856_v0 }
0x2651   :  { %4134 = vtanh.f32 %v2972_v52 }
0x265b   :  { %v4135_v62 = vpop.eup %4134 }
0x265c   :  { %2976 = vrot.lane.b32.xlu0 %v4135_v62, %s4181_s22 }
0x2660   :  { %2313 = vrot.lane.b32.xlu0 %v4658_v29, %s4181_s22 }
0x2664   :  { %2295 = vrot.lane.b32.xlu0 %v2294_v63, %s4181_s22 }
0x26ce   :  { %v2977_v50 = vpop.permute.xlu0 %2976 }
0x26cf   :  { %v2979_v17 = vmul.f32 %v2977_v50, %v2974_v6 }
0x26d1   :  { %v4890_v8 = vadd.f32 %v2982_v28, %v2979_v17 }
0x26d2   :  { %v2314_v56 = vpop.permute.xlu0 %2313 }
0x26d3   :  { %v2985_v9 = vrot.slane %v4890_v8, 4  ;;  %v2316_v27 = vadd.f32 %v2314_v56, %v4815_v1  ;;  %v3089_v61 = vrot.slane %v4890_v8, 6  ;;  %v3338_v56 = vld [vmem:[%s4962_s4 + $0x40] ss:$0 sm:$0xff] }
0x26d5   :  { %2986 = vrot.lane.b32.xlu1 %v2985_v9, %s4181_s22  ;;  %v2318_v31 = vrot.slane %v2316_v27, 2 }
0x26d6   :  { %v2296_v15 = vpop.permute.xlu0 %2295 }
0x26d7   :  { %v2298_v16 = vadd.f32 %v2296_v15, %v4856_v0  ;;  %v2305_v22 = vadd.f32 %v2296_v15, %v2111_v3 }
0x26d9   :  { %v3320_v5 = vmul.f32 -1.442695, %v2298_v16  ;;  %v3321_v58 = vmul.f32 -1.442695, %v2305_v22 }
0x2747   :  { %v2987_v10 = vpop.permute.xlu1 %2986 }
0x2748   :  { %3747 = vmatmul.mubr.msk.f32.vlgmr.msra.gmra.mrb[26].mxu1 %vm57_vm1, %v2987_v10 }
0x2749   :  { %3768 = vmatprep.mubr.msk.f32.mxu1 %vm4180_vm0, %v4179_v13 }
0x281b   :  { %v3056_v11 = vpop.f32.mrb[26].mxu1 }
0x281c   :  { %v3070_v49 = vadd.f32 %v4658_v29, %v3056_v11  ;;  %v3748_v4 = vpop.f32.mrb[27].mxu1  ;;  %v3061_v45 = vrot.slane %v3056_v11, 2 }
0x281e   :  { %v3072_v20 = vrot.slane %v3070_v49, 2  ;;  %v3063_v12 = vadd.f32 %v3061_v45, %v4856_v0 }
0x2820   :  { %3073 = vrot.lane.b32.xlu1 %v3072_v20, %s4183_s8  ;;  %v3335_v13 = vmul.f32 -1.442695, %v3063_v12 }
0x2822   :  { %4136 = vpow2.f32 %v3335_v13 }
0x2823   :  { %4138 = vpow2.f32 %v3320_v5 }
0x2824   :  { %2319 = vrot.lane.b32.xlu1 %v2318_v31, %s4182_s7 }
0x282c   :  { %v4137_v29 = vpop.eup %4136 }
0x282d   :  { %v3067_v19 = vadd.f32 1.0, %v4137_v29  ;;  %v4139_v21 = vpop.eup %4138 }
0x282e   :  { %v2302_v1 = vadd.f32 1.0, %v4139_v21 }
0x282f   :  { %4140 = vrcp.f32 %v3067_v19 }
0x2830   :  { %4142 = vrcp.f32 %v2302_v1 }
0x2839   :  { %v4141_v30 = vpop.eup %4140 }
0x283a   :  { %v4143_v34 = vpop.eup %4142  ;;  %v3083_v54 = vsub.f32 1.0, %v4141_v30  ;;  %v3091_v60 = vmul.f32 %v4141_v30, %v3089_v61 }
0x2892   :  { %v3074_v25 = vpop.permute.xlu1 %3073 }
0x2893   :  { %v3076_v24 = vmul.f32 %v4141_v30, %v3074_v25 }
0x2895   :  { %3078 = vrot.lane.b32.xlu0 %v3076_v24, %s4183_s8 }
0x2896   :  { %v2320_v51 = vpop.permute.xlu1 %2319 }
0x2897   :  { %v2322_v33 = vmul.f32 %v4143_v34, %v2320_v51 }
0x2899   :  { %2324 = vrot.lane.b32.xlu1 %v2322_v33, %s4183_s8 }
0x2907   :  { %v3079_v37 = vpop.permute.xlu0 %3078 }
0x2908   :  { %v3081_v42 = vadd.f32 %v3079_v37, %v4856_v0  ;;  %v3094_v0 = vld [vmem:[%s4962_s4 + $0x8] sm:$0xff] }
0x2909   :  { %v3952_v40 = vpack.c.bf16 %v3094_v0, %v3093_v32 }
0x290a   :  { %4144 = vtanh.f32 %v3081_v42 }
0x290b   :  { %v2325_v35 = vpop.permute.xlu1 %2324  ;;  %3953 = vmatpush3.bf16.msra.mxu1 %v3952_v40 }
0x290c   :  { %v2327_v47 = vadd.f32 %v2325_v35, %v2111_v3  ;;  %3954 = vmatprep.subr.bf16.mxu1 %v4178_v7 }
0x290e   :  { %4146 = vtanh.f32 %v2327_v47 }
0x290f   :  { %3956 = vmatpush3.bf16.msra.mxu1 %v3955_v55  ;;  %4148 = vpow2.f32 %v3321_v58 }
0x2914   :  { %v4145_v18 = vpop.eup %4144 }
0x2915   :  { %3085 = vrot.lane.b32.xlu0 %v4145_v18, %s4181_s22 }
0x2918   :  { %v4147_v57 = vpop.eup %4146 }
0x2919   :  { %2331 = vrot.lane.b32.xlu1 %v4147_v57, %s4181_s22  ;;  %v4149_v39 = vpop.eup %4148 }
0x291a   :  { %v2309_v59 = vadd.f32 1.0, %v4149_v39 }
0x291c   :  { %4150 = vrcp.f32 %v2309_v59 }
0x2926   :  { %v4151_v26 = vpop.eup %4150 }
0x2927   :  { %v2329_v63 = vsub.f32 1.0, %v4151_v26  ;;  %v2335_v6 = vmul.f32 0.0, %v4151_v26 }
0x2987   :  { %v3086_v48 = vpop.permute.xlu0 %3085 }
0x2988   :  { %v3088_v52 = vmul.f32 %v3086_v48, %v3083_v54 }
0x298a   :  { %v3092_v62 = vadd.f32 %v3091_v60, %v3088_v52 }
0x298b   :  { %v2332_v7 = vpop.permute.xlu1 %2331 }
0x298c   :  { %v3177_v2 = vrot.slane %v3092_v62, 6  ;;  %v2334_v50 = vmul.f32 %v2332_v7, %v2329_v63 }
0x298e   :  { %v2336_v28 = vadd.f32 %v2335_v6, %v2334_v50  ;;  %3178 = vrot.lane.b32.xlu0 %v3177_v2, %s4181_s22  ;;  %s4153_s22 = scalar_lea.vmem %s3265_s0, 32 }
0x298f   :  { %p4154_p0 = scmp.ne.s32.totalorder %s3265_s0, %s4153_s22  ;;  %p4159_p2 = scmp.lt.s32.totalorder %s4153_s22, %s4153_s22 }
0x2990   :  { %v3103_v17 = vrot.slane %v2336_v28, 6 }
0x2991   :  { %p4160_p3 = por %p4159_p2, %p4158_p1 }
0x2992   :  { %3758 = vmatmul.mubr.msk.f32.vlgmr.msra.gmra.mrb[30].mxu0 %vm57_vm1, %v3103_v17 }
0x2993   :  { %p4161_p4 = pnand %p4160_p3, %p4154_p0 }
0x2a00   :  { %v3179_v9 = vpop.permute.xlu0 %3178 }
0x2a01   :  { %3769 = vmatmul.mubr.msk.f32.vlgmr.msra.gmra.mrb[28].mxu1 %vm57_vm1, %v3179_v9 }
0x2a65   :  { %v3172_v8 = vpop.f32.mrb[30].mxu0 }
0x2a66   :  { %v3759_v10 = vpop.f32.mrb[31].mxu0 }
0x2ad4   :  { %v3248_v11 = vpop.f32.mrb[28].mxu1 }
0x2ad5   :  { %v3249_v49 = vadd.f32 %v3248_v11, %v3172_v8  ;;  %v3770_v4 = vpop.f32.mrb[29].mxu1 }
0x2ad7   :  { %v3256_v27 = vadd.f32 %v3338_v56, %v3249_v49 }
0x2ad9   :  { %3257 = vst.msk [vmem:[#allocation3] sm:$0x3] %vm258_vm4, %v3256_v27 }
0x2ada   :  { %4164 = shalt.err (!%p4161_p4)
}
0x2adb   :  { %s4165_s4 = scalar_lea.hbm %s4963_s5, 32 }
0x2adc   :  { %p4166_p5 = scmp.ne.s32.totalorder %s4963_s5, %s4165_s4  ;;  %p4169_p6 = scmp.lt.u32.totalorder %s4165_s4, %s4963_s5 }
0x2ade   :  { %p4171_p7 = pnand %p4169_p6, %p4166_p5 }
0x2ae0   :  { %4174 = shalt.err (!%p4171_p7)
}
0x2ae1   :  { %3267 = dma.vmem_to_hbm [thread:$0]  %s3265_s0, 32, %s4963_s5, [#allocation4]  }
0x2ae2   :  { %4175 = dma.done.wait [#allocation4], 32  }
0x2ae3   :  { %4176 = vsyncadd [#allocation4], 4294967264 }
0x2ae4   :  { %3271 = vsyncpa [#allocation4], 1 }

</bundles_post_ra>
